<compile_context>
chip_gen: v5e
topology: v5e:2x2
jax: 0.10.0
libtpu: 0.0.40
codegen_flags: <defaults>
</compile_context>

<pallas_src>
import math

import jax
import jax.numpy as jnp
from jax.experimental import pallas as pl
from jax.experimental.pallas import tpu as pltpu

CHUNK_SIZE = 32


def _round_up(x, m):
    return ((x + m - 1) // m) * m


# --------------------------------------------------------------------------
# Kernel 1: tiled matmul + bias (out = x @ W_kn + b), f32 accumulation
# directly into the resident output block (k is the innermost reduction axis).
# --------------------------------------------------------------------------
def _matmul_bias_kernel(x_ref, w_ref, b_ref, out_ref):
    k = pl.program_id(2)

    @pl.when(k == 0)
    def _init_with_bias():
        out_ref[...] = jnp.broadcast_to(b_ref[...], out_ref.shape)

    out_ref[...] += jnp.dot(x_ref[...], w_ref[...],
                            preferred_element_type=jnp.float32)


# --------------------------------------------------------------------------
# Kernel 2: group-lasso chunk partials over W in native [out, in] layout.
# Emits P[c, kf] = sum over the 32 out-rows of chunk c of W[row, kf]^2,
# chunk-major and lane-dense, written exactly once per block (pure VPU/XLU
# reshape-sum; no MXU, no scratch, no read-modify-write).
# --------------------------------------------------------------------------
def _group_lasso_partials_kernel(w_ref, p_ref):
    w = w_ref[...].astype(jnp.float32)       # keep lasso math in f32 (v5e VPU)
    sq = w * w                                # (tn, tk)
    tn, tk = sq.shape
    p_ref[...] = sq.reshape(tn // CHUNK_SIZE, CHUNK_SIZE, tk).sum(axis=1)


def pruned_linear_forward(x, w, b, *, compute_dtype=None):
    """x: [B, in_f]; w: [out_f, in_f] (nn.Linear layout); b: [out_f].

    Returns (out [B, out_f] in x.dtype, gl_loss f32 scalar)."""
    B, in_f = x.shape
    out_f, in_f2 = w.shape
    assert in_f == in_f2 and b.shape == (out_f,)

    feed_dt = jnp.dtype(compute_dtype) if compute_dtype is not None else jnp.dtype(x.dtype)
    bpe = feed_dt.itemsize

    # ------------------ linear: out = x @ W.T + b --------------------------
    if B >= 512:
        tm = 512
    elif B > 256:
        tm = 256
    else:
        tm = _round_up(B, 8)
    tk = _round_up(in_f, 128) if in_f <= 1024 else 512    # collapse K if small
    tn = _round_up(out_f, 128) if out_f <= 512 else 512
    m_pad, k_pad, n_pad = _round_up(B, tm), _round_up(in_f, tk), _round_up(out_f, tn)
    mt, nt, kt = m_pad // tm, n_pad // tn, k_pad // tk

    x_p = jnp.pad(x, ((0, m_pad - B), (0, k_pad - in_f))).astype(feed_dt)
    w_kn = jnp.pad(w.T, ((0, k_pad - in_f), (0, n_pad - out_f))).astype(feed_dt)
    b_p = jnp.pad(b.astype(jnp.float32), (0, n_pad - out_f)).reshape(1, n_pad)

    # double-buffered x / W / bias blocks + the resident f32 output block
    vmem_main = 2 * (tm * tk * bpe + tk * tn * bpe + tn * 4 + tm * tn * 4)
    vmem_main = int(min(48 * 2**20, max(16 * 2**20, 2 * vmem_main)))

    out_p = pl.pallas_call(
        _matmul_bias_kernel,
        out_shape=jax.ShapeDtypeStruct((m_pad, n_pad), jnp.float32),
        grid_spec=pltpu.PrefetchScalarGridSpec(
            num_scalar_prefetch=0,
            grid=(mt, nt, kt),
            in_specs=[
                pl.BlockSpec((tm, tk), lambda i, j, k: (i, k)),   # x
                pl.BlockSpec((tk, tn), lambda i, j, k: (k, j)),   # W.T  [K, N]
                pl.BlockSpec((1, tn), lambda i, j, k: (0, j)),    # bias
            ],
            out_specs=pl.BlockSpec((tm, tn), lambda i, j, k: (i, j)),
        ),
        compiler_params=pltpu.CompilerParams(
            dimension_semantics=("parallel", "parallel", "arbitrary"),
            vmem_limit_bytes=vmem_main,
        ),
    )(x_p, w_kn, b_p)
    out = out_p[:B, :out_f].astype(x.dtype)

    # ------------- group lasso v2: chunk sums of squares over W ------------
    tn_l = 512 if out_f > 256 else 256        # tn_l % 256 == 0  ->  tn_l//32 % 8 == 0
    tk_l = _round_up(in_f, 128) if in_f <= 1024 else 512
    n_pad_l, k_pad_l = _round_up(out_f, tn_l), _round_up(in_f, tk_l)
    nt_l, kt_l = n_pad_l // tn_l, k_pad_l // tk_l
    nc_rows = n_pad_l // CHUNK_SIZE

    w_nk = jnp.pad(w.astype(jnp.float32),
                   ((0, n_pad_l - out_f), (0, k_pad_l - in_f)))

    vmem_lasso = 2 * (tn_l * tk_l * 4 + (tn_l // CHUNK_SIZE) * tk_l * 4) * 2
    vmem_lasso = int(min(48 * 2**20, max(16 * 2**20, vmem_lasso)))

    p_chunks = pl.pallas_call(
        _group_lasso_partials_kernel,
        out_shape=jax.ShapeDtypeStruct((nc_rows, k_pad_l), jnp.float32),
        grid_spec=pltpu.PrefetchScalarGridSpec(
            num_scalar_prefetch=0,
            grid=(nt_l, kt_l),
            in_specs=[pl.BlockSpec((tn_l, tk_l), lambda j, k: (j, k))],
            out_specs=pl.BlockSpec((tn_l // CHUNK_SIZE, tk_l), lambda j, k: (j, k)),
        ),
        compiler_params=pltpu.CompilerParams(
            dimension_semantics=("parallel", "parallel"),
            vmem_limit_bytes=vmem_lasso,
        ),
    )(w_nk)

    # Reversed cumulative sum over chunks gives each cascade's per-input-feature
    # sum of squares; sqrt + global sum is the group-lasso loss.  Zero padding
    # (extra out rows / in columns / chunks) contributes exactly 0.
    # TODO(synk): this O(n_chunks*in_f) epilogue is left to XLA per the perf
    # review; it could be fused into a tiny Pallas finalize kernel if needed.
    cascade_sq = jnp.cumsum(p_chunks[::-1, :], axis=0)[::-1, :]
    gl_loss = jnp.sum(jnp.sqrt(cascade_sq))

    return out, gl_loss


def _reference(x, w, b):
    out_f = w.shape[0]
    n_chunks = out_f // CHUNK_SIZE + (out_f % CHUNK_SIZE != 0)
    gl = jnp.float32(0.0)
    for c in range(n_chunks):
        cascade = w[c * CHUNK_SIZE:, :]
        gl = gl + jnp.sum(jnp.sqrt(jnp.sum(cascade * cascade, axis=0)))
    out = jnp.matmul(x, w.T, precision=jax.lax.Precision.HIGHEST) + b
    return out, gl


if __name__ == "__main__":
    # grid (2, 2, 3) for the matmul, (2, 3) for the lasso; ragged last chunk
    batch, in_features, out_features = 400, 1536, 1000

    key = jax.random.PRNGKey(0)
    kx, kw, kb = jax.random.split(key, 3)
    bound = 1.0 / math.sqrt(in_features)
    x = jax.random.normal(kx, (batch, in_features), dtype=jnp.float32)
    w = jax.random.uniform(kw, (out_features, in_features),
                           minval=-bound, maxval=bound, dtype=jnp.float32)
    b = jax.random.uniform(kb, (out_features,),
                           minval=-bound, maxval=bound, dtype=jnp.float32)

    out, gl_loss = pruned_linear_forward(x, w, b)
    jax.block_until_ready((out, gl_loss))

    ref_out, ref_gl = _reference(x, w, b)
    assert out.shape == (batch, out_features)
    assert jnp.allclose(out, ref_out, atol=1e-2, rtol=1e-2), \
        float(jnp.max(jnp.abs(out - ref_out)))
    assert jnp.allclose(gl_loss, ref_gl, atol=1e-2, rtol=1e-3), \
        (float(gl_loss), float(ref_gl))

    print("KERNEL_OK")
</pallas_src>

<mosaic_0001>
module attributes {stable_mosaic.version = 11 : i64} {
  func.func @_matmul_bias_kernel(%arg0: i32, %arg1: i32, %arg2: i32, %arg3: memref<256x512xf32, #tpu.memory_space<vmem>>, %arg4: memref<512x512xf32, #tpu.memory_space<vmem>>, %arg5: memref<1x512xf32, #tpu.memory_space<vmem>>, %arg6: memref<256x512xf32, #tpu.memory_space<vmem>>) attributes {dimension_semantics = [#tpu.dimension_semantics<parallel>, #tpu.dimension_semantics<parallel>, #tpu.dimension_semantics<arbitrary>], iteration_bounds = array<i64: 2, 2, 3>, scalar_prefetch = 0 : i64, scratch_operands = 0 : i64, tpu.core_type = #tpu.core_type<tc>, window_params = [{transform_indices = @transform_0, window_bounds = array<i64: 256, 512>}, {transform_indices = @transform_1, window_bounds = array<i64: 512, 512>}, {transform_indices = @transform_2, window_bounds = array<i64: 1, 512>}, {transform_indices = @transform_3, window_bounds = array<i64: 256, 512>}]} {
    %c0_i32 = arith.constant 0 : i32
    %0 = arith.cmpi eq, %arg2, %c0_i32 : i32
    %1 = arith.extui %0 : i1 to i32
    %c0_i32_0 = arith.constant 0 : i32
    %2 = arith.cmpi ne, %1, %c0_i32_0 : i32
    scf.if %2 {
      %c0_8 = arith.constant 0 : index
      %c0_9 = arith.constant 0 : index
      %9 = vector.load %arg5[%c0_8, %c0_9] : memref<1x512xf32, #tpu.memory_space<vmem>>, vector<1x512xf32>
      %10 = vector.shape_cast %9 : vector<1x512xf32> to vector<1x512xf32>
      %11 = vector.broadcast %10 : vector<1x512xf32> to vector<256x512xf32>
      %c0_10 = arith.constant 0 : index
      %c0_11 = arith.constant 0 : index
      %12 = vector.load %arg6[%c0_10, %c0_11] : memref<256x512xf32, #tpu.memory_space<vmem>>, vector<256x512xf32>
      tpu.vector_store %arg6[%c0_10, %c0_11], %11 {strides = array<i32>} : memref<256x512xf32, #tpu.memory_space<vmem>>, vector<256x512xf32>,
    } else {
    }
    %c0 = arith.constant 0 : index
    %c0_1 = arith.constant 0 : index
    %3 = vector.load %arg6[%c0, %c0_1] : memref<256x512xf32, #tpu.memory_space<vmem>>, vector<256x512xf32>
    %c0_2 = arith.constant 0 : index
    %c0_3 = arith.constant 0 : index
    %4 = vector.load %arg3[%c0_2, %c0_3] : memref<256x512xf32, #tpu.memory_space<vmem>>, vector<256x512xf32>
    %c0_4 = arith.constant 0 : index
    %c0_5 = arith.constant 0 : index
    %5 = vector.load %arg4[%c0_4, %c0_5] : memref<512x512xf32, #tpu.memory_space<vmem>>, vector<512x512xf32>
    %cst = arith.constant dense<0.000000e+00> : vector<256x512xf32>
    %6 = tpu.matmul %4, %5, %cst {dimension_numbers = #tpu.dot_dimension_numbers<[1], [0], [0], [1], [0, 0, 1, 1], [], []>} : vector<256x512xf32>, vector<512x512xf32>, vector<256x512xf32> -> vector<256x512xf32>
    %7 = arith.addf %3, %6 : vector<256x512xf32>
    %c0_6 = arith.constant 0 : index
    %c0_7 = arith.constant 0 : index
    %8 = vector.load %arg6[%c0_6, %c0_7] : memref<256x512xf32, #tpu.memory_space<vmem>>, vector<256x512xf32>
    tpu.vector_store %arg6[%c0_6, %c0_7], %7 {strides = array<i32>} : memref<256x512xf32, #tpu.memory_space<vmem>>, vector<256x512xf32>,
    return
  }
  func.func @transform_0(%arg0: i32, %arg1: i32, %arg2: i32) -> (i32, i32) {
    %c0_i32 = arith.constant 0 : i32
    return %arg0, %arg2 : i32, i32
  }
  func.func @transform_1(%arg0: i32, %arg1: i32, %arg2: i32) -> (i32, i32) {
    %c0_i32 = arith.constant 0 : i32
    return %arg2, %arg1 : i32, i32
  }
  func.func @transform_2(%arg0: i32, %arg1: i32, %arg2: i32) -> (i32, i32) {
    %c0_i32 = arith.constant 0 : i32
    %c0_i32_0 = arith.constant 0 : i32
    return %c0_i32, %arg1 : i32, i32
  }
  func.func @transform_3(%arg0: i32, %arg1: i32, %arg2: i32) -> (i32, i32) {
    %c0_i32 = arith.constant 0 : i32
    return %arg0, %arg1 : i32, i32
  }
}

</mosaic_0001>

<bundles_post_ra>
// kernel: tpu_custom_call.1
= control target key start
LH: loop header
LB: loop body
LE: loop exit
PB: predicated region body
PF: predicated region fallthrough
CT: control target
= control target key end

     0   :  { %s5785_s0 = inlined_call_operand.hbm [shape: f32[512,1536], index: 0, kind: input, shape index: {}]   ;;  %s5786_s1 = inlined_call_operand.hbm [shape: f32[1536,1024], index: 1, kind: input, shape index: {}]   ;;  %s5787_s2 = inlined_call_operand.hbm [shape: f32[1,1024], index: 2, kind: input, shape index: {}]   ;;  %s5788_s3 = inlined_call_operand.hbm [shape: f32[512,1024], index: 3, kind: output, shape index: {}]  }
   0x1   :  { %5833 = sst [smem:[#allocation58_spill]] %s5785_s0 }
   0x2   :  { %5834 = sst [smem:[#allocation59_spill]] %s5786_s1 }
   0x3   :  { %5835 = sst [smem:[#allocation60_spill]] %s5787_s2 }
   0x4   :  { %5836 = sst [smem:[#allocation61_spill]] %s5788_s3 }
   0x5   :  { %8 = vsyncpa [#allocation3], 0 }
   0x6   :  { %10 = vsyncpa [#allocation3 + $0x1], 0 }
   0x7   :  { %11 = vsyncpa [#allocation6], 0 }
   0x8   :  { %13 = vsyncpa [#allocation6 + $0x1], 0 }
   0x9   :  { %14 = vsyncpa [#allocation4], 0 }
   0xa   :  { %16 = vsyncpa [#allocation4 + $0x1], 0  ;;  %s4020_s12 = smov 0   ;;  %s4022_s13 = smov 0  }
   0xb   :  { %s4024_s14 = smov 0   ;;  %s4026_s15 = smov 0  }
   0xc   :  { %s4028_s16 = smov 0   ;;  %s4030_s17 = smov 0  }
   0xd   :  { %s4032_s18 = smov 0   ;;  %s4034_s19 = smov 0  }
   0xe   :  { %s4036_s20 = smov 0   ;;  %s4038_s21 = smov 0  }
   0xf   :  { %s4040_s22 = smov 0   ;;  %s4042_s23 = smov 0  }
  0x10   :  { %s4044_s24 = smov 0   ;;  %s4046_s25 = smov 0  }
  0x11   :  { %s4048_s26 = smov 0   ;;  %s4050_s27 = smov 0  }
  0x12   :  { %s4052_s28 = smov 0   ;;  %s4054_s29 = smov 0  }
  0x13   :  { %s4056_s30 = smov 0  }
  0x14 LB: > { %5837 = sst [smem:[#allocation13_spill]] %s3919_s12  ;;  %s34_s4 = sadd.s32 1, %s3979_s27  ;;  %s3991_s30 = sphi %s4056_s30, %s22_s30   ;;  %s3987_s29 = sphi %s4054_s29, %s5953_s29   ;;  %s3983_s28 = sphi %s4052_s28, %s5964_s28   ;;  %s3979_s27 = sphi %s4050_s27, %s5950_s27   ;;  %s3975_s26 = sphi %s4048_s26, %s5949_s26   ;;  %s3971_s25 = sphi %s4046_s25, %s5963_s25   ;;  %s3967_s24 = sphi %s4044_s24, %s5948_s24   ;;  %s3963_s23 = sphi %s4042_s23, %s5962_s23   ;;  %s3959_s22 = sphi %s4040_s22, %s5961_s22   ;;  %s3955_s21 = sphi %s4038_s21, %s5960_s21   ;;  %s3951_s20 = sphi %s4036_s20, %s5946_s20   ;;  %s3947_s19 = sphi %s4034_s19, %s5959_s19   ;;  %s3943_s18 = sphi %s4032_s18, %s5958_s18   ;;  %s3939_s17 = sphi %s4030_s17, %s5957_s17   ;;  %s3935_s16 = sphi %s4028_s16, %s5956_s16   ;;  %s3931_s15 = sphi %s4026_s15, %s5944_s15   ;;  %s3927_s14 = sphi %s4024_s14, %s5954_s14   ;;  %s3923_s13 = sphi %s4022_s13, %s5952_s13   ;;  %s3919_s12 = sphi %s4020_s12, %s5943_s12  }
  0x15   : > { %5838 = sst [smem:[#allocation14_spill]] %s3923_s13  ;;  %s37_s5 = sadd.s32 1, %s3983_s28 }
  0x16   : > { %5839 = sst [smem:[#allocation15_spill]] %s3931_s15  ;;  %p35_p0 = scmp.ge.s32.totalorder %s34_s4, 3 }
  0x17   : > { %5840 = sst [smem:[#allocation16_spill]] %s3935_s16  ;;  %p58_p1 = scmp.eq.s32.totalorder %s3991_s30, 0 }
  0x18   : > { %5841 = sst [smem:[#allocation17_spill]] %s3951_s20  ;;  %s78_s6 = sadd.s32 1, %s3951_s20 }
  0x19   : > { %5842 = sst [smem:[#allocation18_spill]] %s3967_s24  ;;  %p85_p2 = scmp.ne.s32.totalorder %s3951_s20, %s3947_s19 }
  0x1a   : > { %5843 = sst [smem:[#allocation19_spill]] %s3971_s25  ;;  %s5966_s4 = smov (%p35_p0, %s34_s4), 0 }
  0x1b   : > { %5844 = sst [smem:[#allocation20_spill]] %s3975_s26  ;;  %s5968_s5 = smov (!%p35_p0, %s37_s5), %s3983_s28 }
  0x1c   : > { %5845 = sst [smem:[#allocation21_spill]] %s3979_s27  ;;  %s4128_s7 = ssub.s32 %s3979_s27, %s5966_s4 }
  0x1d   : > { %5846 = sst [smem:[#allocation22_spill]] %s3987_s29  ;;  %p4132_p3 = por %p85_p2, %p58_p1 }
  0x1e   : > { %5847 = sst [smem:[#allocation23_spill]] %s5966_s4  ;;  %p39_p4 = scmp.ge.s32.totalorder %s5968_s5, 2 }
  0x1f   : > { %p91_p5 = scmp.ne.s32.totalorder %s3947_s19, %s3943_s18  ;;  %p5801_p6 = scmp.lt.s32.totalorder %s3991_s30, 12 }
  0x20   : > { %s4143_s9 = scalar_select %p39_p4, 0, %s5968_s5  }
  0x21   : > { %s194_s11 = sand.u32 1, %s3991_s30   ;;  %s196_s3 = sand.u32 1, %s3951_s20  }
  0x22   : > { %5849 = sst [smem:[#allocation24_spill]] %s4143_s9  ;;  %s4147_s10 = ssub.s32 %s3983_s28, %s4143_s9 }
  0x23   : > { %s75_s4 = sor.u32 %s4147_s10, %s4128_s7  ;;  %s3195_s26 = sshll.u32 %s196_s3, 11 }
  0x24   : > { %p76_p7 = scmp.eq.s32.totalorder %s75_s4, 0  ;;  %s5795_s25 = sshll.u32 %s3983_s28, 2 }
  0x25   : > { %s3215_s2 = sshll.u32 %s3979_s27, 9  ;;  %s198_s13 = scalar_lea.vmem [#allocation5], %s3195_s26 }
  0x26   : > { %s4155_s24 = scalar_select %p76_p7, %s3951_s20, %s78_s6  }
  0x27   : > { %s204_s12 = sadd.s32 %s3215_s2, %s5795_s25  ;;  %s209_s15 = sshll.u32 %s198_s13, 4  ;;  %s210_s15 = int_to_ptr.vmem [resolvable:$true] %s209_s15 }
  0x28   : > { %5850 = sst [smem:[#allocation25_spill]] %s4155_s24  ;;  %s3199_s9 = sshll.u32 %s204_s12, 3 }
  0x29   : > { %s5851_s1 = sld [smem:[#allocation59_spill]]  ;;  %p3230_p8 = pnand %p5801_p6, %p4132_p3 }
  0x2a   : > { %s4167_s13 = scalar_lea.sflag [#allocation6], %s194_s11  ;;  %s3993_s12 = smov 1024  }
  0x2b   : > { %s5796_s26 = smov 512   ;;  %s5797_s16 = smov 32  }
  0x2c   : > { %p3202_p9 = scmp.ge.s32.totalorder %s3991_s30, 1  ;;  %p236_p10 = scmp.lt.s32.totalorder %s3991_s30, 13 }
  0x2d   : > { %s41_s8 = sadd.s32 1, %s3987_s29  ;;  %p57_p12 = scmp.ne.s32.totalorder %s3963_s23, %s3959_s22 }
  0x2e   : > { %p4174_p11 = pnand %p3202_p9, %p236_p10  ;;  %s5970_s8 = smov (!%p39_p4, %s41_s8), %s3987_s29 }
  0x2f   : > { %s206_s3 = scalar_lea.hbm %s5851_s1, %s3199_s9  ;;  %s50_s9 = sadd.s32 1, %s3963_s23 }
  0x30   : > { %s207_s2 = sshll.u32 %s206_s3, 4  ;;  %p43_p13 = scmp.ge.s32.totalorder %s5970_s8, 2  ;;  %s208_s2 = int_to_ptr.hbm [resolvable:$true] %s207_s2 }
  0x31   : > { %3232 = dma.hbm_to_vmem [thread:$0]  (!%p3230_p8), %s208_s2, 32768, %s210_s15, %s4167_s13, %s3993_s12, %s5796_s26, %s5797_s16  }
  0x32   : > { %p63_p0 = scmp.ne.s32.totalorder %s3959_s22, %s3955_s21  ;;  %p4189_p2 = por %p58_p1, %p57_p12 }
  0x33   : > { %s132_s11 = sadd.s32 1, %s3927_s14  ;;  %s5972_s8 = smov (%p43_p13, %s5970_s8), 0 }
  0x34   : > { %5854 = sst [smem:[#allocation26_spill]] %s5972_s8  ;;  %s169_s4 = sand.u32 1, %s3963_s23  }
  0x35   : > { %s3192_s3 = sshll.u32 %s3979_s27, 2  ;;  %s45_s5 = ssub.s32 %s3987_s29, %s5972_s8 }
  0x36   : > { %s47_s2 = sor.u32 %s4128_s7, %s45_s5  ;;  %s129_s12 = sor.u32 %s4147_s10, %s45_s5 }
  0x37   : > { %p48_p3 = scmp.eq.s32.totalorder %s47_s2, 0  ;;  %p130_p4 = scmp.eq.s32.totalorder %s129_s12, 0 }
  0x38   : > { %s3190_s25 = sshll.u32 %s169_s4, 10  ;;  %s3217_s26 = smul.u32 384, %s3987_s29 }
  0x39   : > { %s4204_s16 = scalar_select %p48_p3, %s3963_s23, %s50_s9  }
  0x3a   : > { %s4207_s1 = scalar_select %p130_p4, %s3927_s14, %s132_s11  }
  0x3b   : > { %5855 = sst [smem:[#allocation27_spill]] %s4204_s16  ;;  %s179_s24 = sadd.s32 %s3217_s26, %s3192_s3 }
  0x3c   : > { %s3194_s20 = sshll.u32 %s179_s24, 3  ;;  %s173_s8 = scalar_lea.vmem [#allocation2], %s3190_s25 }
  0x3d   : > { %s184_s7 = sshll.u32 %s173_s8, 4  ;;  %s5856_s0 = sld [smem:[#allocation58_spill]]  ;;  %s185_s7 = int_to_ptr.vmem [resolvable:$true] %s184_s7 }
  0x3e   : > { %s5857_s29 = sld [smem:[#allocation16_spill]]  ;;  %p3227_p7 = pnand %p5801_p6, %p4189_p2 }
  0x3f   : > { %s5858_s9 = sld [smem:[#allocation15_spill]]  ;;  %s170_s25 = scalar_lea.sflag [#allocation3], %s169_s4 }
  0x40   : > { %s5859_s24 = sld [smem:[#allocation14_spill]]  ;;  %s3996_s26 = smov 1536  }
  0x41   : > { %s5860_s8 = smov 32   ;;  %s5861_s3 = smov 512  }
  0x42   : > { %s5862_s5 = sld [smem:[#allocation13_spill]]  ;;  %s3187_s2 = sadd.s32 4294967294, %s3991_s30  }
  0x43   : > { %s181_s12 = scalar_lea.hbm %s5856_s0, %s3194_s20  ;;  %s4219_s20 = sadd.s32 4294967295, %s3991_s30  }
  0x44   : > { %s182_s11 = sshll.u32 %s181_s12, 4  ;;  %p64_p8 = scmp.eq.s32.totalorder %s4219_s20, 0  ;;  %s183_s11 = int_to_ptr.hbm [resolvable:$true] %s182_s11 }
  0x45   : > { %3229 = dma.hbm_to_vmem [thread:$0]  (!%p3227_p7), %s183_s11, 16384, %s185_s7, %s170_s25, %s3996_s26, %s5861_s3, %s5860_s8  }
  0x46   : > { %p102_p9 = scmp.eq.s32.totalorder %s4147_s10, 0  ;;  %s104_s15 = sadd.s32 1, %s3939_s17 }
  0x47   : > { %p4228_p10 = por %p64_p8, %p63_p0  ;;  %p4235_p12 = por %p91_p5, %p64_p8 }
  0x48   : > { %s4240_s7 = scalar_select %p102_p9, %s3939_s17, %s104_s15  }
  0x49   : > { %p111_p13 = scmp.ne.s32.totalorder %s3939_s17, %s5857_s29  ;;  %p117_p2 = scmp.ne.s32.totalorder %s5857_s29, %s5858_s9 }
  0x4a   : > { %p142_p3 = scmp.ne.s32.totalorder %s3927_s14, %s5859_s24  ;;  %p143_p4 = scmp.eq.s32.totalorder %s4219_s20, 11 }
  0x4b   : > { %p4251_p7 = por %p111_p13, %p58_p1  ;;  %p4255_p0 = por %p117_p2, %p64_p8 }
  0x4c   : > { %p4259_p5 = por %p143_p4, %p142_p3  ;;  %p148_p9 = scmp.ne.s32.totalorder %s5859_s24, %s5862_s5 }
  0x4d   : > { %p149_p6 = scmp.eq.s32.totalorder %s3187_s2, 11  ;;  %s221_s29 = sand.u32 1, %s3939_s17  }
  0x4e   : > { %s3200_s9 = sshll.u32 %s221_s29, 2  ;;  %s5868_s11 = sshll.u32 %s3983_s28, 2 }
  0x4f   : > { %s5869_s8 = sld [smem:[#allocation60_spill]]  ;;  %p4271_p1 = por %p149_p6, %p148_p9 }
  0x50   : > { %s223_s27 = scalar_lea.vmem [#allocation7], %s3200_s9  ;;  %p5871_p8 = scmp.lt.s32.totalorder %s3991_s30, 12 }
  0x51   : > { %s231_s16 = sshll.u32 %s223_s27, 4  ;;  %s232_s16 = int_to_ptr.vmem [resolvable:$true] %s231_s16 }
  0x52   : > { %p3233_p13 = pnand %p5871_p8, %p4251_p7 }
  0x53   : > { %240 = sbr.rel (%p4174_p11) target bundleno = 1472 (0x5c0), region = 32 }
  0x55   : > { %s227_s3 = scalar_lea.hbm %s5869_s8, %s5868_s11 }
  0x56   : > { %s229_s0 = sshll.u32 %s227_s3, 4  ;;  %s230_s0 = int_to_ptr.hbm [resolvable:$true] %s229_s0 }
  0x57   : > { %3235 = dma.hbm_to_vmem [thread:$0]  (!%p3233_p13), %s230_s0, 64, %s232_s16, %s4167_s13  }
  0x58   : > { %s242_s24 = sand.u32 1, %s3959_s22  }
  0x59   : > { %s3203_s5 = sshll.u32 %s242_s24, 10  ;;  %s243_s2 = scalar_lea.sflag [#allocation3], %s242_s24 }
  0x5a   : > { %s4283_s29 = scalar_lea.vmem [#allocation2], %s3203_s5 }
  0x5b   : > { %3902 = dma.done.wait (%p4228_p10), %s243_s2, 16384  }
  0x5c   : > { %3904 = vsyncadd (%p4228_p10), %s243_s2, 4294950912  ;;  %s252_s27 = sand.u32 1, %s4219_s20   ;;  %s254_s0 = sand.u32 1, %s3947_s19  }
  0x5d   : > { %s3204_s13 = sshll.u32 %s254_s0, 11  ;;  %s253_s16 = scalar_lea.sflag [#allocation6], %s252_s27 }
  0x5e   : > { %s4291_s6 = scalar_lea.vmem [#allocation5], %s3204_s13 }
  0x5f   : > { %3906 = dma.done.wait (%p4235_p12), %s253_s16, 32768  }
  0x60   : > { %3908 = vsyncadd (%p4235_p12), %s253_s16, 4294934528  ;;  %s5872_s21 = sld [smem:[#allocation16_spill]] }
  0x66   : > { %s264_s9 = sand.u32 1, %s5872_s21  }
  0x67   : > { %s3205_s11 = sshll.u32 %s264_s9, 2 }
  0x68   : > { %s266_s12 = scalar_lea.vmem [#allocation7], %s3205_s11 }
  0x69   : > { %3910 = dma.done.wait (%p4255_p0), %s253_s16, 64  }
  0x6a   : > { %3912 = vsyncadd (%p4255_p0), %s253_s16, 4294967232  ;;  %s5873_s20 = sld [smem:[#allocation14_spill]] }
  0x6b   : > { %s5874_s3 = sld [smem:[#allocation18_spill]] }
  0x70   : > { %s297_s25 = sand.u32 1, %s5873_s20  }
  0x71   : > { %s3206_s26 = sshll.u32 %s297_s25, 10  ;;  %p3207_p6 = scmp.ne.s32.totalorder %s5874_s3, 0 }
  0x72   : > { %s4305_s8 = scalar_lea.vmem [#allocation8], %s3206_s26 }
  0x73   : > { %310 = sbr.rel (%p3207_p6) target bundleno = 251 (0xfb), region = 48 }
  0x78   : > { %v4308_v0 = vld [vmem:[%s266_s12] sm:$0xf] }
  0x79   : > { %v313_v1 = vperm.slane %v4308_v0, 0  ;;  %v314_v2 = vperm.slane %v4308_v0, 1  ;;  %v315_v3 = vperm.slane %v4308_v0, 2  ;;  %v316_v4 = vperm.slane %v4308_v0, 3 }
  0x7b   : > { %321 = vst [vmem:[%s4305_s8] sm:$0xff] %v313_v1 }
  0x7c   : > { %325 = vst [vmem:[%s4305_s8 + $0x20] sm:$0xff] %v313_v1 }
  0x7d   : > { %329 = vst [vmem:[%s4305_s8 + $0x40] sm:$0xff] %v313_v1 }
  0x7e   : > { %333 = vst [vmem:[%s4305_s8 + $0x60] sm:$0xff] %v313_v1 }
  0x7f   : > { %337 = vst [vmem:[%s4305_s8 + $0x80] sm:$0xff] %v313_v1 }
  0x80   : > { %341 = vst [vmem:[%s4305_s8 + $0xa0] sm:$0xff] %v313_v1 }
  0x81   : > { %345 = vst [vmem:[%s4305_s8 + $0xc0] sm:$0xff] %v313_v1 }
  0x82   : > { %349 = vst [vmem:[%s4305_s8 + $0xe0] sm:$0xff] %v313_v1 }
  0x83   : > { %353 = vst [vmem:[%s4305_s8 + $0x100] sm:$0xff] %v313_v1 }
  0x84   : > { %357 = vst [vmem:[%s4305_s8 + $0x120] sm:$0xff] %v313_v1 }
  0x85   : > { %361 = vst [vmem:[%s4305_s8 + $0x140] sm:$0xff] %v313_v1 }
  0x86   : > { %365 = vst [vmem:[%s4305_s8 + $0x160] sm:$0xff] %v313_v1 }
  0x87   : > { %369 = vst [vmem:[%s4305_s8 + $0x180] sm:$0xff] %v313_v1 }
  0x88   : > { %373 = vst [vmem:[%s4305_s8 + $0x1a0] sm:$0xff] %v313_v1 }
  0x89   : > { %377 = vst [vmem:[%s4305_s8 + $0x1c0] sm:$0xff] %v313_v1 }
  0x8a   : > { %381 = vst [vmem:[%s4305_s8 + $0x1e0] sm:$0xff] %v313_v1 }
  0x8b   : > { %385 = vst [vmem:[%s4305_s8 + $0x200] sm:$0xff] %v313_v1 }
  0x8c   : > { %389 = vst [vmem:[%s4305_s8 + $0x220] sm:$0xff] %v313_v1 }
  0x8d   : > { %393 = vst [vmem:[%s4305_s8 + $0x240] sm:$0xff] %v313_v1 }
  0x8e   : > { %397 = vst [vmem:[%s4305_s8 + $0x260] sm:$0xff] %v313_v1 }
  0x8f   : > { %401 = vst [vmem:[%s4305_s8 + $0x280] sm:$0xff] %v313_v1 }
  0x90   : > { %405 = vst [vmem:[%s4305_s8 + $0x2a0] sm:$0xff] %v313_v1 }
  0x91   : > { %409 = vst [vmem:[%s4305_s8 + $0x2c0] sm:$0xff] %v313_v1 }
  0x92   : > { %413 = vst [vmem:[%s4305_s8 + $0x2e0] sm:$0xff] %v313_v1 }
  0x93   : > { %417 = vst [vmem:[%s4305_s8 + $0x300] sm:$0xff] %v313_v1 }
  0x94   : > { %421 = vst [vmem:[%s4305_s8 + $0x320] sm:$0xff] %v313_v1 }
  0x95   : > { %425 = vst [vmem:[%s4305_s8 + $0x340] sm:$0xff] %v313_v1 }
  0x96   : > { %429 = vst [vmem:[%s4305_s8 + $0x360] sm:$0xff] %v313_v1 }
  0x97   : > { %433 = vst [vmem:[%s4305_s8 + $0x380] sm:$0xff] %v313_v1 }
  0x98   : > { %437 = vst [vmem:[%s4305_s8 + $0x3a0] sm:$0xff] %v313_v1 }
  0x99   : > { %441 = vst [vmem:[%s4305_s8 + $0x3c0] sm:$0xff] %v313_v1 }
  0x9a   : > { %445 = vst [vmem:[%s4305_s8 + $0x3e0] sm:$0xff] %v313_v1 }
  0x9b   : > { %322 = vst [vmem:[%s4305_s8 + $0x8] sm:$0xff] %v314_v2 }
  0x9c   : > { %326 = vst [vmem:[%s4305_s8 + $0x28] sm:$0xff] %v314_v2 }
  0x9d   : > { %330 = vst [vmem:[%s4305_s8 + $0x48] sm:$0xff] %v314_v2 }
  0x9e   : > { %334 = vst [vmem:[%s4305_s8 + $0x68] sm:$0xff] %v314_v2 }
  0x9f   : > { %338 = vst [vmem:[%s4305_s8 + $0x88] sm:$0xff] %v314_v2 }
  0xa0   : > { %342 = vst [vmem:[%s4305_s8 + $0xa8] sm:$0xff] %v314_v2 }
  0xa1   : > { %346 = vst [vmem:[%s4305_s8 + $0xc8] sm:$0xff] %v314_v2 }
  0xa2   : > { %350 = vst [vmem:[%s4305_s8 + $0xe8] sm:$0xff] %v314_v2 }
  0xa3   : > { %354 = vst [vmem:[%s4305_s8 + $0x108] sm:$0xff] %v314_v2 }
  0xa4   : > { %358 = vst [vmem:[%s4305_s8 + $0x128] sm:$0xff] %v314_v2 }
  0xa5   : > { %362 = vst [vmem:[%s4305_s8 + $0x148] sm:$0xff] %v314_v2 }
  0xa6   : > { %366 = vst [vmem:[%s4305_s8 + $0x168] sm:$0xff] %v314_v2 }
  0xa7   : > { %370 = vst [vmem:[%s4305_s8 + $0x188] sm:$0xff] %v314_v2 }
  0xa8   : > { %374 = vst [vmem:[%s4305_s8 + $0x1a8] sm:$0xff] %v314_v2 }
  0xa9   : > { %378 = vst [vmem:[%s4305_s8 + $0x1c8] sm:$0xff] %v314_v2 }
  0xaa   : > { %382 = vst [vmem:[%s4305_s8 + $0x1e8] sm:$0xff] %v314_v2 }
  0xab   : > { %386 = vst [vmem:[%s4305_s8 + $0x208] sm:$0xff] %v314_v2 }
  0xac   : > { %390 = vst [vmem:[%s4305_s8 + $0x228] sm:$0xff] %v314_v2 }
  0xad   : > { %394 = vst [vmem:[%s4305_s8 + $0x248] sm:$0xff] %v314_v2 }
  0xae   : > { %398 = vst [vmem:[%s4305_s8 + $0x268] sm:$0xff] %v314_v2 }
  0xaf   : > { %402 = vst [vmem:[%s4305_s8 + $0x288] sm:$0xff] %v314_v2 }
  0xb0   : > { %406 = vst [vmem:[%s4305_s8 + $0x2a8] sm:$0xff] %v314_v2 }
  0xb1   : > { %410 = vst [vmem:[%s4305_s8 + $0x2c8] sm:$0xff] %v314_v2 }
  0xb2   : > { %414 = vst [vmem:[%s4305_s8 + $0x2e8] sm:$0xff] %v314_v2 }
  0xb3   : > { %418 = vst [vmem:[%s4305_s8 + $0x308] sm:$0xff] %v314_v2 }
  0xb4   : > { %422 = vst [vmem:[%s4305_s8 + $0x328] sm:$0xff] %v314_v2 }
  0xb5   : > { %426 = vst [vmem:[%s4305_s8 + $0x348] sm:$0xff] %v314_v2 }
  0xb6   : > { %430 = vst [vmem:[%s4305_s8 + $0x368] sm:$0xff] %v314_v2 }
  0xb7   : > { %434 = vst [vmem:[%s4305_s8 + $0x388] sm:$0xff] %v314_v2 }
  0xb8   : > { %438 = vst [vmem:[%s4305_s8 + $0x3a8] sm:$0xff] %v314_v2 }
  0xb9   : > { %442 = vst [vmem:[%s4305_s8 + $0x3c8] sm:$0xff] %v314_v2 }
  0xba   : > { %446 = vst [vmem:[%s4305_s8 + $0x3e8] sm:$0xff] %v314_v2 }
  0xbb   : > { %323 = vst [vmem:[%s4305_s8 + $0x10] sm:$0xff] %v315_v3 }
  0xbc   : > { %327 = vst [vmem:[%s4305_s8 + $0x30] sm:$0xff] %v315_v3 }
  0xbd   : > { %331 = vst [vmem:[%s4305_s8 + $0x50] sm:$0xff] %v315_v3 }
  0xbe   : > { %335 = vst [vmem:[%s4305_s8 + $0x70] sm:$0xff] %v315_v3 }
  0xbf   : > { %339 = vst [vmem:[%s4305_s8 + $0x90] sm:$0xff] %v315_v3 }
  0xc0   : > { %343 = vst [vmem:[%s4305_s8 + $0xb0] sm:$0xff] %v315_v3 }
  0xc1   : > { %347 = vst [vmem:[%s4305_s8 + $0xd0] sm:$0xff] %v315_v3 }
  0xc2   : > { %351 = vst [vmem:[%s4305_s8 + $0xf0] sm:$0xff] %v315_v3 }
  0xc3   : > { %355 = vst [vmem:[%s4305_s8 + $0x110] sm:$0xff] %v315_v3 }
  0xc4   : > { %359 = vst [vmem:[%s4305_s8 + $0x130] sm:$0xff] %v315_v3 }
  0xc5   : > { %363 = vst [vmem:[%s4305_s8 + $0x150] sm:$0xff] %v315_v3 }
  0xc6   : > { %367 = vst [vmem:[%s4305_s8 + $0x170] sm:$0xff] %v315_v3 }
  0xc7   : > { %371 = vst [vmem:[%s4305_s8 + $0x190] sm:$0xff] %v315_v3 }
  0xc8   : > { %375 = vst [vmem:[%s4305_s8 + $0x1b0] sm:$0xff] %v315_v3 }
  0xc9   : > { %379 = vst [vmem:[%s4305_s8 + $0x1d0] sm:$0xff] %v315_v3 }
  0xca   : > { %383 = vst [vmem:[%s4305_s8 + $0x1f0] sm:$0xff] %v315_v3 }
  0xcb   : > { %387 = vst [vmem:[%s4305_s8 + $0x210] sm:$0xff] %v315_v3 }
  0xcc   : > { %391 = vst [vmem:[%s4305_s8 + $0x230] sm:$0xff] %v315_v3 }
  0xcd   : > { %395 = vst [vmem:[%s4305_s8 + $0x250] sm:$0xff] %v315_v3 }
  0xce   : > { %399 = vst [vmem:[%s4305_s8 + $0x270] sm:$0xff] %v315_v3 }
  0xcf   : > { %403 = vst [vmem:[%s4305_s8 + $0x290] sm:$0xff] %v315_v3 }
  0xd0   : > { %407 = vst [vmem:[%s4305_s8 + $0x2b0] sm:$0xff] %v315_v3 }
  0xd1   : > { %411 = vst [vmem:[%s4305_s8 + $0x2d0] sm:$0xff] %v315_v3 }
  0xd2   : > { %415 = vst [vmem:[%s4305_s8 + $0x2f0] sm:$0xff] %v315_v3 }
  0xd3   : > { %419 = vst [vmem:[%s4305_s8 + $0x310] sm:$0xff] %v315_v3 }
  0xd4   : > { %423 = vst [vmem:[%s4305_s8 + $0x330] sm:$0xff] %v315_v3 }
  0xd5   : > { %427 = vst [vmem:[%s4305_s8 + $0x350] sm:$0xff] %v315_v3 }
  0xd6   : > { %431 = vst [vmem:[%s4305_s8 + $0x370] sm:$0xff] %v315_v3 }
  0xd7   : > { %435 = vst [vmem:[%s4305_s8 + $0x390] sm:$0xff] %v315_v3 }
  0xd8   : > { %439 = vst [vmem:[%s4305_s8 + $0x3b0] sm:$0xff] %v315_v3 }
  0xd9   : > { %443 = vst [vmem:[%s4305_s8 + $0x3d0] sm:$0xff] %v315_v3 }
  0xda   : > { %447 = vst [vmem:[%s4305_s8 + $0x3f0] sm:$0xff] %v315_v3 }
  0xdb   : > { %324 = vst [vmem:[%s4305_s8 + $0x18] sm:$0xff] %v316_v4 }
  0xdc   : > { %328 = vst [vmem:[%s4305_s8 + $0x38] sm:$0xff] %v316_v4 }
  0xdd   : > { %332 = vst [vmem:[%s4305_s8 + $0x58] sm:$0xff] %v316_v4 }
  0xde   : > { %336 = vst [vmem:[%s4305_s8 + $0x78] sm:$0xff] %v316_v4 }
  0xdf   : > { %340 = vst [vmem:[%s4305_s8 + $0x98] sm:$0xff] %v316_v4 }
  0xe0   : > { %344 = vst [vmem:[%s4305_s8 + $0xb8] sm:$0xff] %v316_v4 }
  0xe1   : > { %348 = vst [vmem:[%s4305_s8 + $0xd8] sm:$0xff] %v316_v4 }
  0xe2   : > { %352 = vst [vmem:[%s4305_s8 + $0xf8] sm:$0xff] %v316_v4 }
  0xe3   : > { %356 = vst [vmem:[%s4305_s8 + $0x118] sm:$0xff] %v316_v4 }
  0xe4   : > { %360 = vst [vmem:[%s4305_s8 + $0x138] sm:$0xff] %v316_v4 }
  0xe5   : > { %364 = vst [vmem:[%s4305_s8 + $0x158] sm:$0xff] %v316_v4 }
  0xe6   : > { %368 = vst [vmem:[%s4305_s8 + $0x178] sm:$0xff] %v316_v4 }
  0xe7   : > { %372 = vst [vmem:[%s4305_s8 + $0x198] sm:$0xff] %v316_v4 }
  0xe8   : > { %376 = vst [vmem:[%s4305_s8 + $0x1b8] sm:$0xff] %v316_v4 }
  0xe9   : > { %380 = vst [vmem:[%s4305_s8 + $0x1d8] sm:$0xff] %v316_v4 }
  0xea   : > { %384 = vst [vmem:[%s4305_s8 + $0x1f8] sm:$0xff] %v316_v4 }
  0xeb   : > { %388 = vst [vmem:[%s4305_s8 + $0x218] sm:$0xff] %v316_v4 }
  0xec   : > { %392 = vst [vmem:[%s4305_s8 + $0x238] sm:$0xff] %v316_v4 }
  0xed   : > { %396 = vst [vmem:[%s4305_s8 + $0x258] sm:$0xff] %v316_v4 }
  0xee   : > { %400 = vst [vmem:[%s4305_s8 + $0x278] sm:$0xff] %v316_v4 }
  0xef   : > { %404 = vst [vmem:[%s4305_s8 + $0x298] sm:$0xff] %v316_v4 }
  0xf0   : > { %408 = vst [vmem:[%s4305_s8 + $0x2b8] sm:$0xff] %v316_v4 }
  0xf1   : > { %412 = vst [vmem:[%s4305_s8 + $0x2d8] sm:$0xff] %v316_v4 }
  0xf2   : > { %416 = vst [vmem:[%s4305_s8 + $0x2f8] sm:$0xff] %v316_v4 }
  0xf3   : > { %420 = vst [vmem:[%s4305_s8 + $0x318] sm:$0xff] %v316_v4 }
  0xf4   : > { %424 = vst [vmem:[%s4305_s8 + $0x338] sm:$0xff] %v316_v4 }
  0xf5   : > { %428 = vst [vmem:[%s4305_s8 + $0x358] sm:$0xff] %v316_v4 }
  0xf6   : > { %432 = vst [vmem:[%s4305_s8 + $0x378] sm:$0xff] %v316_v4 }
  0xf7   : > { %436 = vst [vmem:[%s4305_s8 + $0x398] sm:$0xff] %v316_v4 }
  0xf8   : > { %440 = vst [vmem:[%s4305_s8 + $0x3b8] sm:$0xff] %v316_v4 }
  0xf9   : > { %444 = vst [vmem:[%s4305_s8 + $0x3d8] sm:$0xff] %v316_v4 }
  0xfa   : > { %448 = vst [vmem:[%s4305_s8 + $0x3f8] sm:$0xff] %v316_v4 }
  0xfb PF: > { %v893_v5 = vld [vmem:[%s4291_s6 + $0x5e0] sm:$0xff]  ;;  %v579_v3 = vld [vmem:[%s4283_s29 + $0x10] sm:$0xff]  ;;  %v580_v4 = vld [vmem:[%s4283_s29 + $0x18] sm:$0xff]  ;;  %s5935_s4 = sld [smem:[#allocation19_spill]]  ;;  %s3041_s9 = sshll.u32 %s4305_s8, 4  ;;  %s3042_s9 = int_to_ptr.vmem [resolvable:$true] %s3041_s9 }
  0xfc   : > { %v889_v6 = vld [vmem:[%s4291_s6 + $0x5c0] sm:$0xff]  ;;  %1187 = vmatpush.msra.mxu2 %v893_v5  ;;  %v894_v5 = vld [vmem:[%s4291_s6 + $0x5e8] sm:$0xff]  ;;  %s5936_s18 = sld [smem:[#allocation20_spill]]  ;;  %s3026_s12 = scalar_lea.sflag [#allocation4], %s297_s25 }
  0xfd   : > { %v957_v7 = vld [vmem:[%s4291_s6 + $0x7e0] sm:$0xff]  ;;  %s5938_s16 = sld [smem:[#allocation61_spill]] }
  0xfe   : > { %1300 = vmatpush.msra.mxu3 %v957_v7  ;;  %v765_v8 = vld [vmem:[%s4291_s6 + $0x1e0] sm:$0xff]  ;;  %1188 = vmatpush.msra.mxu2 %v889_v6  ;;  %v958_v6 = vld [vmem:[%s4291_s6 + $0x7e8] sm:$0xff] }
  0xff   : > { %v829_v9 = vld [vmem:[%s4291_s6 + $0x3e0] sm:$0xff]  ;;  %961 = vmatpush.msra.mxu0 %v765_v8 }
 0x100   : > { %v885_v10 = vld [vmem:[%s4291_s6 + $0x5a0] sm:$0xff]  ;;  %1074 = vmatpush.msra.mxu1 %v829_v9 }
 0x101   : > { %v953_v11 = vld [vmem:[%s4291_s6 + $0x7c0] sm:$0xff]  ;;  %1189 = vmatpush.msra.mxu2 %v885_v10  ;;  %v578_v10 = vld [vmem:[%s4283_s29 + $0x8] sm:$0xff]  ;;  %s3210_s24 = sshll.u32 %s5935_s4, 2 }
 0x102   : > { %v761_v12 = vld [vmem:[%s4291_s6 + $0x1c0] sm:$0xff]  ;;  %1301 = vmatpush.msra.mxu3 %v953_v11  ;;  %v766_v11 = vld [vmem:[%s4291_s6 + $0x1e8] sm:$0xff]  ;;  %s3216_s5 = sshll.u32 %s5936_s18, 8 }
 0x103   : > { %v825_v13 = vld [vmem:[%s4291_s6 + $0x3c0] sm:$0xff]  ;;  %962 = vmatpush.msra.mxu0 %v761_v12  ;;  %v830_v12 = vld [vmem:[%s4291_s6 + $0x3e8] sm:$0xff]  ;;  %s3038_s2 = sadd.s32 %s3216_s5, %s3210_s24 }
 0x104   : > { %v949_v14 = vld [vmem:[%s4291_s6 + $0x7a0] sm:$0xff]  ;;  %1075 = vmatpush.msra.mxu1 %v825_v13  ;;  %v890_v13 = vld [vmem:[%s4291_s6 + $0x5c8] sm:$0xff] }
 0x105   : > { %v757_v15 = vld [vmem:[%s4291_s6 + $0x1a0] sm:$0xff]  ;;  %1302 = vmatpush.msra.mxu3 %v949_v14  ;;  %v954_v14 = vld [vmem:[%s4291_s6 + $0x7c8] sm:$0xff] }
 0x106   : > { %v881_v16 = vld [vmem:[%s4291_s6 + $0x580] sm:$0xff]  ;;  %963 = vmatpush.msra.mxu0 %v757_v15  ;;  %v762_v15 = vld [vmem:[%s4291_s6 + $0x1c8] sm:$0xff] }
 0x107   : > { %v821_v17 = vld [vmem:[%s4291_s6 + $0x3a0] sm:$0xff]  ;;  %1190 = vmatpush.msra.mxu2 %v881_v16  ;;  %v826_v16 = vld [vmem:[%s4291_s6 + $0x3c8] sm:$0xff] }
 0x108   : > { %v945_v18 = vld [vmem:[%s4291_s6 + $0x780] sm:$0xff]  ;;  %1076 = vmatpush.msra.mxu1 %v821_v17  ;;  %v886_v17 = vld [vmem:[%s4291_s6 + $0x5a8] sm:$0xff] }
 0x109   : > { %v753_v19 = vld [vmem:[%s4291_s6 + $0x180] sm:$0xff]  ;;  %1303 = vmatpush.msra.mxu3 %v945_v18  ;;  %v950_v18 = vld [vmem:[%s4291_s6 + $0x7a8] sm:$0xff] }
 0x10a   : > { %v817_v20 = vld [vmem:[%s4291_s6 + $0x380] sm:$0xff]  ;;  %964 = vmatpush.msra.mxu0 %v753_v19  ;;  %v583_v19 = vld [vmem:[%s4283_s29 + $0x30] sm:$0xff] }
 0x10b   : > { %v877_v21 = vld [vmem:[%s4291_s6 + $0x560] sm:$0xff]  ;;  %1077 = vmatpush.msra.mxu1 %v817_v20  ;;  %v584_v20 = vld [vmem:[%s4283_s29 + $0x38] sm:$0xff] }
 0x10c   : > { %v941_v22 = vld [vmem:[%s4291_s6 + $0x760] sm:$0xff]  ;;  %1191 = vmatpush.msra.mxu2 %v877_v21  ;;  %v758_v21 = vld [vmem:[%s4291_s6 + $0x1a8] sm:$0xff] }
 0x10d   : > { %v749_v23 = vld [vmem:[%s4291_s6 + $0x160] sm:$0xff]  ;;  %1304 = vmatpush.msra.mxu3 %v941_v22  ;;  %v822_v22 = vld [vmem:[%s4291_s6 + $0x3a8] sm:$0xff] }
 0x10e   : > { %v813_v24 = vld [vmem:[%s4291_s6 + $0x360] sm:$0xff]  ;;  %965 = vmatpush.msra.mxu0 %v749_v23 }
 0x10f   : > { %v873_v25 = vld [vmem:[%s4291_s6 + $0x540] sm:$0xff]  ;;  %1078 = vmatpush.msra.mxu1 %v813_v24  ;;  %v582_v24 = vld [vmem:[%s4283_s29 + $0x28] sm:$0xff] }
 0x110   : > { %v937_v26 = vld [vmem:[%s4291_s6 + $0x740] sm:$0xff]  ;;  %1192 = vmatpush.msra.mxu2 %v873_v25  ;;  %v587_v25 = vld [vmem:[%s4283_s29 + $0x50] sm:$0xff] }
 0x111   : > { %v745_v27 = vld [vmem:[%s4291_s6 + $0x140] sm:$0xff]  ;;  %1305 = vmatpush.msra.mxu3 %v937_v26  ;;  %v588_v26 = vld [vmem:[%s4283_s29 + $0x58] sm:$0xff] }
 0x112   : > { %v809_v28 = vld [vmem:[%s4291_s6 + $0x340] sm:$0xff]  ;;  %966 = vmatpush.msra.mxu0 %v745_v27 }
 0x113   : > { %v869_v29 = vld [vmem:[%s4291_s6 + $0x520] sm:$0xff]  ;;  %1079 = vmatpush.msra.mxu1 %v809_v28  ;;  %v586_v28 = vld [vmem:[%s4283_s29 + $0x48] sm:$0xff] }
 0x114   : > { %v933_v30 = vld [vmem:[%s4291_s6 + $0x720] sm:$0xff]  ;;  %1193 = vmatpush.msra.mxu2 %v869_v29  ;;  %v882_v29 = vld [vmem:[%s4291_s6 + $0x588] sm:$0xff] }
 0x115   : > { %v741_v31 = vld [vmem:[%s4291_s6 + $0x120] sm:$0xff]  ;;  %1306 = vmatpush.msra.mxu3 %v933_v30  ;;  %v946_v30 = vld [vmem:[%s4291_s6 + $0x788] sm:$0xff] }
 0x116   : > { %v805_v32 = vld [vmem:[%s4291_s6 + $0x320] sm:$0xff]  ;;  %967 = vmatpush.msra.mxu0 %v741_v31  ;;  %v754_v31 = vld [vmem:[%s4291_s6 + $0x188] sm:$0xff] }
 0x117   : > { %v865_v33 = vld [vmem:[%s4291_s6 + $0x500] sm:$0xff]  ;;  %1080 = vmatpush.msra.mxu1 %v805_v32  ;;  %v818_v32 = vld [vmem:[%s4291_s6 + $0x388] sm:$0xff] }
 0x118   : > { %v929_v34 = vld [vmem:[%s4291_s6 + $0x700] sm:$0xff]  ;;  %1194 = vmatpush.msra.mxu2 %v865_v33  ;;  %v591_v33 = vld [vmem:[%s4283_s29 + $0x70] sm:$0xff] }
 0x119   : > { %v737_v35 = vld [vmem:[%s4291_s6 + $0x100] sm:$0xff]  ;;  %1307 = vmatpush.msra.mxu3 %v929_v34  ;;  %v592_v34 = vld [vmem:[%s4283_s29 + $0x78] sm:$0xff] }
 0x11a   : > { %v801_v36 = vld [vmem:[%s4291_s6 + $0x300] sm:$0xff]  ;;  %968 = vmatpush.msra.mxu0 %v737_v35 }
 0x11b   : > { %v861_v37 = vld [vmem:[%s4291_s6 + $0x4e0] sm:$0xff]  ;;  %1081 = vmatpush.msra.mxu1 %v801_v36  ;;  %v590_v36 = vld [vmem:[%s4283_s29 + $0x68] sm:$0xff] }
 0x11c   : > { %v925_v38 = vld [vmem:[%s4291_s6 + $0x6e0] sm:$0xff]  ;;  %1195 = vmatpush.msra.mxu2 %v861_v37  ;;  %v595_v37 = vld [vmem:[%s4283_s29 + $0x90] sm:$0xff] }
 0x11d   : > { %v733_v39 = vld [vmem:[%s4291_s6 + $0xe0] sm:$0xff]  ;;  %1308 = vmatpush.msra.mxu3 %v925_v38  ;;  %v596_v38 = vld [vmem:[%s4283_s29 + $0x98] sm:$0xff] }
 0x11e   : > { %v797_v40 = vld [vmem:[%s4291_s6 + $0x2e0] sm:$0xff]  ;;  %969 = vmatpush.msra.mxu0 %v733_v39 }
 0x11f   : > { %v857_v41 = vld [vmem:[%s4291_s6 + $0x4c0] sm:$0xff]  ;;  %1082 = vmatpush.msra.mxu1 %v797_v40  ;;  %v594_v40 = vld [vmem:[%s4283_s29 + $0x88] sm:$0xff] }
 0x120   : > { %v921_v42 = vld [vmem:[%s4291_s6 + $0x6c0] sm:$0xff]  ;;  %1196 = vmatpush.msra.mxu2 %v857_v41  ;;  %v878_v41 = vld [vmem:[%s4291_s6 + $0x568] sm:$0xff] }
 0x121   : > { %v729_v43 = vld [vmem:[%s4291_s6 + $0xc0] sm:$0xff]  ;;  %1309 = vmatpush.msra.mxu3 %v921_v42  ;;  %v942_v42 = vld [vmem:[%s4291_s6 + $0x768] sm:$0xff] }
 0x122   : > { %v793_v44 = vld [vmem:[%s4291_s6 + $0x2c0] sm:$0xff]  ;;  %970 = vmatpush.msra.mxu0 %v729_v43  ;;  %v750_v43 = vld [vmem:[%s4291_s6 + $0x168] sm:$0xff] }
 0x123   : > { %v853_v45 = vld [vmem:[%s4291_s6 + $0x4a0] sm:$0xff]  ;;  %1083 = vmatpush.msra.mxu1 %v793_v44  ;;  %v814_v44 = vld [vmem:[%s4291_s6 + $0x368] sm:$0xff] }
 0x124   : > { %v917_v46 = vld [vmem:[%s4291_s6 + $0x6a0] sm:$0xff]  ;;  %1197 = vmatpush.msra.mxu2 %v853_v45  ;;  %v599_v45 = vld [vmem:[%s4283_s29 + $0xb0] sm:$0xff] }
 0x125   : > { %v725_v47 = vld [vmem:[%s4291_s6 + $0xa0] sm:$0xff]  ;;  %1310 = vmatpush.msra.mxu3 %v917_v46  ;;  %v600_v46 = vld [vmem:[%s4283_s29 + $0xb8] sm:$0xff] }
 0x126   : > { %v789_v48 = vld [vmem:[%s4291_s6 + $0x2a0] sm:$0xff]  ;;  %971 = vmatpush.msra.mxu0 %v725_v47 }
 0x127   : > { %v849_v49 = vld [vmem:[%s4291_s6 + $0x480] sm:$0xff]  ;;  %1084 = vmatpush.msra.mxu1 %v789_v48  ;;  %v598_v48 = vld [vmem:[%s4283_s29 + $0xa8] sm:$0xff] }
 0x128   : > { %v913_v50 = vld [vmem:[%s4291_s6 + $0x680] sm:$0xff]  ;;  %1198 = vmatpush.msra.mxu2 %v849_v49  ;;  %v603_v49 = vld [vmem:[%s4283_s29 + $0xd0] sm:$0xff] }
 0x129   : > { %v721_v51 = vld [vmem:[%s4291_s6 + $0x80] sm:$0xff]  ;;  %1311 = vmatpush.msra.mxu3 %v913_v50  ;;  %v604_v50 = vld [vmem:[%s4283_s29 + $0xd8] sm:$0xff] }
 0x12a   : > { %v785_v52 = vld [vmem:[%s4291_s6 + $0x280] sm:$0xff]  ;;  %972 = vmatpush.msra.mxu0 %v721_v51 }
 0x12b   : > { %v845_v53 = vld [vmem:[%s4291_s6 + $0x460] sm:$0xff]  ;;  %1085 = vmatpush.msra.mxu1 %v785_v52  ;;  %v602_v52 = vld [vmem:[%s4283_s29 + $0xc8] sm:$0xff] }
 0x12c   : > { %v909_v54 = vld [vmem:[%s4291_s6 + $0x660] sm:$0xff]  ;;  %1199 = vmatpush.msra.mxu2 %v845_v53  ;;  %v874_v53 = vld [vmem:[%s4291_s6 + $0x548] sm:$0xff] }
 0x12d   : > { %v717_v55 = vld [vmem:[%s4291_s6 + $0x60] sm:$0xff]  ;;  %1312 = vmatpush.msra.mxu3 %v909_v54  ;;  %v938_v54 = vld [vmem:[%s4291_s6 + $0x748] sm:$0xff] }
 0x12e   : > { %v781_v56 = vld [vmem:[%s4291_s6 + $0x260] sm:$0xff]  ;;  %973 = vmatpush.msra.mxu0 %v717_v55  ;;  %v746_v55 = vld [vmem:[%s4291_s6 + $0x148] sm:$0xff] }
 0x12f   : > { %v841_v57 = vld [vmem:[%s4291_s6 + $0x440] sm:$0xff]  ;;  %1086 = vmatpush.msra.mxu1 %v781_v56  ;;  %v810_v56 = vld [vmem:[%s4291_s6 + $0x348] sm:$0xff] }
 0x130   : > { %v905_v58 = vld [vmem:[%s4291_s6 + $0x640] sm:$0xff]  ;;  %1200 = vmatpush.msra.mxu2 %v841_v57  ;;  %v607_v57 = vld [vmem:[%s4283_s29 + $0xf0] sm:$0xff] }
 0x131   : > { %v713_v59 = vld [vmem:[%s4291_s6 + $0x40] sm:$0xff]  ;;  %1313 = vmatpush.msra.mxu3 %v905_v58  ;;  %v608_v58 = vld [vmem:[%s4283_s29 + $0xf8] sm:$0xff] }
 0x132   : > { %v777_v60 = vld [vmem:[%s4291_s6 + $0x240] sm:$0xff]  ;;  %974 = vmatpush.msra.mxu0 %v713_v59 }
 0x133   : > { %v837_v61 = vld [vmem:[%s4291_s6 + $0x420] sm:$0xff]  ;;  %1087 = vmatpush.msra.mxu1 %v777_v60  ;;  %v606_v60 = vld [vmem:[%s4283_s29 + $0xe8] sm:$0xff] }
 0x134   : > { %v901_v62 = vld [vmem:[%s4291_s6 + $0x620] sm:$0xff]  ;;  %1201 = vmatpush.msra.mxu2 %v837_v61  ;;  %v611_v61 = vld [vmem:[%s4283_s29 + $0x110] sm:$0xff] }
 0x135   : > { %v709_v63 = vld [vmem:[%s4291_s6 + $0x20] sm:$0xff]  ;;  %1314 = vmatpush.msra.mxu3 %v901_v62  ;;  %v612_v62 = vld [vmem:[%s4283_s29 + $0x118] sm:$0xff] }
 0x136   : > { %v773_v0 = vld [vmem:[%s4291_s6 + $0x220] sm:$0xff]  ;;  %975 = vmatpush.msra.mxu0 %v709_v63 }
 0x137   : > { %v833_v1 = vld [vmem:[%s4291_s6 + $0x400] sm:$0xff]  ;;  %1088 = vmatpush.msra.mxu1 %v773_v0  ;;  %v610_v0 = vld [vmem:[%s4283_s29 + $0x108] sm:$0xff] }
 0x138   : > { %v897_v2 = vld [vmem:[%s4291_s6 + $0x600] sm:$0xff]  ;;  %1202 = vmatpush.msra.mxu2 %v833_v1  ;;  %v870_v1 = vld [vmem:[%s4291_s6 + $0x528] sm:$0xff] }
 0x139   : > { %1315 = vmatpush.msra.mxu3 %v897_v2  ;;  %v705_v7 = vld [vmem:[%s4291_s6] sm:$0xff]  ;;  %1203 = vmatmul.f32.vlgmr.msra.gmra.mxu2 %v579_v3  ;;  %v934_v2 = vld [vmem:[%s4291_s6 + $0x728] sm:$0xff] }
 0x13a   : > { %v769_v8 = vld [vmem:[%s4291_s6 + $0x200] sm:$0xff]  ;;  %1316 = vmatmul.f32.vlgmr.msra.gmra.mxu3 %v580_v4  ;;  %1639 = vmatpush.msrb.mxu2 %v894_v5  ;;  %v742_v3 = vld [vmem:[%s4291_s6 + $0x128] sm:$0xff]  ;;  %v615_v5 = vld [vmem:[%s4283_s29 + $0x130] sm:$0xff] }
 0x13b   : > { %v577_v9 = vld [vmem:[%s4283_s29] sm:$0xff]  ;;  %1752 = vmatpush.msrb.mxu3 %v958_v6  ;;  %976 = vmatpush.msra.mxu0 %v705_v7  ;;  %v806_v4 = vld [vmem:[%s4291_s6 + $0x328] sm:$0xff]  ;;  %v616_v6 = vld [vmem:[%s4283_s29 + $0x138] sm:$0xff] }
 0x13c   : > { %1089 = vmatpush.msra.mxu1 %v769_v8  ;;  %977 = vmatmul.f32.vlgmr.msra.gmra.mxu0 %v577_v9  ;;  %v581_v23 = vld [vmem:[%s4283_s29 + $0x20] sm:$0xff]  ;;  %v614_v8 = vld [vmem:[%s4283_s29 + $0x128] sm:$0xff]  ;;  %v619_v9 = vld [vmem:[%s4283_s29 + $0x150] sm:$0xff] }
 0x13d   : > { %1090 = vmatmul.f32.vlgmr.msra.gmra.mxu1 %v578_v10  ;;  %1413 = vmatpush.msrb.mxu0 %v766_v11  ;;  %v585_v27 = vld [vmem:[%s4283_s29 + $0x40] sm:$0xff]  ;;  %v620_v10 = vld [vmem:[%s4283_s29 + $0x158] sm:$0xff] }
 0x13e   : > { %1526 = vmatpush.msrb.mxu1 %v830_v12  ;;  %1640 = vmatpush.msrb.mxu2 %v890_v13  ;;  %v589_v35 = vld [vmem:[%s4283_s29 + $0x60] sm:$0xff]  ;;  %v618_v12 = vld [vmem:[%s4283_s29 + $0x148] sm:$0xff] }
 0x13f   : > { %1753 = vmatpush.msrb.mxu3 %v954_v14  ;;  %1414 = vmatpush.msrb.mxu0 %v762_v15  ;;  %v593_v39 = vld [vmem:[%s4283_s29 + $0x80] sm:$0xff]  ;;  %v866_v13 = vld [vmem:[%s4291_s6 + $0x508] sm:$0xff] }
 0x140   : > { %1527 = vmatpush.msrb.mxu1 %v826_v16  ;;  %1641 = vmatpush.msrb.mxu2 %v886_v17  ;;  %v597_v47 = vld [vmem:[%s4283_s29 + $0xa0] sm:$0xff]  ;;  %v930_v14 = vld [vmem:[%s4291_s6 + $0x708] sm:$0xff]  ;;  %v623_v17 = vld [vmem:[%s4283_s29 + $0x170] sm:$0xff] }
 0x141   : > { %1754 = vmatpush.msrb.mxu3 %v950_v18  ;;  %1206 = vmatmul.f32.gmra.mxu2 %v583_v19  ;;  %v601_v51 = vld [vmem:[%s4283_s29 + $0xc0] sm:$0xff]  ;;  %v738_v15 = vld [vmem:[%s4291_s6 + $0x108] sm:$0xff]  ;;  %v624_v18 = vld [vmem:[%s4283_s29 + $0x178] sm:$0xff] }
 0x142   : > { %1319 = vmatmul.f32.gmra.mxu3 %v584_v20  ;;  %1415 = vmatpush.msrb.mxu0 %v758_v21  ;;  %v605_v59 = vld [vmem:[%s4283_s29 + $0xe0] sm:$0xff]  ;;  %v802_v16 = vld [vmem:[%s4291_s6 + $0x308] sm:$0xff]  ;;  %v627_v21 = vld [vmem:[%s4283_s29 + $0x190] sm:$0xff] }
 0x143   : > { %1528 = vmatpush.msrb.mxu1 %v822_v22  ;;  %1642 = vmatpush.msrb.mxu2 %v882_v29  ;;  %v609_v63 = vld [vmem:[%s4283_s29 + $0x100] sm:$0xff]  ;;  %v622_v20 = vld [vmem:[%s4283_s29 + $0x168] sm:$0xff]  ;;  %v628_v22 = vld [vmem:[%s4283_s29 + $0x198] sm:$0xff] }
 0x144   : > { %980 = vmatmul.f32.gmra.mxu0 %v581_v23  ;;  %1755 = vmatpush.msrb.mxu3 %v946_v30  ;;  %v613_v7 = vld [vmem:[%s4283_s29 + $0x120] sm:$0xff]  ;;  %v631_v29 = vld [vmem:[%s4283_s29 + $0x1b0] sm:$0xff]  ;;  %v632_v30 = vld [vmem:[%s4283_s29 + $0x1b8] sm:$0xff] }
 0x145   : > { %1093 = vmatmul.f32.gmra.mxu1 %v582_v24  ;;  %1416 = vmatpush.msrb.mxu0 %v754_v31  ;;  %v617_v11 = vld [vmem:[%s4283_s29 + $0x140] sm:$0xff]  ;;  %v626_v24 = vld [vmem:[%s4283_s29 + $0x188] sm:$0xff] }
 0x146   : > { %1529 = vmatpush.msrb.mxu1 %v818_v32  ;;  %1643 = vmatpush.msrb.mxu2 %v878_v41  ;;  %v621_v19 = vld [vmem:[%s4283_s29 + $0x160] sm:$0xff]  ;;  %v630_v32 = vld [vmem:[%s4283_s29 + $0x1a8] sm:$0xff]  ;;  %v639_v41 = vld [vmem:[%s4283_s29 + $0x1f0] sm:$0xff] }
 0x147   : > { %1756 = vmatpush.msrb.mxu3 %v942_v42  ;;  %1417 = vmatpush.msrb.mxu0 %v750_v43  ;;  %v625_v23 = vld [vmem:[%s4283_s29 + $0x180] sm:$0xff]  ;;  %v640_v42 = vld [vmem:[%s4283_s29 + $0x1f8] sm:$0xff] }
 0x148   : > { %1530 = vmatpush.msrb.mxu1 %v814_v44  ;;  %1644 = vmatpush.msrb.mxu2 %v874_v53  ;;  %v629_v31 = vld [vmem:[%s4283_s29 + $0x1a0] sm:$0xff]  ;;  %v638_v44 = vld [vmem:[%s4283_s29 + $0x1e8] sm:$0xff] }
 0x149   : > { %1209 = vmatmul.f32.gmra.mxu2 %v587_v25  ;;  %1757 = vmatpush.msrb.mxu3 %v938_v54  ;;  %v862_v25 = vld [vmem:[%s4291_s6 + $0x4e8] sm:$0xff]  ;;  %v637_v43 = vld [vmem:[%s4283_s29 + $0x1e0] sm:$0xff] }
 0x14a   : > { %1322 = vmatmul.f32.gmra.mxu3 %v588_v26  ;;  %1418 = vmatpush.msrb.mxu0 %v746_v55  ;;  %v926_v26 = vld [vmem:[%s4291_s6 + $0x6e8] sm:$0xff] }
 0x14b   : > { %1531 = vmatpush.msrb.mxu1 %v810_v56  ;;  %1645 = vmatpush.msrb.mxu2 %v870_v1  ;;  %v918_v53 = vld [vmem:[%s4291_s6 + $0x6a8] sm:$0xff] }
 0x14c   : > { %983 = vmatmul.f32.gmra.mxu0 %v585_v27  ;;  %1758 = vmatpush.msrb.mxu3 %v934_v2  ;;  %v734_v27 = vld [vmem:[%s4291_s6 + $0xe8] sm:$0xff]  ;;  %v645_v2 = vld [vmem:[%s4283_s29 + $0x220] sm:$0xff] }
 0x14d   : > { %1096 = vmatmul.f32.gmra.mxu1 %v586_v28  ;;  %1419 = vmatpush.msrb.mxu0 %v742_v3  ;;  %v798_v28 = vld [vmem:[%s4291_s6 + $0x2e8] sm:$0xff] }
 0x14e   : > { %1532 = vmatpush.msrb.mxu1 %v806_v4  ;;  %1646 = vmatpush.msrb.mxu2 %v866_v13  ;;  %v646_v3 = vld [vmem:[%s4283_s29 + $0x228] sm:$0xff] }
 0x14f   : > { %1759 = vmatpush.msrb.mxu3 %v930_v14  ;;  %1420 = vmatpush.msrb.mxu0 %v738_v15  ;;  %v649_v15 = vld [vmem:[%s4283_s29 + $0x240] sm:$0xff] }
 0x150   : > { %1533 = vmatpush.msrb.mxu1 %v802_v16  ;;  %1647 = vmatpush.msrb.mxu2 %v862_v25  ;;  %v650_v16 = vld [vmem:[%s4283_s29 + $0x248] sm:$0xff] }
 0x151   : > { %1212 = vmatmul.f32.gmra.mxu2 %v591_v33  ;;  %1760 = vmatpush.msrb.mxu3 %v926_v26  ;;  %v635_v33 = vld [vmem:[%s4283_s29 + $0x1d0] sm:$0xff]  ;;  %v457_v25 = vld [vmem:[%s4305_s8 + $0x40] sm:$0xff] }
 0x152   : > { %1325 = vmatmul.f32.gmra.mxu3 %v592_v34  ;;  %1421 = vmatpush.msrb.mxu0 %v734_v27  ;;  %v636_v34 = vld [vmem:[%s4283_s29 + $0x1d8] sm:$0xff]  ;;  %v655_v26 = vld [vmem:[%s4283_s29 + $0x270] sm:$0xff] }
 0x153   : > { %1534 = vmatpush.msrb.mxu1 %v798_v28  ;;  %v656_v27 = vld [vmem:[%s4283_s29 + $0x278] sm:$0xff] }
 0x154   : > { %986 = vmatmul.f32.gmra.mxu0 %v589_v35  ;;  %v633_v35 = vld [vmem:[%s4283_s29 + $0x1c0] sm:$0xff] }
 0x155   : > { %1099 = vmatmul.f32.gmra.mxu1 %v590_v36  ;;  %v634_v36 = vld [vmem:[%s4283_s29 + $0x1c8] sm:$0xff] }
 0x159   : > { %1215 = vmatmul.f32.gmra.mxu2 %v595_v37  ;;  %v858_v37 = vld [vmem:[%s4291_s6 + $0x4c8] sm:$0xff] }
 0x15a   : > { %1328 = vmatmul.f32.gmra.mxu3 %v596_v38  ;;  %v922_v38 = vld [vmem:[%s4291_s6 + $0x6c8] sm:$0xff]  ;;  %1648 = vmatpush.msrb.mxu2 %v858_v37 }
 0x15b   : > { %1761 = vmatpush.msrb.mxu3 %v922_v38  ;;  %v461_v38 = vld [vmem:[%s4305_s8 + $0x60] sm:$0xff] }
 0x15c   : > { %989 = vmatmul.f32.gmra.mxu0 %v593_v39  ;;  %v730_v39 = vld [vmem:[%s4291_s6 + $0xc8] sm:$0xff] }
 0x15d   : > { %1102 = vmatmul.f32.gmra.mxu1 %v594_v40  ;;  %v794_v40 = vld [vmem:[%s4291_s6 + $0x2c8] sm:$0xff]  ;;  %1422 = vmatpush.msrb.mxu0 %v730_v39  ;;  %v659_v39 = vld [vmem:[%s4283_s29 + $0x290] sm:$0xff] }
 0x15e   : > { %1535 = vmatpush.msrb.mxu1 %v794_v40  ;;  %1762 = vmatpush.msrb.mxu3 %v918_v53  ;;  %v660_v40 = vld [vmem:[%s4283_s29 + $0x298] sm:$0xff]  ;;  %v718_v53 = vld [vmem:[%s4291_s6 + $0x68] sm:$0xff] }
 0x161   : > { %1218 = vmatmul.f32.gmra.mxu2 %v599_v45  ;;  %v643_v45 = vld [vmem:[%s4283_s29 + $0x210] sm:$0xff] }
 0x162   : > { %1331 = vmatmul.f32.gmra.mxu3 %v600_v46  ;;  %v644_v46 = vld [vmem:[%s4283_s29 + $0x218] sm:$0xff] }
 0x164   : > { %992 = vmatmul.f32.gmra.mxu0 %v597_v47 }
 0x165   : > { %1105 = vmatmul.f32.gmra.mxu1 %v598_v48 }
 0x169   : > { %1221 = vmatmul.f32.gmra.mxu2 %v603_v49  ;;  %v641_v49 = vld [vmem:[%s4283_s29 + $0x200] sm:$0xff] }
 0x16a   : > { %1334 = vmatmul.f32.gmra.mxu3 %v604_v50  ;;  %v642_v50 = vld [vmem:[%s4283_s29 + $0x208] sm:$0xff] }
 0x16c   : > { %995 = vmatmul.f32.gmra.mxu0 %v601_v51 }
 0x16d   : > { %1108 = vmatmul.f32.gmra.mxu1 %v602_v52  ;;  %v854_v52 = vld [vmem:[%s4291_s6 + $0x4a8] sm:$0xff] }
 0x16e   : > { %1649 = vmatpush.msrb.mxu2 %v854_v52 }
 0x171   : > { %1224 = vmatmul.f32.gmra.mxu2 %v607_v57  ;;  %v726_v57 = vld [vmem:[%s4291_s6 + $0xa8] sm:$0xff] }
 0x172   : > { %1337 = vmatmul.f32.gmra.mxu3 %v608_v58  ;;  %v790_v58 = vld [vmem:[%s4291_s6 + $0x2a8] sm:$0xff]  ;;  %1423 = vmatpush.msrb.mxu0 %v726_v57  ;;  %v664_v57 = vld [vmem:[%s4283_s29 + $0x2b8] sm:$0xff] }
 0x173   : > { %1536 = vmatpush.msrb.mxu1 %v790_v58 }
 0x174   : > { %998 = vmatmul.f32.gmra.mxu0 %v605_v59  ;;  %v449_v59 = vld [vmem:[%s4305_s8] sm:$0xff] }
 0x175   : > { %1111 = vmatmul.f32.gmra.mxu1 %v606_v60  ;;  %v647_v60 = vld [vmem:[%s4283_s29 + $0x230] sm:$0xff] }
 0x179   : > { %1227 = vmatmul.f32.gmra.mxu2 %v611_v61  ;;  %v648_v61 = vld [vmem:[%s4283_s29 + $0x238] sm:$0xff] }
 0x17a   : > { %1340 = vmatmul.f32.gmra.mxu3 %v612_v62 }
 0x17c   : > { %1001 = vmatmul.f32.gmra.mxu0 %v609_v63 }
 0x17d   : > { %1114 = vmatmul.f32.gmra.mxu1 %v610_v0 }
 0x181   : > { %1230 = vmatmul.f32.gmra.mxu2 %v615_v5 }
 0x182   : > { %1343 = vmatmul.f32.gmra.mxu3 %v616_v6 }
 0x184   : > { %1004 = vmatmul.f32.gmra.mxu0 %v613_v7 }
 0x185   : > { %1117 = vmatmul.f32.gmra.mxu1 %v614_v8  ;;  %v453_v8 = vld [vmem:[%s4305_s8 + $0x20] sm:$0xff] }
 0x189   : > { %1233 = vmatmul.f32.gmra.mxu2 %v619_v9  ;;  %v651_v9 = vld [vmem:[%s4283_s29 + $0x250] sm:$0xff] }
 0x18a   : > { %1346 = vmatmul.f32.gmra.mxu3 %v620_v10  ;;  %v652_v10 = vld [vmem:[%s4283_s29 + $0x258] sm:$0xff] }
 0x18c   : > { %1007 = vmatmul.f32.gmra.mxu0 %v617_v11 }
 0x18d   : > { %1120 = vmatmul.f32.gmra.mxu1 %v618_v12 }
 0x191   : > { %1236 = vmatmul.f32.gmra.mxu2 %v623_v17 }
 0x192   : > { %1349 = vmatmul.f32.gmra.mxu3 %v624_v18  ;;  %v850_v18 = vld [vmem:[%s4291_s6 + $0x488] sm:$0xff] }
 0x193   : > { %1650 = vmatpush.msrb.mxu2 %v850_v18 }
 0x194   : > { %1010 = vmatmul.f32.gmra.mxu0 %v621_v19  ;;  %v914_v19 = vld [vmem:[%s4291_s6 + $0x688] sm:$0xff] }
 0x195   : > { %1123 = vmatmul.f32.gmra.mxu1 %v622_v20  ;;  %1763 = vmatpush.msrb.mxu3 %v914_v19  ;;  %v714_v19 = vld [vmem:[%s4291_s6 + $0x48] sm:$0xff] }
 0x199   : > { %1239 = vmatmul.f32.gmra.mxu2 %v627_v21 }
 0x19a   : > { %1352 = vmatmul.f32.gmra.mxu3 %v628_v22 }
 0x19c   : > { %1013 = vmatmul.f32.gmra.mxu0 %v625_v23  ;;  %v722_v23 = vld [vmem:[%s4291_s6 + $0x88] sm:$0xff] }
 0x19d   : > { %1126 = vmatmul.f32.gmra.mxu1 %v626_v24  ;;  %v786_v24 = vld [vmem:[%s4291_s6 + $0x288] sm:$0xff]  ;;  %1424 = vmatpush.msrb.mxu0 %v722_v23  ;;  %v672_v23 = vld [vmem:[%s4283_s29 + $0x2f8] sm:$0xff] }
 0x19e   : > { %1537 = vmatpush.msrb.mxu1 %v786_v24 }
 0x19f   : > { %1425 = vmatpush.msrb.mxu0 %v718_v53  ;;  %v680_v53 = vld [vmem:[%s4283_s29 + $0x338] sm:$0xff] }
 0x1a1   : > { %1242 = vmatmul.f32.gmra.mxu2 %v631_v29  ;;  %1426 = vmatpush.msrb.mxu0 %v714_v19  ;;  %v688_v19 = vld [vmem:[%s4283_s29 + $0x378] sm:$0xff] }
 0x1a2   : > { %1355 = vmatmul.f32.gmra.mxu3 %v632_v30 }
 0x1a4   : > { %1016 = vmatmul.f32.gmra.mxu0 %v629_v31 }
 0x1a5   : > { %1129 = vmatmul.f32.gmra.mxu1 %v630_v32  ;;  %v653_v32 = vld [vmem:[%s4283_s29 + $0x260] sm:$0xff] }
 0x1a9   : > { %1245 = vmatmul.f32.gmra.mxu2 %v635_v33  ;;  %v654_v33 = vld [vmem:[%s4283_s29 + $0x268] sm:$0xff] }
 0x1aa   : > { %1358 = vmatmul.f32.gmra.mxu3 %v636_v34 }
 0x1ac   : > { %1019 = vmatmul.f32.gmra.mxu0 %v633_v35 }
 0x1ad   : > { %1132 = vmatmul.f32.gmra.mxu1 %v634_v36 }
 0x1b1   : > { %1248 = vmatmul.f32.gmra.mxu2 %v639_v41 }
 0x1b2   : > { %1361 = vmatmul.f32.gmra.mxu3 %v640_v42 }
 0x1b4   : > { %1022 = vmatmul.f32.gmra.mxu0 %v637_v43 }
 0x1b5   : > { %1135 = vmatmul.f32.gmra.mxu1 %v638_v44 }
 0x1b9   : > { %1251 = vmatmul.f32.gmra.mxu2 %v643_v45  ;;  %v978_v47 = vpop.f32.mrf.mxu0  ;;  %v657_v45 = vld [vmem:[%s4283_s29 + $0x280] sm:$0xff] }
 0x1ba   : > { %v1091_v48 = vpop.f32.mrf.mxu1  ;;  %1364 = vmatmul.f32.gmra.mxu3 %v644_v46  ;;  %v658_v46 = vld [vmem:[%s4283_s29 + $0x288] sm:$0xff] }
 0x1bb   : > { %v1092_v51 = vadd.f32 %v1091_v48, %v978_v47  ;;  %v846_v48 = vld [vmem:[%s4291_s6 + $0x468] sm:$0xff] }
 0x1bc   : > { %v1204_v54 = vpop.f32.mrf.mxu2  ;;  %1025 = vmatmul.f32.gmra.mxu0 %v641_v49  ;;  %v910_v49 = vld [vmem:[%s4291_s6 + $0x668] sm:$0xff]  ;;  %1651 = vmatpush.msrb.mxu2 %v846_v48 }
 0x1bd   : > { %1138 = vmatmul.f32.gmra.mxu1 %v642_v50  ;;  %v1317_v55 = vpop.f32.mrf.mxu3  ;;  %v1205_v56 = vadd.f32 %v1204_v54, %v1092_v51  ;;  %1764 = vmatpush.msrb.mxu3 %v910_v49  ;;  %v782_v54 = vld [vmem:[%s4291_s6 + $0x268] sm:$0xff] }
 0x1be   : > { %1538 = vmatpush.msrb.mxu1 %v782_v54  ;;  %v710_v49 = vld [vmem:[%s4291_s6 + $0x28] sm:$0xff] }
 0x1bf   : > { %v1318_v62 = vadd.f32 %v1317_v55, %v1205_v56  ;;  %v465_v55 = vld [vmem:[%s4305_s8 + $0x80] sm:$0xff]  ;;  %v663_v56 = vld [vmem:[%s4283_s29 + $0x2b0] sm:$0xff]  ;;  %1427 = vmatpush.msrb.mxu0 %v710_v49  ;;  %v696_v49 = vld [vmem:[%s4283_s29 + $0x3b8] sm:$0xff] }
 0x1c1   : > { %v2769_v63 = vadd.f32 %v1318_v62, %v449_v59  ;;  %1254 = vmatmul.f32.gmra.mxu2 %v647_v60  ;;  %v981_v0 = vpop.f32.mrf.mxu0  ;;  %v661_v62 = vld [vmem:[%s4283_s29 + $0x2a0] sm:$0xff] }
 0x1c2   : > { %v1094_v1 = vpop.f32.mrf.mxu1  ;;  %1367 = vmatmul.f32.gmra.mxu3 %v648_v61 }
 0x1c3   : > { %v1095_v4 = vadd.f32 %v1094_v1, %v981_v0  ;;  %2897 = vst [vmem:[%s4305_s8] sm:$0xff] %v2769_v63  ;;  %v662_v63 = vld [vmem:[%s4283_s29 + $0x2a8] sm:$0xff] }
 0x1c4   : > { %v1207_v5 = vpop.f32.mrf.mxu2  ;;  %1028 = vmatmul.f32.gmra.mxu0 %v645_v2 }
 0x1c5   : > { %1141 = vmatmul.f32.gmra.mxu1 %v646_v3  ;;  %v1320_v6 = vpop.f32.mrf.mxu3  ;;  %v1208_v7 = vadd.f32 %v1207_v5, %v1095_v4  ;;  %v469_v4 = vld [vmem:[%s4305_s8 + $0xa0] sm:$0xff]  ;;  %v667_v5 = vld [vmem:[%s4283_s29 + $0x2d0] sm:$0xff] }
 0x1c7   : > { %v1321_v11 = vadd.f32 %v1320_v6, %v1208_v7  ;;  %v668_v6 = vld [vmem:[%s4283_s29 + $0x2d8] sm:$0xff] }
 0x1c9   : > { %v2773_v12 = vadd.f32 %v1321_v11, %v453_v8  ;;  %1257 = vmatmul.f32.gmra.mxu2 %v651_v9  ;;  %v984_v13 = vpop.f32.mrf.mxu0  ;;  %v665_v11 = vld [vmem:[%s4283_s29 + $0x2c0] sm:$0xff] }
 0x1ca   : > { %v1097_v14 = vpop.f32.mrf.mxu1  ;;  %1370 = vmatmul.f32.gmra.mxu3 %v652_v10 }
 0x1cb   : > { %v1098_v17 = vadd.f32 %v1097_v14, %v984_v13  ;;  %2901 = vst [vmem:[%s4305_s8 + $0x20] sm:$0xff] %v2773_v12  ;;  %v666_v12 = vld [vmem:[%s4283_s29 + $0x2c8] sm:$0xff] }
 0x1cc   : > { %v1210_v20 = vpop.f32.mrf.mxu2  ;;  %1031 = vmatmul.f32.gmra.mxu0 %v649_v15  ;;  %v842_v14 = vld [vmem:[%s4291_s6 + $0x448] sm:$0xff] }
 0x1cd   : > { %1144 = vmatmul.f32.gmra.mxu1 %v650_v16  ;;  %v1323_v21 = vpop.f32.mrf.mxu3  ;;  %v1211_v22 = vadd.f32 %v1210_v20, %v1098_v17  ;;  %v906_v15 = vld [vmem:[%s4291_s6 + $0x648] sm:$0xff]  ;;  %1652 = vmatpush.msrb.mxu2 %v842_v14 }
 0x1ce   : > { %1765 = vmatpush.msrb.mxu3 %v906_v15  ;;  %v778_v20 = vld [vmem:[%s4291_s6 + $0x248] sm:$0xff] }
 0x1cf   : > { %v1324_v28 = vadd.f32 %v1323_v21, %v1211_v22  ;;  %v473_v21 = vld [vmem:[%s4305_s8 + $0xc0] sm:$0xff]  ;;  %v671_v22 = vld [vmem:[%s4283_s29 + $0x2f0] sm:$0xff]  ;;  %1539 = vmatpush.msrb.mxu1 %v778_v20 }
 0x1d0   : > { %v706_v15 = vld [vmem:[%s4291_s6 + $0x8] sm:$0xff] }
 0x1d1   : > { %v2777_v29 = vadd.f32 %v1324_v28, %v457_v25  ;;  %1260 = vmatmul.f32.gmra.mxu2 %v655_v26  ;;  %v987_v30 = vpop.f32.mrf.mxu0  ;;  %v669_v28 = vld [vmem:[%s4283_s29 + $0x2e0] sm:$0xff]  ;;  %1428 = vmatpush.msrb.mxu0 %v706_v15  ;;  %v704_v15 = vld [vmem:[%s4283_s29 + $0x3f8] sm:$0xff] }
 0x1d2   : > { %v1100_v31 = vpop.f32.mrf.mxu1  ;;  %1373 = vmatmul.f32.gmra.mxu3 %v656_v27 }
 0x1d3   : > { %v1101_v34 = vadd.f32 %v1100_v31, %v987_v30  ;;  %2905 = vst [vmem:[%s4305_s8 + $0x40] sm:$0xff] %v2777_v29  ;;  %v670_v29 = vld [vmem:[%s4283_s29 + $0x2e8] sm:$0xff] }
 0x1d4   : > { %v1213_v35 = vpop.f32.mrf.mxu2  ;;  %1034 = vmatmul.f32.gmra.mxu0 %v653_v32 }
 0x1d5   : > { %1147 = vmatmul.f32.gmra.mxu1 %v654_v33  ;;  %v1326_v36 = vpop.f32.mrf.mxu3  ;;  %v1214_v37 = vadd.f32 %v1213_v35, %v1101_v34  ;;  %v477_v34 = vld [vmem:[%s4305_s8 + $0xe0] sm:$0xff]  ;;  %v675_v35 = vld [vmem:[%s4283_s29 + $0x310] sm:$0xff] }
 0x1d7   : > { %v1327_v41 = vadd.f32 %v1326_v36, %v1214_v37  ;;  %v676_v36 = vld [vmem:[%s4283_s29 + $0x318] sm:$0xff] }
 0x1d9   : > { %v2781_v42 = vadd.f32 %v1327_v41, %v461_v38  ;;  %1263 = vmatmul.f32.gmra.mxu2 %v659_v39  ;;  %v990_v43 = vpop.f32.mrf.mxu0  ;;  %v673_v41 = vld [vmem:[%s4283_s29 + $0x300] sm:$0xff] }
 0x1da   : > { %v1103_v44 = vpop.f32.mrf.mxu1  ;;  %1376 = vmatmul.f32.gmra.mxu3 %v660_v40 }
 0x1db   : > { %v1104_v47 = vadd.f32 %v1103_v44, %v990_v43  ;;  %2909 = vst [vmem:[%s4305_s8 + $0x60] sm:$0xff] %v2781_v42  ;;  %v674_v42 = vld [vmem:[%s4283_s29 + $0x308] sm:$0xff] }
 0x1dc   : > { %v1216_v50 = vpop.f32.mrf.mxu2  ;;  %1037 = vmatmul.f32.gmra.mxu0 %v657_v45  ;;  %v838_v44 = vld [vmem:[%s4291_s6 + $0x428] sm:$0xff] }
 0x1dd   : > { %1150 = vmatmul.f32.gmra.mxu1 %v658_v46  ;;  %v1329_v51 = vpop.f32.mrf.mxu3  ;;  %v1217_v52 = vadd.f32 %v1216_v50, %v1104_v47  ;;  %v902_v45 = vld [vmem:[%s4291_s6 + $0x628] sm:$0xff]  ;;  %1653 = vmatpush.msrb.mxu2 %v838_v44 }
 0x1de   : > { %1766 = vmatpush.msrb.mxu3 %v902_v45  ;;  %v774_v50 = vld [vmem:[%s4291_s6 + $0x228] sm:$0xff]  ;;  %v767_v45 = vld [vmem:[%s4291_s6 + $0x1f0] sm:$0xff] }
 0x1df   : > { %v1330_v58 = vadd.f32 %v1329_v51, %v1217_v52  ;;  %v481_v51 = vld [vmem:[%s4305_s8 + $0x100] sm:$0xff]  ;;  %v679_v52 = vld [vmem:[%s4283_s29 + $0x330] sm:$0xff]  ;;  %1540 = vmatpush.msrb.mxu1 %v774_v50  ;;  %1865 = vmatpush.msra.mxu0 %v767_v45 }
 0x1e1   : > { %v2785_v59 = vadd.f32 %v1330_v58, %v465_v55  ;;  %1266 = vmatmul.f32.gmra.mxu2 %v663_v56  ;;  %v993_v60 = vpop.f32.mrf.mxu0  ;;  %v677_v58 = vld [vmem:[%s4283_s29 + $0x320] sm:$0xff] }
 0x1e2   : > { %v1106_v61 = vpop.f32.mrf.mxu1  ;;  %1379 = vmatmul.f32.gmra.mxu3 %v664_v57 }
 0x1e3   : > { %v1107_v0 = vadd.f32 %v1106_v61, %v993_v60  ;;  %2913 = vst [vmem:[%s4305_s8 + $0x80] sm:$0xff] %v2785_v59  ;;  %v678_v59 = vld [vmem:[%s4283_s29 + $0x328] sm:$0xff] }
 0x1e4   : > { %v1219_v1 = vpop.f32.mrf.mxu2  ;;  %1040 = vmatmul.f32.gmra.mxu0 %v661_v62 }
 0x1e5   : > { %1153 = vmatmul.f32.gmra.mxu1 %v662_v63  ;;  %v1332_v2 = vpop.f32.mrf.mxu3  ;;  %v1220_v3 = vadd.f32 %v1219_v1, %v1107_v0  ;;  %v485_v0 = vld [vmem:[%s4305_s8 + $0x120] sm:$0xff]  ;;  %v683_v1 = vld [vmem:[%s4283_s29 + $0x350] sm:$0xff] }
 0x1e7   : > { %v1333_v7 = vadd.f32 %v1332_v2, %v1220_v3  ;;  %v684_v2 = vld [vmem:[%s4283_s29 + $0x358] sm:$0xff] }
 0x1e9   : > { %v2789_v8 = vadd.f32 %v1333_v7, %v469_v4  ;;  %1269 = vmatmul.f32.gmra.mxu2 %v667_v5  ;;  %v996_v9 = vpop.f32.mrf.mxu0  ;;  %v681_v7 = vld [vmem:[%s4283_s29 + $0x340] sm:$0xff] }
 0x1ea   : > { %v1109_v10 = vpop.f32.mrf.mxu1  ;;  %1382 = vmatmul.f32.gmra.mxu3 %v668_v6 }
 0x1eb   : > { %v1110_v13 = vadd.f32 %v1109_v10, %v996_v9  ;;  %2917 = vst [vmem:[%s4305_s8 + $0xa0] sm:$0xff] %v2789_v8  ;;  %v682_v8 = vld [vmem:[%s4283_s29 + $0x348] sm:$0xff] }
 0x1ec   : > { %v1222_v16 = vpop.f32.mrf.mxu2  ;;  %1043 = vmatmul.f32.gmra.mxu0 %v665_v11  ;;  %v834_v10 = vld [vmem:[%s4291_s6 + $0x408] sm:$0xff] }
 0x1ed   : > { %1156 = vmatmul.f32.gmra.mxu1 %v666_v12  ;;  %v1335_v17 = vpop.f32.mrf.mxu3  ;;  %v1223_v18 = vadd.f32 %v1222_v16, %v1110_v13  ;;  %v898_v11 = vld [vmem:[%s4291_s6 + $0x608] sm:$0xff]  ;;  %1654 = vmatpush.msrb.mxu2 %v834_v10 }
 0x1ee   : > { %1767 = vmatpush.msrb.mxu3 %v898_v11  ;;  %v770_v16 = vld [vmem:[%s4291_s6 + $0x208] sm:$0xff]  ;;  %v763_v11 = vld [vmem:[%s4291_s6 + $0x1d0] sm:$0xff] }
 0x1ef   : > { %v1336_v24 = vadd.f32 %v1335_v17, %v1223_v18  ;;  %v489_v17 = vld [vmem:[%s4305_s8 + $0x140] sm:$0xff]  ;;  %v687_v18 = vld [vmem:[%s4283_s29 + $0x370] sm:$0xff]  ;;  %1541 = vmatpush.msrb.mxu1 %v770_v16  ;;  %1866 = vmatpush.msra.mxu0 %v763_v11 }
 0x1f1   : > { %v2793_v25 = vadd.f32 %v1336_v24, %v473_v21  ;;  %1272 = vmatmul.f32.gmra.mxu2 %v671_v22  ;;  %v999_v26 = vpop.f32.mrf.mxu0  ;;  %v685_v24 = vld [vmem:[%s4283_s29 + $0x360] sm:$0xff] }
 0x1f2   : > { %v1112_v27 = vpop.f32.mrf.mxu1  ;;  %1385 = vmatmul.f32.gmra.mxu3 %v672_v23 }
 0x1f3   : > { %v1113_v30 = vadd.f32 %v1112_v27, %v999_v26  ;;  %2921 = vst [vmem:[%s4305_s8 + $0xc0] sm:$0xff] %v2793_v25  ;;  %v686_v25 = vld [vmem:[%s4283_s29 + $0x368] sm:$0xff] }
 0x1f4   : > { %v1225_v31 = vpop.f32.mrf.mxu2  ;;  %1046 = vmatmul.f32.gmra.mxu0 %v669_v28 }
 0x1f5   : > { %1159 = vmatmul.f32.gmra.mxu1 %v670_v29  ;;  %v1338_v32 = vpop.f32.mrf.mxu3  ;;  %v1226_v33 = vadd.f32 %v1225_v31, %v1113_v30  ;;  %v493_v30 = vld [vmem:[%s4305_s8 + $0x160] sm:$0xff]  ;;  %v691_v31 = vld [vmem:[%s4283_s29 + $0x390] sm:$0xff] }
 0x1f7   : > { %v1339_v37 = vadd.f32 %v1338_v32, %v1226_v33  ;;  %v692_v32 = vld [vmem:[%s4283_s29 + $0x398] sm:$0xff] }
 0x1f9   : > { %v2797_v38 = vadd.f32 %v1339_v37, %v477_v34  ;;  %1275 = vmatmul.f32.gmra.mxu2 %v675_v35  ;;  %v1002_v39 = vpop.f32.mrf.mxu0  ;;  %v689_v37 = vld [vmem:[%s4283_s29 + $0x380] sm:$0xff] }
 0x1fa   : > { %v1115_v40 = vpop.f32.mrf.mxu1  ;;  %1388 = vmatmul.f32.gmra.mxu3 %v676_v36 }
 0x1fb   : > { %v1116_v43 = vadd.f32 %v1115_v40, %v1002_v39  ;;  %2925 = vst [vmem:[%s4305_s8 + $0xe0] sm:$0xff] %v2797_v38  ;;  %v690_v38 = vld [vmem:[%s4283_s29 + $0x388] sm:$0xff]  ;;  %v895_v40 = vld [vmem:[%s4291_s6 + $0x5f0] sm:$0xff] }
 0x1fc   : > { %v1228_v46 = vpop.f32.mrf.mxu2  ;;  %1049 = vmatmul.f32.gmra.mxu0 %v673_v41  ;;  %v959_v41 = vld [vmem:[%s4291_s6 + $0x7f0] sm:$0xff]  ;;  %2091 = vmatpush.msra.mxu2 %v895_v40 }
 0x1fd   : > { %1162 = vmatmul.f32.gmra.mxu1 %v674_v42  ;;  %v1341_v47 = vpop.f32.mrf.mxu3  ;;  %v1229_v48 = vadd.f32 %v1228_v46, %v1116_v43  ;;  %2204 = vmatpush.msra.mxu3 %v959_v41  ;;  %v831_v46 = vld [vmem:[%s4291_s6 + $0x3f0] sm:$0xff] }
 0x1fe   : > { %1978 = vmatpush.msra.mxu1 %v831_v46  ;;  %v759_v41 = vld [vmem:[%s4291_s6 + $0x1b0] sm:$0xff] }
 0x1ff   : > { %v1342_v54 = vadd.f32 %v1341_v47, %v1229_v48  ;;  %v497_v47 = vld [vmem:[%s4305_s8 + $0x180] sm:$0xff]  ;;  %v695_v48 = vld [vmem:[%s4283_s29 + $0x3b0] sm:$0xff]  ;;  %1867 = vmatpush.msra.mxu0 %v759_v41 }
 0x200   : > { %v3405_v46 = vld [vmem:[%s4283_s29 + $0x30] sm:$0xff] }
 0x201   : > { %v2801_v55 = vadd.f32 %v1342_v54, %v481_v51  ;;  %1278 = vmatmul.f32.gmra.mxu2 %v679_v52  ;;  %v1005_v56 = vpop.f32.mrf.mxu0  ;;  %v693_v54 = vld [vmem:[%s4283_s29 + $0x3a0] sm:$0xff] }
 0x202   : > { %v1118_v57 = vpop.f32.mrf.mxu1  ;;  %1391 = vmatmul.f32.gmra.mxu3 %v680_v53 }
 0x203   : > { %v1119_v60 = vadd.f32 %v1118_v57, %v1005_v56  ;;  %2929 = vst [vmem:[%s4305_s8 + $0x100] sm:$0xff] %v2801_v55  ;;  %v694_v55 = vld [vmem:[%s4283_s29 + $0x3a8] sm:$0xff] }
 0x204   : > { %v1231_v61 = vpop.f32.mrf.mxu2  ;;  %1052 = vmatmul.f32.gmra.mxu0 %v677_v58 }
 0x205   : > { %1165 = vmatmul.f32.gmra.mxu1 %v678_v59  ;;  %v1344_v62 = vpop.f32.mrf.mxu3  ;;  %v1232_v63 = vadd.f32 %v1231_v61, %v1119_v60  ;;  %v501_v60 = vld [vmem:[%s4305_s8 + $0x1a0] sm:$0xff]  ;;  %v699_v61 = vld [vmem:[%s4283_s29 + $0x3d0] sm:$0xff] }
 0x207   : > { %v1345_v3 = vadd.f32 %v1344_v62, %v1232_v63  ;;  %v700_v62 = vld [vmem:[%s4283_s29 + $0x3d8] sm:$0xff] }
 0x209   : > { %v2805_v4 = vadd.f32 %v1345_v3, %v485_v0  ;;  %1281 = vmatmul.f32.gmra.mxu2 %v683_v1  ;;  %v1008_v5 = vpop.f32.mrf.mxu0  ;;  %v697_v3 = vld [vmem:[%s4283_s29 + $0x3c0] sm:$0xff] }
 0x20a   : > { %v1121_v6 = vpop.f32.mrf.mxu1  ;;  %1394 = vmatmul.f32.gmra.mxu3 %v684_v2 }
 0x20b   : > { %v1122_v9 = vadd.f32 %v1121_v6, %v1008_v5  ;;  %2933 = vst [vmem:[%s4305_s8 + $0x120] sm:$0xff] %v2805_v4  ;;  %v698_v4 = vld [vmem:[%s4283_s29 + $0x3c8] sm:$0xff]  ;;  %v891_v6 = vld [vmem:[%s4291_s6 + $0x5d0] sm:$0xff] }
 0x20c   : > { %v1234_v12 = vpop.f32.mrf.mxu2  ;;  %1055 = vmatmul.f32.gmra.mxu0 %v681_v7  ;;  %v955_v7 = vld [vmem:[%s4291_s6 + $0x7d0] sm:$0xff]  ;;  %2092 = vmatpush.msra.mxu2 %v891_v6 }
 0x20d   : > { %1168 = vmatmul.f32.gmra.mxu1 %v682_v8  ;;  %v1347_v13 = vpop.f32.mrf.mxu3  ;;  %v1235_v14 = vadd.f32 %v1234_v12, %v1122_v9  ;;  %2205 = vmatpush.msra.mxu3 %v955_v7  ;;  %v827_v12 = vld [vmem:[%s4291_s6 + $0x3d0] sm:$0xff] }
 0x20e   : > { %1979 = vmatpush.msra.mxu1 %v827_v12  ;;  %v755_v7 = vld [vmem:[%s4291_s6 + $0x190] sm:$0xff] }
 0x20f   : > { %v1348_v20 = vadd.f32 %v1347_v13, %v1235_v14  ;;  %v505_v13 = vld [vmem:[%s4305_s8 + $0x1c0] sm:$0xff]  ;;  %v703_v14 = vld [vmem:[%s4283_s29 + $0x3f0] sm:$0xff]  ;;  %1868 = vmatpush.msra.mxu0 %v755_v7 }
 0x210   : > { %v3413_v12 = vld [vmem:[%s4283_s29 + $0x70] sm:$0xff] }
 0x211   : > { %v2809_v21 = vadd.f32 %v1348_v20, %v489_v17  ;;  %1284 = vmatmul.f32.gmra.mxu2 %v687_v18  ;;  %v1011_v22 = vpop.f32.mrf.mxu0  ;;  %v701_v20 = vld [vmem:[%s4283_s29 + $0x3e0] sm:$0xff] }
 0x212   : > { %v1124_v23 = vpop.f32.mrf.mxu1  ;;  %1397 = vmatmul.f32.gmra.mxu3 %v688_v19 }
 0x213   : > { %v1125_v26 = vadd.f32 %v1124_v23, %v1011_v22  ;;  %2937 = vst [vmem:[%s4305_s8 + $0x140] sm:$0xff] %v2809_v21  ;;  %v702_v21 = vld [vmem:[%s4283_s29 + $0x3e8] sm:$0xff] }
 0x214   : > { %v1237_v27 = vpop.f32.mrf.mxu2  ;;  %1058 = vmatmul.f32.gmra.mxu0 %v685_v24 }
 0x215   : > { %1171 = vmatmul.f32.gmra.mxu1 %v686_v25  ;;  %v1350_v28 = vpop.f32.mrf.mxu3  ;;  %v1238_v29 = vadd.f32 %v1237_v27, %v1125_v26  ;;  %v509_v26 = vld [vmem:[%s4305_s8 + $0x1e0] sm:$0xff] }
 0x217   : > { %v1351_v33 = vadd.f32 %v1350_v28, %v1238_v29  ;;  %v3401_v29 = vld [vmem:[%s4283_s29 + $0x10] sm:$0xff] }
 0x219   : > { %v2813_v34 = vadd.f32 %v1351_v33, %v493_v30  ;;  %1287 = vmatmul.f32.gmra.mxu2 %v691_v31  ;;  %v1014_v35 = vpop.f32.mrf.mxu0 }
 0x21a   : > { %v1127_v36 = vpop.f32.mrf.mxu1  ;;  %1400 = vmatmul.f32.gmra.mxu3 %v692_v32  ;;  %v3402_v32 = vld [vmem:[%s4283_s29 + $0x18] sm:$0xff] }
 0x21b   : > { %v1128_v39 = vadd.f32 %v1127_v36, %v1014_v35  ;;  %2941 = vst [vmem:[%s4305_s8 + $0x160] sm:$0xff] %v2813_v34  ;;  %v887_v34 = vld [vmem:[%s4291_s6 + $0x5b0] sm:$0xff] }
 0x21c   : > { %v1240_v42 = vpop.f32.mrf.mxu2  ;;  %1061 = vmatmul.f32.gmra.mxu0 %v689_v37  ;;  %v951_v35 = vld [vmem:[%s4291_s6 + $0x7b0] sm:$0xff]  ;;  %v3403_v37 = vld [vmem:[%s4283_s29] sm:$0xff]  ;;  %2093 = vmatpush.msra.mxu2 %v887_v34  ;;  %v3420_v34 = vld [vmem:[%s4283_s29 + $0x88] sm:$0xff] }
 0x21d   : > { %1174 = vmatmul.f32.gmra.mxu1 %v690_v38  ;;  %v1353_v43 = vpop.f32.mrf.mxu3  ;;  %v1241_v44 = vadd.f32 %v1240_v42, %v1128_v39  ;;  %v3404_v38 = vld [vmem:[%s4283_s29 + $0x8] sm:$0xff]  ;;  %2206 = vmatpush.msra.mxu3 %v951_v35  ;;  %v823_v42 = vld [vmem:[%s4291_s6 + $0x3b0] sm:$0xff] }
 0x21e   : > { %1980 = vmatpush.msra.mxu1 %v823_v42  ;;  %v3421_v42 = vld [vmem:[%s4283_s29 + $0xb0] sm:$0xff] }
 0x21f   : > { %v1354_v50 = vadd.f32 %v1353_v43, %v1241_v44  ;;  %v513_v43 = vld [vmem:[%s4305_s8 + $0x200] sm:$0xff] }
 0x221   : > { %v2817_v51 = vadd.f32 %v1354_v50, %v497_v47  ;;  %1290 = vmatmul.f32.gmra.mxu2 %v695_v48  ;;  %v1017_v52 = vpop.f32.mrf.mxu0 }
 0x222   : > { %v1130_v53 = vpop.f32.mrf.mxu1  ;;  %1403 = vmatmul.f32.gmra.mxu3 %v696_v49  ;;  %v3406_v49 = vld [vmem:[%s4283_s29 + $0x38] sm:$0xff] }
 0x223   : > { %v1131_v56 = vadd.f32 %v1130_v53, %v1017_v52  ;;  %2945 = vst [vmem:[%s4305_s8 + $0x180] sm:$0xff] %v2817_v51  ;;  %v3407_v52 = vld [vmem:[%s4283_s29 + $0x20] sm:$0xff]  ;;  %v3408_v53 = vld [vmem:[%s4283_s29 + $0x28] sm:$0xff] }
 0x224   : > { %v1243_v57 = vpop.f32.mrf.mxu2  ;;  %1064 = vmatmul.f32.gmra.mxu0 %v693_v54 }
 0x225   : > { %1177 = vmatmul.f32.gmra.mxu1 %v694_v55  ;;  %v1356_v58 = vpop.f32.mrf.mxu3  ;;  %v1244_v59 = vadd.f32 %v1243_v57, %v1131_v56  ;;  %v517_v56 = vld [vmem:[%s4305_s8 + $0x220] sm:$0xff] }
 0x227   : > { %v1357_v63 = vadd.f32 %v1356_v58, %v1244_v59  ;;  %v3409_v59 = vld [vmem:[%s4283_s29 + $0x50] sm:$0xff] }
 0x229   : > { %v2821_v0 = vadd.f32 %v1357_v63, %v501_v60  ;;  %1293 = vmatmul.f32.gmra.mxu2 %v699_v61  ;;  %v1020_v1 = vpop.f32.mrf.mxu0 }
 0x22a   : > { %v1133_v2 = vpop.f32.mrf.mxu1  ;;  %1406 = vmatmul.f32.gmra.mxu3 %v700_v62  ;;  %v3410_v62 = vld [vmem:[%s4283_s29 + $0x58] sm:$0xff] }
 0x22b   : > { %v1134_v5 = vadd.f32 %v1133_v2, %v1020_v1  ;;  %2949 = vst [vmem:[%s4305_s8 + $0x1a0] sm:$0xff] %v2821_v0  ;;  %v883_v0 = vld [vmem:[%s4291_s6 + $0x590] sm:$0xff] }
 0x22c   : > { %v1246_v8 = vpop.f32.mrf.mxu2  ;;  %1067 = vmatmul.f32.gmra.mxu0 %v697_v3  ;;  %v947_v1 = vld [vmem:[%s4291_s6 + $0x790] sm:$0xff]  ;;  %v3411_v3 = vld [vmem:[%s4283_s29 + $0x40] sm:$0xff]  ;;  %2094 = vmatpush.msra.mxu2 %v883_v0  ;;  %v3428_v0 = vld [vmem:[%s4283_s29 + $0xc8] sm:$0xff] }
 0x22d   : > { %1180 = vmatmul.f32.gmra.mxu1 %v698_v4  ;;  %v1359_v9 = vpop.f32.mrf.mxu3  ;;  %v1247_v10 = vadd.f32 %v1246_v8, %v1134_v5  ;;  %v3412_v4 = vld [vmem:[%s4283_s29 + $0x48] sm:$0xff]  ;;  %2207 = vmatpush.msra.mxu3 %v947_v1  ;;  %v819_v8 = vld [vmem:[%s4291_s6 + $0x390] sm:$0xff] }
 0x22e   : > { %1981 = vmatpush.msra.mxu1 %v819_v8  ;;  %v3429_v8 = vld [vmem:[%s4283_s29 + $0xf0] sm:$0xff] }
 0x22f   : > { %v1360_v16 = vadd.f32 %v1359_v9, %v1247_v10  ;;  %v521_v9 = vld [vmem:[%s4305_s8 + $0x240] sm:$0xff] }
 0x231   : > { %v2825_v17 = vadd.f32 %v1360_v16, %v505_v13  ;;  %1296 = vmatmul.f32.gmra.mxu2 %v703_v14  ;;  %v1023_v18 = vpop.f32.mrf.mxu0 }
 0x232   : > { %v1136_v19 = vpop.f32.mrf.mxu1  ;;  %1409 = vmatmul.f32.gmra.mxu3 %v704_v15  ;;  %v3414_v15 = vld [vmem:[%s4283_s29 + $0x78] sm:$0xff] }
 0x233   : > { %v1137_v22 = vadd.f32 %v1136_v19, %v1023_v18  ;;  %2953 = vst [vmem:[%s4305_s8 + $0x1c0] sm:$0xff] %v2825_v17  ;;  %v3415_v18 = vld [vmem:[%s4283_s29 + $0x60] sm:$0xff]  ;;  %v3416_v19 = vld [vmem:[%s4283_s29 + $0x68] sm:$0xff] }
 0x234   : > { %v1249_v23 = vpop.f32.mrf.mxu2  ;;  %1070 = vmatmul.f32.gmra.mxu0 %v701_v20 }
 0x235   : > { %1183 = vmatmul.f32.gmra.mxu1 %v702_v21  ;;  %v1362_v24 = vpop.f32.mrf.mxu3  ;;  %v1250_v25 = vadd.f32 %v1249_v23, %v1137_v22  ;;  %v525_v22 = vld [vmem:[%s4305_s8 + $0x260] sm:$0xff] }
 0x237   : > { %v1363_v27 = vadd.f32 %v1362_v24, %v1250_v25  ;;  %v3417_v25 = vld [vmem:[%s4283_s29 + $0x90] sm:$0xff] }
 0x239   : > { %v2829_v28 = vadd.f32 %v1363_v27, %v509_v26  ;;  %1655 = vmatmul.f32.vlgmr.msrb.gmra.mxu2 %v3401_v29  ;;  %v1026_v30 = vpop.f32.mrf.mxu0 }
 0x23a   : > { %v1139_v31 = vpop.f32.mrf.mxu1  ;;  %1768 = vmatmul.f32.vlgmr.msrb.gmra.mxu3 %v3402_v32 }
 0x23b   : > { %v1140_v33 = vadd.f32 %v1139_v31, %v1026_v30  ;;  %2957 = vst [vmem:[%s4305_s8 + $0x1e0] sm:$0xff] %v2829_v28  ;;  %v3418_v28 = vld [vmem:[%s4283_s29 + $0x98] sm:$0xff]  ;;  %v879_v30 = vld [vmem:[%s4291_s6 + $0x570] sm:$0xff] }
 0x23c   : > { %v1252_v36 = vpop.f32.mrf.mxu2  ;;  %1429 = vmatmul.f32.vlgmr.msrb.gmra.mxu0 %v3403_v37  ;;  %v943_v31 = vld [vmem:[%s4291_s6 + $0x770] sm:$0xff]  ;;  %2095 = vmatpush.msra.mxu2 %v879_v30  ;;  %v3436_v30 = vld [vmem:[%s4283_s29 + $0x108] sm:$0xff] }
 0x23d   : > { %1542 = vmatmul.f32.vlgmr.msrb.gmra.mxu1 %v3404_v38  ;;  %v1365_v39 = vpop.f32.mrf.mxu3  ;;  %v1253_v40 = vadd.f32 %v1252_v36, %v1140_v33  ;;  %v3419_v33 = vld [vmem:[%s4283_s29 + $0x80] sm:$0xff]  ;;  %2208 = vmatpush.msra.mxu3 %v943_v31  ;;  %v751_v37 = vld [vmem:[%s4291_s6 + $0x170] sm:$0xff] }
 0x23e   : > { %v815_v38 = vld [vmem:[%s4291_s6 + $0x370] sm:$0xff]  ;;  %1869 = vmatpush.msra.mxu0 %v751_v37 }
 0x23f   : > { %v1366_v44 = vadd.f32 %v1365_v39, %v1253_v40  ;;  %v529_v39 = vld [vmem:[%s4305_s8 + $0x280] sm:$0xff]  ;;  %1982 = vmatpush.msra.mxu1 %v815_v38  ;;  %v3437_v38 = vld [vmem:[%s4283_s29 + $0x130] sm:$0xff] }
 0x241   : > { %v2833_v45 = vadd.f32 %v1366_v44, %v513_v43  ;;  %1658 = vmatmul.f32.gmra.mxu2 %v3405_v46  ;;  %v1029_v47 = vpop.f32.mrf.mxu0 }
 0x242   : > { %v1142_v48 = vpop.f32.mrf.mxu1  ;;  %1771 = vmatmul.f32.gmra.mxu3 %v3406_v49  ;;  %v3424_v49 = vld [vmem:[%s4283_s29 + $0xa8] sm:$0xff] }
 0x243   : > { %v1143_v50 = vadd.f32 %v1142_v48, %v1029_v47  ;;  %2961 = vst [vmem:[%s4305_s8 + $0x200] sm:$0xff] %v2833_v45  ;;  %v3422_v45 = vld [vmem:[%s4283_s29 + $0xb8] sm:$0xff]  ;;  %v3423_v48 = vld [vmem:[%s4283_s29 + $0xa0] sm:$0xff] }
 0x244   : > { %v1255_v51 = vpop.f32.mrf.mxu2  ;;  %1432 = vmatmul.f32.gmra.mxu0 %v3407_v52  ;;  %v533_v52 = vld [vmem:[%s4305_s8 + $0x2a0] sm:$0xff] }
 0x245   : > { %1545 = vmatmul.f32.gmra.mxu1 %v3408_v53  ;;  %v1368_v54 = vpop.f32.mrf.mxu3  ;;  %v1256_v55 = vadd.f32 %v1255_v51, %v1143_v50 }
 0x247   : > { %v1369_v57 = vadd.f32 %v1368_v54, %v1256_v55  ;;  %v3425_v55 = vld [vmem:[%s4283_s29 + $0xd0] sm:$0xff] }
 0x249   : > { %v2837_v58 = vadd.f32 %v1369_v57, %v517_v56  ;;  %1661 = vmatmul.f32.gmra.mxu2 %v3409_v59  ;;  %v1032_v60 = vpop.f32.mrf.mxu0 }
 0x24a   : > { %v1145_v61 = vpop.f32.mrf.mxu1  ;;  %1774 = vmatmul.f32.gmra.mxu3 %v3410_v62 }
 0x24b   : > { %v1146_v63 = vadd.f32 %v1145_v61, %v1032_v60  ;;  %2965 = vst [vmem:[%s4305_s8 + $0x220] sm:$0xff] %v2837_v58  ;;  %v3426_v58 = vld [vmem:[%s4283_s29 + $0xd8] sm:$0xff]  ;;  %v875_v60 = vld [vmem:[%s4291_s6 + $0x550] sm:$0xff] }
 0x24c   : > { %v1258_v2 = vpop.f32.mrf.mxu2  ;;  %1435 = vmatmul.f32.gmra.mxu0 %v3411_v3  ;;  %v939_v61 = vld [vmem:[%s4291_s6 + $0x750] sm:$0xff]  ;;  %2096 = vmatpush.msra.mxu2 %v875_v60  ;;  %v3444_v60 = vld [vmem:[%s4283_s29 + $0x148] sm:$0xff] }
 0x24d   : > { %1548 = vmatmul.f32.gmra.mxu1 %v3412_v4  ;;  %v1371_v5 = vpop.f32.mrf.mxu3  ;;  %v1259_v6 = vadd.f32 %v1258_v2, %v1146_v63  ;;  %v3427_v63 = vld [vmem:[%s4283_s29 + $0xc0] sm:$0xff]  ;;  %2209 = vmatpush.msra.mxu3 %v939_v61  ;;  %v747_v3 = vld [vmem:[%s4291_s6 + $0x150] sm:$0xff] }
 0x24e   : > { %v811_v4 = vld [vmem:[%s4291_s6 + $0x350] sm:$0xff]  ;;  %1870 = vmatpush.msra.mxu0 %v747_v3 }
 0x24f   : > { %v1372_v10 = vadd.f32 %v1371_v5, %v1259_v6  ;;  %v537_v5 = vld [vmem:[%s4305_s8 + $0x2c0] sm:$0xff]  ;;  %1983 = vmatpush.msra.mxu1 %v811_v4  ;;  %v3445_v4 = vld [vmem:[%s4283_s29 + $0x170] sm:$0xff] }
 0x251   : > { %v2841_v11 = vadd.f32 %v1372_v10, %v521_v9  ;;  %1664 = vmatmul.f32.gmra.mxu2 %v3413_v12  ;;  %v1035_v13 = vpop.f32.mrf.mxu0 }
 0x252   : > { %v1148_v14 = vpop.f32.mrf.mxu1  ;;  %1777 = vmatmul.f32.gmra.mxu3 %v3414_v15  ;;  %v3432_v15 = vld [vmem:[%s4283_s29 + $0xe8] sm:$0xff] }
 0x253   : > { %v1149_v16 = vadd.f32 %v1148_v14, %v1035_v13  ;;  %2969 = vst [vmem:[%s4305_s8 + $0x240] sm:$0xff] %v2841_v11  ;;  %v3430_v11 = vld [vmem:[%s4283_s29 + $0xf8] sm:$0xff]  ;;  %v3431_v14 = vld [vmem:[%s4283_s29 + $0xe0] sm:$0xff] }
 0x254   : > { %v1261_v17 = vpop.f32.mrf.mxu2  ;;  %1438 = vmatmul.f32.gmra.mxu0 %v3415_v18  ;;  %v541_v18 = vld [vmem:[%s4305_s8 + $0x2e0] sm:$0xff] }
 0x255   : > { %1551 = vmatmul.f32.gmra.mxu1 %v3416_v19  ;;  %v1374_v20 = vpop.f32.mrf.mxu3  ;;  %v1262_v21 = vadd.f32 %v1261_v17, %v1149_v16 }
 0x257   : > { %v1375_v23 = vadd.f32 %v1374_v20, %v1262_v21  ;;  %v3433_v21 = vld [vmem:[%s4283_s29 + $0x110] sm:$0xff] }
 0x259   : > { %v2845_v24 = vadd.f32 %v1375_v23, %v525_v22  ;;  %1667 = vmatmul.f32.gmra.mxu2 %v3417_v25  ;;  %v1038_v26 = vpop.f32.mrf.mxu0 }
 0x25a   : > { %v1151_v27 = vpop.f32.mrf.mxu1  ;;  %1780 = vmatmul.f32.gmra.mxu3 %v3418_v28 }
 0x25b   : > { %v1152_v29 = vadd.f32 %v1151_v27, %v1038_v26  ;;  %2973 = vst [vmem:[%s4305_s8 + $0x260] sm:$0xff] %v2845_v24  ;;  %v3434_v24 = vld [vmem:[%s4283_s29 + $0x118] sm:$0xff]  ;;  %v871_v26 = vld [vmem:[%s4291_s6 + $0x530] sm:$0xff] }
 0x25c   : > { %v1264_v32 = vpop.f32.mrf.mxu2  ;;  %1441 = vmatmul.f32.gmra.mxu0 %v3419_v33  ;;  %v935_v27 = vld [vmem:[%s4291_s6 + $0x730] sm:$0xff]  ;;  %2097 = vmatpush.msra.mxu2 %v871_v26  ;;  %v3452_v26 = vld [vmem:[%s4283_s29 + $0x188] sm:$0xff] }
 0x25d   : > { %1554 = vmatmul.f32.gmra.mxu1 %v3420_v34  ;;  %v1377_v35 = vpop.f32.mrf.mxu3  ;;  %v1265_v36 = vadd.f32 %v1264_v32, %v1152_v29  ;;  %v3435_v29 = vld [vmem:[%s4283_s29 + $0x100] sm:$0xff]  ;;  %2210 = vmatpush.msra.mxu3 %v935_v27  ;;  %v743_v33 = vld [vmem:[%s4291_s6 + $0x130] sm:$0xff] }
 0x25e   : > { %v807_v34 = vld [vmem:[%s4291_s6 + $0x330] sm:$0xff]  ;;  %1871 = vmatpush.msra.mxu0 %v743_v33 }
 0x25f   : > { %v1378_v40 = vadd.f32 %v1377_v35, %v1265_v36  ;;  %v545_v35 = vld [vmem:[%s4305_s8 + $0x300] sm:$0xff]  ;;  %1984 = vmatpush.msra.mxu1 %v807_v34  ;;  %v3453_v34 = vld [vmem:[%s4283_s29 + $0x1b0] sm:$0xff] }
 0x261   : > { %v2849_v41 = vadd.f32 %v1378_v40, %v529_v39  ;;  %1670 = vmatmul.f32.gmra.mxu2 %v3421_v42  ;;  %v1041_v43 = vpop.f32.mrf.mxu0 }
 0x262   : > { %v1154_v44 = vpop.f32.mrf.mxu1  ;;  %1783 = vmatmul.f32.gmra.mxu3 %v3422_v45  ;;  %v3440_v45 = vld [vmem:[%s4283_s29 + $0x128] sm:$0xff] }
 0x263   : > { %v1155_v46 = vadd.f32 %v1154_v44, %v1041_v43  ;;  %2977 = vst [vmem:[%s4305_s8 + $0x280] sm:$0xff] %v2849_v41  ;;  %v3438_v41 = vld [vmem:[%s4283_s29 + $0x138] sm:$0xff]  ;;  %v3439_v44 = vld [vmem:[%s4283_s29 + $0x120] sm:$0xff] }
 0x264   : > { %v1267_v47 = vpop.f32.mrf.mxu2  ;;  %1444 = vmatmul.f32.gmra.mxu0 %v3423_v48  ;;  %v549_v48 = vld [vmem:[%s4305_s8 + $0x320] sm:$0xff] }
 0x265   : > { %1557 = vmatmul.f32.gmra.mxu1 %v3424_v49  ;;  %v1380_v50 = vpop.f32.mrf.mxu3  ;;  %v1268_v51 = vadd.f32 %v1267_v47, %v1155_v46 }
 0x267   : > { %v1381_v53 = vadd.f32 %v1380_v50, %v1268_v51  ;;  %v3441_v51 = vld [vmem:[%s4283_s29 + $0x150] sm:$0xff] }
 0x269   : > { %v2853_v54 = vadd.f32 %v1381_v53, %v533_v52  ;;  %1673 = vmatmul.f32.gmra.mxu2 %v3425_v55  ;;  %v1044_v56 = vpop.f32.mrf.mxu0 }
 0x26a   : > { %v1157_v57 = vpop.f32.mrf.mxu1  ;;  %1786 = vmatmul.f32.gmra.mxu3 %v3426_v58 }
 0x26b   : > { %v1158_v59 = vadd.f32 %v1157_v57, %v1044_v56  ;;  %2981 = vst [vmem:[%s4305_s8 + $0x2a0] sm:$0xff] %v2853_v54  ;;  %v3442_v54 = vld [vmem:[%s4283_s29 + $0x158] sm:$0xff]  ;;  %v867_v56 = vld [vmem:[%s4291_s6 + $0x510] sm:$0xff] }
 0x26c   : > { %v1270_v62 = vpop.f32.mrf.mxu2  ;;  %1447 = vmatmul.f32.gmra.mxu0 %v3427_v63  ;;  %v931_v57 = vld [vmem:[%s4291_s6 + $0x710] sm:$0xff]  ;;  %2098 = vmatpush.msra.mxu2 %v867_v56  ;;  %v3460_v56 = vld [vmem:[%s4283_s29 + $0x1c8] sm:$0xff] }
 0x26d   : > { %1560 = vmatmul.f32.gmra.mxu1 %v3428_v0  ;;  %v1383_v1 = vpop.f32.mrf.mxu3  ;;  %v1271_v2 = vadd.f32 %v1270_v62, %v1158_v59  ;;  %v3443_v59 = vld [vmem:[%s4283_s29 + $0x140] sm:$0xff]  ;;  %2211 = vmatpush.msra.mxu3 %v931_v57  ;;  %v739_v63 = vld [vmem:[%s4291_s6 + $0x110] sm:$0xff] }
 0x26e   : > { %v803_v0 = vld [vmem:[%s4291_s6 + $0x310] sm:$0xff]  ;;  %1872 = vmatpush.msra.mxu0 %v739_v63 }
 0x26f   : > { %v1384_v6 = vadd.f32 %v1383_v1, %v1271_v2  ;;  %v553_v1 = vld [vmem:[%s4305_s8 + $0x340] sm:$0xff]  ;;  %1985 = vmatpush.msra.mxu1 %v803_v0  ;;  %v3461_v0 = vld [vmem:[%s4283_s29 + $0x1f0] sm:$0xff] }
 0x271   : > { %v2857_v7 = vadd.f32 %v1384_v6, %v537_v5  ;;  %1676 = vmatmul.f32.gmra.mxu2 %v3429_v8  ;;  %v1047_v9 = vpop.f32.mrf.mxu0 }
 0x272   : > { %v1160_v10 = vpop.f32.mrf.mxu1  ;;  %1789 = vmatmul.f32.gmra.mxu3 %v3430_v11  ;;  %v3448_v11 = vld [vmem:[%s4283_s29 + $0x168] sm:$0xff] }
 0x273   : > { %v1161_v12 = vadd.f32 %v1160_v10, %v1047_v9  ;;  %2985 = vst [vmem:[%s4305_s8 + $0x2c0] sm:$0xff] %v2857_v7  ;;  %v3446_v7 = vld [vmem:[%s4283_s29 + $0x178] sm:$0xff]  ;;  %v3447_v10 = vld [vmem:[%s4283_s29 + $0x160] sm:$0xff] }
 0x274   : > { %v1273_v13 = vpop.f32.mrf.mxu2  ;;  %1450 = vmatmul.f32.gmra.mxu0 %v3431_v14  ;;  %v557_v14 = vld [vmem:[%s4305_s8 + $0x360] sm:$0xff] }
 0x275   : > { %1563 = vmatmul.f32.gmra.mxu1 %v3432_v15  ;;  %v1386_v16 = vpop.f32.mrf.mxu3  ;;  %v1274_v17 = vadd.f32 %v1273_v13, %v1161_v12 }
 0x277   : > { %v1387_v19 = vadd.f32 %v1386_v16, %v1274_v17  ;;  %v3449_v17 = vld [vmem:[%s4283_s29 + $0x190] sm:$0xff] }
 0x279   : > { %v2861_v20 = vadd.f32 %v1387_v19, %v541_v18  ;;  %1679 = vmatmul.f32.gmra.mxu2 %v3433_v21  ;;  %v1050_v22 = vpop.f32.mrf.mxu0 }
 0x27a   : > { %v1163_v23 = vpop.f32.mrf.mxu1  ;;  %1792 = vmatmul.f32.gmra.mxu3 %v3434_v24 }
 0x27b   : > { %v1164_v25 = vadd.f32 %v1163_v23, %v1050_v22  ;;  %2989 = vst [vmem:[%s4305_s8 + $0x2e0] sm:$0xff] %v2861_v20  ;;  %v3450_v20 = vld [vmem:[%s4283_s29 + $0x198] sm:$0xff]  ;;  %v863_v22 = vld [vmem:[%s4291_s6 + $0x4f0] sm:$0xff] }
 0x27c   : > { %v1276_v28 = vpop.f32.mrf.mxu2  ;;  %1453 = vmatmul.f32.gmra.mxu0 %v3435_v29  ;;  %v927_v23 = vld [vmem:[%s4291_s6 + $0x6f0] sm:$0xff]  ;;  %2099 = vmatpush.msra.mxu2 %v863_v22  ;;  %v3468_v22 = vld [vmem:[%s4283_s29 + $0x208] sm:$0xff] }
 0x27d   : > { %1566 = vmatmul.f32.gmra.mxu1 %v3436_v30  ;;  %v1389_v31 = vpop.f32.mrf.mxu3  ;;  %v1277_v32 = vadd.f32 %v1276_v28, %v1164_v25  ;;  %v3451_v25 = vld [vmem:[%s4283_s29 + $0x180] sm:$0xff]  ;;  %2212 = vmatpush.msra.mxu3 %v927_v23  ;;  %v735_v29 = vld [vmem:[%s4291_s6 + $0xf0] sm:$0xff] }
 0x27e   : > { %v799_v30 = vld [vmem:[%s4291_s6 + $0x2f0] sm:$0xff]  ;;  %1873 = vmatpush.msra.mxu0 %v735_v29 }
 0x27f   : > { %v1390_v36 = vadd.f32 %v1389_v31, %v1277_v32  ;;  %v561_v31 = vld [vmem:[%s4305_s8 + $0x380] sm:$0xff]  ;;  %1986 = vmatpush.msra.mxu1 %v799_v30  ;;  %v3469_v30 = vld [vmem:[%s4283_s29 + $0x230] sm:$0xff] }
 0x281   : > { %v2865_v37 = vadd.f32 %v1390_v36, %v545_v35  ;;  %1682 = vmatmul.f32.gmra.mxu2 %v3437_v38  ;;  %v1053_v39 = vpop.f32.mrf.mxu0 }
 0x282   : > { %v1166_v40 = vpop.f32.mrf.mxu1  ;;  %1795 = vmatmul.f32.gmra.mxu3 %v3438_v41  ;;  %v3456_v41 = vld [vmem:[%s4283_s29 + $0x1a8] sm:$0xff] }
 0x283   : > { %v1167_v42 = vadd.f32 %v1166_v40, %v1053_v39  ;;  %2993 = vst [vmem:[%s4305_s8 + $0x300] sm:$0xff] %v2865_v37  ;;  %v3454_v37 = vld [vmem:[%s4283_s29 + $0x1b8] sm:$0xff]  ;;  %v3455_v40 = vld [vmem:[%s4283_s29 + $0x1a0] sm:$0xff] }
 0x284   : > { %v1279_v43 = vpop.f32.mrf.mxu2  ;;  %1456 = vmatmul.f32.gmra.mxu0 %v3439_v44  ;;  %v565_v44 = vld [vmem:[%s4305_s8 + $0x3a0] sm:$0xff] }
 0x285   : > { %1569 = vmatmul.f32.gmra.mxu1 %v3440_v45  ;;  %v1392_v46 = vpop.f32.mrf.mxu3  ;;  %v1280_v47 = vadd.f32 %v1279_v43, %v1167_v42 }
 0x287   : > { %v1393_v49 = vadd.f32 %v1392_v46, %v1280_v47  ;;  %v3457_v47 = vld [vmem:[%s4283_s29 + $0x1d0] sm:$0xff] }
 0x289   : > { %v2869_v50 = vadd.f32 %v1393_v49, %v549_v48  ;;  %1685 = vmatmul.f32.gmra.mxu2 %v3441_v51  ;;  %v1056_v52 = vpop.f32.mrf.mxu0 }
 0x28a   : > { %v1169_v53 = vpop.f32.mrf.mxu1  ;;  %1798 = vmatmul.f32.gmra.mxu3 %v3442_v54 }
 0x28b   : > { %v1170_v55 = vadd.f32 %v1169_v53, %v1056_v52  ;;  %2997 = vst [vmem:[%s4305_s8 + $0x320] sm:$0xff] %v2869_v50  ;;  %v3458_v50 = vld [vmem:[%s4283_s29 + $0x1d8] sm:$0xff]  ;;  %v859_v52 = vld [vmem:[%s4291_s6 + $0x4d0] sm:$0xff] }
 0x28c   : > { %v1282_v58 = vpop.f32.mrf.mxu2  ;;  %1459 = vmatmul.f32.gmra.mxu0 %v3443_v59  ;;  %v923_v53 = vld [vmem:[%s4291_s6 + $0x6d0] sm:$0xff]  ;;  %2100 = vmatpush.msra.mxu2 %v859_v52  ;;  %v3476_v52 = vld [vmem:[%s4283_s29 + $0x248] sm:$0xff] }
 0x28d   : > { %1572 = vmatmul.f32.gmra.mxu1 %v3444_v60  ;;  %v1395_v61 = vpop.f32.mrf.mxu3  ;;  %v1283_v62 = vadd.f32 %v1282_v58, %v1170_v55  ;;  %v3459_v55 = vld [vmem:[%s4283_s29 + $0x1c0] sm:$0xff]  ;;  %2213 = vmatpush.msra.mxu3 %v923_v53  ;;  %v731_v59 = vld [vmem:[%s4291_s6 + $0xd0] sm:$0xff] }
 0x28e   : > { %v795_v60 = vld [vmem:[%s4291_s6 + $0x2d0] sm:$0xff]  ;;  %1874 = vmatpush.msra.mxu0 %v731_v59 }
 0x28f   : > { %v1396_v2 = vadd.f32 %v1395_v61, %v1283_v62  ;;  %v569_v61 = vld [vmem:[%s4305_s8 + $0x3c0] sm:$0xff]  ;;  %1987 = vmatpush.msra.mxu1 %v795_v60  ;;  %v3477_v60 = vld [vmem:[%s4283_s29 + $0x270] sm:$0xff] }
 0x291   : > { %v2873_v3 = vadd.f32 %v1396_v2, %v553_v1  ;;  %1688 = vmatmul.f32.gmra.mxu2 %v3445_v4  ;;  %v1059_v5 = vpop.f32.mrf.mxu0 }
 0x292   : > { %v1172_v6 = vpop.f32.mrf.mxu1  ;;  %1801 = vmatmul.f32.gmra.mxu3 %v3446_v7  ;;  %v3464_v7 = vld [vmem:[%s4283_s29 + $0x1e8] sm:$0xff] }
 0x293   : > { %v1173_v8 = vadd.f32 %v1172_v6, %v1059_v5  ;;  %3001 = vst [vmem:[%s4305_s8 + $0x340] sm:$0xff] %v2873_v3  ;;  %v3462_v3 = vld [vmem:[%s4283_s29 + $0x1f8] sm:$0xff]  ;;  %v3463_v6 = vld [vmem:[%s4283_s29 + $0x1e0] sm:$0xff] }
 0x294   : > { %v1285_v9 = vpop.f32.mrf.mxu2  ;;  %1462 = vmatmul.f32.gmra.mxu0 %v3447_v10  ;;  %v573_v10 = vld [vmem:[%s4305_s8 + $0x3e0] sm:$0xff] }
 0x295   : > { %1575 = vmatmul.f32.gmra.mxu1 %v3448_v11  ;;  %v1398_v12 = vpop.f32.mrf.mxu3  ;;  %v1286_v13 = vadd.f32 %v1285_v9, %v1173_v8 }
 0x297   : > { %v1399_v15 = vadd.f32 %v1398_v12, %v1286_v13  ;;  %v3465_v13 = vld [vmem:[%s4283_s29 + $0x210] sm:$0xff] }
 0x299   : > { %v2877_v16 = vadd.f32 %v1399_v15, %v557_v14  ;;  %1691 = vmatmul.f32.gmra.mxu2 %v3449_v17  ;;  %v1062_v18 = vpop.f32.mrf.mxu0 }
 0x29a   : > { %v1175_v19 = vpop.f32.mrf.mxu1  ;;  %1804 = vmatmul.f32.gmra.mxu3 %v3450_v20 }
 0x29b   : > { %v1176_v21 = vadd.f32 %v1175_v19, %v1062_v18  ;;  %3005 = vst [vmem:[%s4305_s8 + $0x360] sm:$0xff] %v2877_v16  ;;  %v3466_v16 = vld [vmem:[%s4283_s29 + $0x218] sm:$0xff]  ;;  %v855_v18 = vld [vmem:[%s4291_s6 + $0x4b0] sm:$0xff] }
 0x29c   : > { %v1288_v24 = vpop.f32.mrf.mxu2  ;;  %1465 = vmatmul.f32.gmra.mxu0 %v3451_v25  ;;  %v919_v19 = vld [vmem:[%s4291_s6 + $0x6b0] sm:$0xff]  ;;  %2101 = vmatpush.msra.mxu2 %v855_v18  ;;  %v3484_v18 = vld [vmem:[%s4283_s29 + $0x288] sm:$0xff] }
 0x29d   : > { %1578 = vmatmul.f32.gmra.mxu1 %v3452_v26  ;;  %v1401_v27 = vpop.f32.mrf.mxu3  ;;  %v1289_v28 = vadd.f32 %v1288_v24, %v1176_v21  ;;  %v3467_v21 = vld [vmem:[%s4283_s29 + $0x200] sm:$0xff]  ;;  %2214 = vmatpush.msra.mxu3 %v919_v19  ;;  %v727_v25 = vld [vmem:[%s4291_s6 + $0xb0] sm:$0xff] }
 0x29e   : > { %v791_v26 = vld [vmem:[%s4291_s6 + $0x2b0] sm:$0xff]  ;;  %1875 = vmatpush.msra.mxu0 %v727_v25 }
 0x29f   : > { %v1402_v32 = vadd.f32 %v1401_v27, %v1289_v28  ;;  %v450_v27 = vld [vmem:[%s4305_s8 + $0x8] sm:$0xff]  ;;  %1988 = vmatpush.msra.mxu1 %v791_v26 }
 0x2a0   : > { %v3485_v26 = vld [vmem:[%s4283_s29 + $0x2b0] sm:$0xff] }
 0x2a1   : > { %v2881_v33 = vadd.f32 %v1402_v32, %v561_v31  ;;  %1694 = vmatmul.f32.gmra.mxu2 %v3453_v34  ;;  %v1065_v35 = vpop.f32.mrf.mxu0 }
 0x2a2   : > { %v1178_v36 = vpop.f32.mrf.mxu1  ;;  %1807 = vmatmul.f32.gmra.mxu3 %v3454_v37  ;;  %v3472_v37 = vld [vmem:[%s4283_s29 + $0x228] sm:$0xff] }
 0x2a3   : > { %v1179_v38 = vadd.f32 %v1178_v36, %v1065_v35  ;;  %3009 = vst [vmem:[%s4305_s8 + $0x380] sm:$0xff] %v2881_v33  ;;  %v3470_v33 = vld [vmem:[%s4283_s29 + $0x238] sm:$0xff]  ;;  %v3471_v36 = vld [vmem:[%s4283_s29 + $0x220] sm:$0xff] }
 0x2a4   : > { %v1291_v39 = vpop.f32.mrf.mxu2  ;;  %1468 = vmatmul.f32.gmra.mxu0 %v3455_v40  ;;  %v454_v40 = vld [vmem:[%s4305_s8 + $0x28] sm:$0xff] }
 0x2a5   : > { %1581 = vmatmul.f32.gmra.mxu1 %v3456_v41  ;;  %v1404_v42 = vpop.f32.mrf.mxu3  ;;  %v1292_v43 = vadd.f32 %v1291_v39, %v1179_v38 }
 0x2a7   : > { %v1405_v45 = vadd.f32 %v1404_v42, %v1292_v43  ;;  %v3473_v43 = vld [vmem:[%s4283_s29 + $0x250] sm:$0xff] }
 0x2a9   : > { %v2885_v46 = vadd.f32 %v1405_v45, %v565_v44  ;;  %1697 = vmatmul.f32.gmra.mxu2 %v3457_v47  ;;  %v1068_v48 = vpop.f32.mrf.mxu0 }
 0x2aa   : > { %v1181_v49 = vpop.f32.mrf.mxu1  ;;  %1810 = vmatmul.f32.gmra.mxu3 %v3458_v50 }
 0x2ab   : > { %v1182_v51 = vadd.f32 %v1181_v49, %v1068_v48  ;;  %3013 = vst [vmem:[%s4305_s8 + $0x3a0] sm:$0xff] %v2885_v46  ;;  %v3474_v46 = vld [vmem:[%s4283_s29 + $0x258] sm:$0xff]  ;;  %v851_v48 = vld [vmem:[%s4291_s6 + $0x490] sm:$0xff] }
 0x2ac   : > { %v1294_v54 = vpop.f32.mrf.mxu2  ;;  %1471 = vmatmul.f32.gmra.mxu0 %v3459_v55  ;;  %v915_v49 = vld [vmem:[%s4291_s6 + $0x690] sm:$0xff]  ;;  %2102 = vmatpush.msra.mxu2 %v851_v48  ;;  %v3492_v48 = vld [vmem:[%s4283_s29 + $0x2c8] sm:$0xff] }
 0x2ad   : > { %1584 = vmatmul.f32.gmra.mxu1 %v3460_v56  ;;  %v1407_v57 = vpop.f32.mrf.mxu3  ;;  %v1295_v58 = vadd.f32 %v1294_v54, %v1182_v51  ;;  %v3475_v51 = vld [vmem:[%s4283_s29 + $0x240] sm:$0xff]  ;;  %2215 = vmatpush.msra.mxu3 %v915_v49  ;;  %v723_v55 = vld [vmem:[%s4291_s6 + $0x90] sm:$0xff] }
 0x2ae   : > { %v787_v56 = vld [vmem:[%s4291_s6 + $0x290] sm:$0xff]  ;;  %1876 = vmatpush.msra.mxu0 %v723_v55 }
 0x2af   : > { %v1408_v62 = vadd.f32 %v1407_v57, %v1295_v58  ;;  %v458_v57 = vld [vmem:[%s4305_s8 + $0x48] sm:$0xff]  ;;  %1989 = vmatpush.msra.mxu1 %v787_v56 }
 0x2b0   : > { %v3493_v56 = vld [vmem:[%s4283_s29 + $0x2f0] sm:$0xff] }
 0x2b1   : > { %v2889_v63 = vadd.f32 %v1408_v62, %v569_v61  ;;  %1700 = vmatmul.f32.gmra.mxu2 %v3461_v0  ;;  %v1071_v1 = vpop.f32.mrf.mxu0 }
 0x2b2   : > { %v1184_v2 = vpop.f32.mrf.mxu1  ;;  %1813 = vmatmul.f32.gmra.mxu3 %v3462_v3  ;;  %v3480_v3 = vld [vmem:[%s4283_s29 + $0x268] sm:$0xff] }
 0x2b3   : > { %v1185_v4 = vadd.f32 %v1184_v2, %v1071_v1  ;;  %3017 = vst [vmem:[%s4305_s8 + $0x3c0] sm:$0xff] %v2889_v63  ;;  %v3478_v63 = vld [vmem:[%s4283_s29 + $0x278] sm:$0xff]  ;;  %v3479_v2 = vld [vmem:[%s4283_s29 + $0x260] sm:$0xff] }
 0x2b4   : > { %v1297_v5 = vpop.f32.mrf.mxu2  ;;  %1474 = vmatmul.f32.gmra.mxu0 %v3463_v6  ;;  %v462_v6 = vld [vmem:[%s4305_s8 + $0x68] sm:$0xff] }
 0x2b5   : > { %1587 = vmatmul.f32.gmra.mxu1 %v3464_v7  ;;  %v1410_v8 = vpop.f32.mrf.mxu3  ;;  %v1298_v9 = vadd.f32 %v1297_v5, %v1185_v4 }
 0x2b7   : > { %v1411_v11 = vadd.f32 %v1410_v8, %v1298_v9  ;;  %v3481_v9 = vld [vmem:[%s4283_s29 + $0x290] sm:$0xff] }
 0x2b9   : > { %v2893_v12 = vadd.f32 %v1411_v11, %v573_v10  ;;  %1703 = vmatmul.f32.gmra.mxu2 %v3465_v13  ;;  %v1430_v14 = vpop.f32.mrf.mxu0 }
 0x2ba   : > { %v1543_v15 = vpop.f32.mrf.mxu1  ;;  %1816 = vmatmul.f32.gmra.mxu3 %v3466_v16 }
 0x2bb   : > { %v1544_v17 = vadd.f32 %v1543_v15, %v1430_v14  ;;  %3021 = vst [vmem:[%s4305_s8 + $0x3e0] sm:$0xff] %v2893_v12  ;;  %v3482_v12 = vld [vmem:[%s4283_s29 + $0x298] sm:$0xff]  ;;  %v847_v14 = vld [vmem:[%s4291_s6 + $0x470] sm:$0xff] }
 0x2bc   : > { %v1656_v20 = vpop.f32.mrf.mxu2  ;;  %1477 = vmatmul.f32.gmra.mxu0 %v3467_v21  ;;  %v911_v15 = vld [vmem:[%s4291_s6 + $0x670] sm:$0xff]  ;;  %2103 = vmatpush.msra.mxu2 %v847_v14  ;;  %v3500_v14 = vld [vmem:[%s4283_s29 + $0x308] sm:$0xff] }
 0x2bd   : > { %1590 = vmatmul.f32.gmra.mxu1 %v3468_v22  ;;  %v1769_v23 = vpop.f32.mrf.mxu3  ;;  %v1657_v24 = vadd.f32 %v1656_v20, %v1544_v17  ;;  %v3483_v17 = vld [vmem:[%s4283_s29 + $0x280] sm:$0xff]  ;;  %2216 = vmatpush.msra.mxu3 %v911_v15  ;;  %v719_v21 = vld [vmem:[%s4291_s6 + $0x70] sm:$0xff] }
 0x2be   : > { %v783_v22 = vld [vmem:[%s4291_s6 + $0x270] sm:$0xff]  ;;  %1877 = vmatpush.msra.mxu0 %v719_v21 }
 0x2bf   : > { %v1770_v28 = vadd.f32 %v1769_v23, %v1657_v24  ;;  %v466_v23 = vld [vmem:[%s4305_s8 + $0x88] sm:$0xff]  ;;  %1990 = vmatpush.msra.mxu1 %v783_v22 }
 0x2c0   : > { %v3501_v22 = vld [vmem:[%s4283_s29 + $0x330] sm:$0xff] }
 0x2c1   : > { %v2770_v29 = vadd.f32 %v1770_v28, %v450_v27  ;;  %1706 = vmatmul.f32.gmra.mxu2 %v3469_v30  ;;  %v1433_v31 = vpop.f32.mrf.mxu0 }
 0x2c2   : > { %v1546_v32 = vpop.f32.mrf.mxu1  ;;  %1819 = vmatmul.f32.gmra.mxu3 %v3470_v33  ;;  %v3488_v33 = vld [vmem:[%s4283_s29 + $0x2a8] sm:$0xff] }
 0x2c3   : > { %v1547_v34 = vadd.f32 %v1546_v32, %v1433_v31  ;;  %2898 = vst [vmem:[%s4305_s8 + $0x8] sm:$0xff] %v2770_v29  ;;  %v3486_v29 = vld [vmem:[%s4283_s29 + $0x2b8] sm:$0xff]  ;;  %v3487_v32 = vld [vmem:[%s4283_s29 + $0x2a0] sm:$0xff] }
 0x2c4   : > { %v1659_v35 = vpop.f32.mrf.mxu2  ;;  %1480 = vmatmul.f32.gmra.mxu0 %v3471_v36  ;;  %v470_v36 = vld [vmem:[%s4305_s8 + $0xa8] sm:$0xff] }
 0x2c5   : > { %1593 = vmatmul.f32.gmra.mxu1 %v3472_v37  ;;  %v1772_v38 = vpop.f32.mrf.mxu3  ;;  %v1660_v39 = vadd.f32 %v1659_v35, %v1547_v34 }
 0x2c7   : > { %v1773_v41 = vadd.f32 %v1772_v38, %v1660_v39  ;;  %v3489_v39 = vld [vmem:[%s4283_s29 + $0x2d0] sm:$0xff] }
 0x2c9   : > { %v2774_v42 = vadd.f32 %v1773_v41, %v454_v40  ;;  %1709 = vmatmul.f32.gmra.mxu2 %v3473_v43  ;;  %v1436_v44 = vpop.f32.mrf.mxu0 }
 0x2ca   : > { %v1549_v45 = vpop.f32.mrf.mxu1  ;;  %1822 = vmatmul.f32.gmra.mxu3 %v3474_v46 }
 0x2cb   : > { %v1550_v47 = vadd.f32 %v1549_v45, %v1436_v44  ;;  %2902 = vst [vmem:[%s4305_s8 + $0x28] sm:$0xff] %v2774_v42  ;;  %v3490_v42 = vld [vmem:[%s4283_s29 + $0x2d8] sm:$0xff]  ;;  %v843_v44 = vld [vmem:[%s4291_s6 + $0x450] sm:$0xff] }
 0x2cc   : > { %v1662_v50 = vpop.f32.mrf.mxu2  ;;  %1483 = vmatmul.f32.gmra.mxu0 %v3475_v51  ;;  %v907_v45 = vld [vmem:[%s4291_s6 + $0x650] sm:$0xff]  ;;  %2104 = vmatpush.msra.mxu2 %v843_v44  ;;  %v3508_v44 = vld [vmem:[%s4283_s29 + $0x348] sm:$0xff] }
 0x2cd   : > { %1596 = vmatmul.f32.gmra.mxu1 %v3476_v52  ;;  %v1775_v53 = vpop.f32.mrf.mxu3  ;;  %v1663_v54 = vadd.f32 %v1662_v50, %v1550_v47  ;;  %v3491_v47 = vld [vmem:[%s4283_s29 + $0x2c0] sm:$0xff]  ;;  %2217 = vmatpush.msra.mxu3 %v907_v45  ;;  %v715_v51 = vld [vmem:[%s4291_s6 + $0x50] sm:$0xff] }
 0x2ce   : > { %v779_v52 = vld [vmem:[%s4291_s6 + $0x250] sm:$0xff]  ;;  %1878 = vmatpush.msra.mxu0 %v715_v51 }
 0x2cf   : > { %v1776_v58 = vadd.f32 %v1775_v53, %v1663_v54  ;;  %v474_v53 = vld [vmem:[%s4305_s8 + $0xc8] sm:$0xff]  ;;  %1991 = vmatpush.msra.mxu1 %v779_v52 }
 0x2d0   : > { %v3509_v52 = vld [vmem:[%s4283_s29 + $0x370] sm:$0xff] }
 0x2d1   : > { %v2778_v59 = vadd.f32 %v1776_v58, %v458_v57  ;;  %1712 = vmatmul.f32.gmra.mxu2 %v3477_v60  ;;  %v1439_v61 = vpop.f32.mrf.mxu0 }
 0x2d2   : > { %v1552_v62 = vpop.f32.mrf.mxu1  ;;  %1825 = vmatmul.f32.gmra.mxu3 %v3478_v63  ;;  %v3496_v63 = vld [vmem:[%s4283_s29 + $0x2e8] sm:$0xff] }
 0x2d3   : > { %v1553_v0 = vadd.f32 %v1552_v62, %v1439_v61  ;;  %2906 = vst [vmem:[%s4305_s8 + $0x48] sm:$0xff] %v2778_v59  ;;  %v3494_v59 = vld [vmem:[%s4283_s29 + $0x2f8] sm:$0xff]  ;;  %v3495_v62 = vld [vmem:[%s4283_s29 + $0x2e0] sm:$0xff] }
 0x2d4   : > { %v1665_v1 = vpop.f32.mrf.mxu2  ;;  %1486 = vmatmul.f32.gmra.mxu0 %v3479_v2  ;;  %v478_v2 = vld [vmem:[%s4305_s8 + $0xe8] sm:$0xff] }
 0x2d5   : > { %1599 = vmatmul.f32.gmra.mxu1 %v3480_v3  ;;  %v1778_v4 = vpop.f32.mrf.mxu3  ;;  %v1666_v5 = vadd.f32 %v1665_v1, %v1553_v0 }
 0x2d7   : > { %v1779_v7 = vadd.f32 %v1778_v4, %v1666_v5  ;;  %v3497_v5 = vld [vmem:[%s4283_s29 + $0x310] sm:$0xff] }
 0x2d9   : > { %v2782_v8 = vadd.f32 %v1779_v7, %v462_v6  ;;  %1715 = vmatmul.f32.gmra.mxu2 %v3481_v9  ;;  %v1442_v10 = vpop.f32.mrf.mxu0 }
 0x2da   : > { %v1555_v11 = vpop.f32.mrf.mxu1  ;;  %1828 = vmatmul.f32.gmra.mxu3 %v3482_v12 }
 0x2db   : > { %v1556_v13 = vadd.f32 %v1555_v11, %v1442_v10  ;;  %2910 = vst [vmem:[%s4305_s8 + $0x68] sm:$0xff] %v2782_v8  ;;  %v3498_v8 = vld [vmem:[%s4283_s29 + $0x318] sm:$0xff]  ;;  %v839_v10 = vld [vmem:[%s4291_s6 + $0x430] sm:$0xff] }
 0x2dc   : > { %v1668_v16 = vpop.f32.mrf.mxu2  ;;  %1489 = vmatmul.f32.gmra.mxu0 %v3483_v17  ;;  %v903_v11 = vld [vmem:[%s4291_s6 + $0x630] sm:$0xff]  ;;  %2105 = vmatpush.msra.mxu2 %v839_v10  ;;  %v3516_v10 = vld [vmem:[%s4283_s29 + $0x388] sm:$0xff] }
 0x2dd   : > { %1602 = vmatmul.f32.gmra.mxu1 %v3484_v18  ;;  %v1781_v19 = vpop.f32.mrf.mxu3  ;;  %v1669_v20 = vadd.f32 %v1668_v16, %v1556_v13  ;;  %v3499_v13 = vld [vmem:[%s4283_s29 + $0x300] sm:$0xff]  ;;  %2218 = vmatpush.msra.mxu3 %v903_v11  ;;  %v711_v17 = vld [vmem:[%s4291_s6 + $0x30] sm:$0xff] }
 0x2de   : > { %v775_v18 = vld [vmem:[%s4291_s6 + $0x230] sm:$0xff]  ;;  %1879 = vmatpush.msra.mxu0 %v711_v17 }
 0x2df   : > { %v1782_v24 = vadd.f32 %v1781_v19, %v1669_v20  ;;  %v482_v19 = vld [vmem:[%s4305_s8 + $0x108] sm:$0xff]  ;;  %1992 = vmatpush.msra.mxu1 %v775_v18 }
 0x2e0   : > { %v3517_v18 = vld [vmem:[%s4283_s29 + $0x3b0] sm:$0xff] }
 0x2e1   : > { %v2786_v25 = vadd.f32 %v1782_v24, %v466_v23  ;;  %1718 = vmatmul.f32.gmra.mxu2 %v3485_v26  ;;  %v1445_v27 = vpop.f32.mrf.mxu0 }
 0x2e2   : > { %v1558_v28 = vpop.f32.mrf.mxu1  ;;  %1831 = vmatmul.f32.gmra.mxu3 %v3486_v29  ;;  %v3504_v29 = vld [vmem:[%s4283_s29 + $0x328] sm:$0xff] }
 0x2e3   : > { %v1559_v30 = vadd.f32 %v1558_v28, %v1445_v27  ;;  %2914 = vst [vmem:[%s4305_s8 + $0x88] sm:$0xff] %v2786_v25  ;;  %v3502_v25 = vld [vmem:[%s4283_s29 + $0x338] sm:$0xff]  ;;  %v3503_v28 = vld [vmem:[%s4283_s29 + $0x320] sm:$0xff] }
 0x2e4   : > { %v1671_v31 = vpop.f32.mrf.mxu2  ;;  %1492 = vmatmul.f32.gmra.mxu0 %v3487_v32  ;;  %v486_v32 = vld [vmem:[%s4305_s8 + $0x128] sm:$0xff] }
 0x2e5   : > { %1605 = vmatmul.f32.gmra.mxu1 %v3488_v33  ;;  %v1784_v34 = vpop.f32.mrf.mxu3  ;;  %v1672_v35 = vadd.f32 %v1671_v31, %v1559_v30 }
 0x2e7   : > { %v1785_v37 = vadd.f32 %v1784_v34, %v1672_v35  ;;  %v3505_v35 = vld [vmem:[%s4283_s29 + $0x350] sm:$0xff] }
 0x2e9   : > { %v2790_v38 = vadd.f32 %v1785_v37, %v470_v36  ;;  %1721 = vmatmul.f32.gmra.mxu2 %v3489_v39  ;;  %v1448_v40 = vpop.f32.mrf.mxu0 }
 0x2ea   : > { %v1561_v41 = vpop.f32.mrf.mxu1  ;;  %1834 = vmatmul.f32.gmra.mxu3 %v3490_v42 }
 0x2eb   : > { %v1562_v43 = vadd.f32 %v1561_v41, %v1448_v40  ;;  %2918 = vst [vmem:[%s4305_s8 + $0xa8] sm:$0xff] %v2790_v38  ;;  %v3506_v38 = vld [vmem:[%s4283_s29 + $0x358] sm:$0xff]  ;;  %v835_v40 = vld [vmem:[%s4291_s6 + $0x410] sm:$0xff] }
 0x2ec   : > { %v1674_v46 = vpop.f32.mrf.mxu2  ;;  %1495 = vmatmul.f32.gmra.mxu0 %v3491_v47  ;;  %v899_v41 = vld [vmem:[%s4291_s6 + $0x610] sm:$0xff]  ;;  %2106 = vmatpush.msra.mxu2 %v835_v40  ;;  %v3524_v40 = vld [vmem:[%s4283_s29 + $0x3c8] sm:$0xff] }
 0x2ed   : > { %1608 = vmatmul.f32.gmra.mxu1 %v3492_v48  ;;  %v1787_v49 = vpop.f32.mrf.mxu3  ;;  %v1675_v50 = vadd.f32 %v1674_v46, %v1562_v43  ;;  %v3507_v43 = vld [vmem:[%s4283_s29 + $0x340] sm:$0xff]  ;;  %2219 = vmatpush.msra.mxu3 %v899_v41  ;;  %v707_v47 = vld [vmem:[%s4291_s6 + $0x10] sm:$0xff] }
 0x2ee   : > { %v771_v48 = vld [vmem:[%s4291_s6 + $0x210] sm:$0xff]  ;;  %1880 = vmatpush.msra.mxu0 %v707_v47 }
 0x2ef   : > { %v1788_v54 = vadd.f32 %v1787_v49, %v1675_v50  ;;  %v490_v49 = vld [vmem:[%s4305_s8 + $0x148] sm:$0xff]  ;;  %1993 = vmatpush.msra.mxu1 %v771_v48 }
 0x2f0   : > { %v3525_v48 = vld [vmem:[%s4283_s29 + $0x3f0] sm:$0xff] }
 0x2f1   : > { %v2794_v55 = vadd.f32 %v1788_v54, %v474_v53  ;;  %1724 = vmatmul.f32.gmra.mxu2 %v3493_v56  ;;  %v1451_v57 = vpop.f32.mrf.mxu0 }
 0x2f2   : > { %v1564_v58 = vpop.f32.mrf.mxu1  ;;  %1837 = vmatmul.f32.gmra.mxu3 %v3494_v59  ;;  %v3512_v59 = vld [vmem:[%s4283_s29 + $0x368] sm:$0xff] }
 0x2f3   : > { %v1565_v60 = vadd.f32 %v1564_v58, %v1451_v57  ;;  %2922 = vst [vmem:[%s4305_s8 + $0xc8] sm:$0xff] %v2794_v55  ;;  %v3510_v55 = vld [vmem:[%s4283_s29 + $0x378] sm:$0xff]  ;;  %v3511_v58 = vld [vmem:[%s4283_s29 + $0x360] sm:$0xff] }
 0x2f4   : > { %v1677_v61 = vpop.f32.mrf.mxu2  ;;  %1498 = vmatmul.f32.gmra.mxu0 %v3495_v62  ;;  %v494_v62 = vld [vmem:[%s4305_s8 + $0x168] sm:$0xff] }
 0x2f5   : > { %1611 = vmatmul.f32.gmra.mxu1 %v3496_v63  ;;  %v1790_v0 = vpop.f32.mrf.mxu3  ;;  %v1678_v1 = vadd.f32 %v1677_v61, %v1565_v60 }
 0x2f7   : > { %v1791_v3 = vadd.f32 %v1790_v0, %v1678_v1  ;;  %v3513_v1 = vld [vmem:[%s4283_s29 + $0x390] sm:$0xff] }
 0x2f9   : > { %v2798_v4 = vadd.f32 %v1791_v3, %v478_v2  ;;  %1727 = vmatmul.f32.gmra.mxu2 %v3497_v5  ;;  %v1454_v6 = vpop.f32.mrf.mxu0 }
 0x2fa   : > { %v1567_v7 = vpop.f32.mrf.mxu1  ;;  %1840 = vmatmul.f32.gmra.mxu3 %v3498_v8 }
 0x2fb   : > { %v1568_v9 = vadd.f32 %v1567_v7, %v1454_v6  ;;  %2926 = vst [vmem:[%s4305_s8 + $0xe8] sm:$0xff] %v2798_v4  ;;  %v3514_v4 = vld [vmem:[%s4283_s29 + $0x398] sm:$0xff] }
 0x2fc   : > { %v1680_v12 = vpop.f32.mrf.mxu2  ;;  %1501 = vmatmul.f32.gmra.mxu0 %v3499_v13  ;;  %v896_v6 = vld [vmem:[%s4291_s6 + $0x5f8] sm:$0xff] }
 0x2fd   : > { %1614 = vmatmul.f32.gmra.mxu1 %v3500_v14  ;;  %v1793_v15 = vpop.f32.mrf.mxu3  ;;  %v1681_v16 = vadd.f32 %v1680_v12, %v1568_v9  ;;  %v960_v7 = vld [vmem:[%s4291_s6 + $0x7f8] sm:$0xff]  ;;  %v3515_v9 = vld [vmem:[%s4283_s29 + $0x380] sm:$0xff]  ;;  %2543 = vmatpush.msrb.mxu2 %v896_v6  ;;  %v3532_v6 = vld [vmem:[%s4283_s29 + $0x8] sm:$0xff] }
 0x2fe   : > { %2656 = vmatpush.msrb.mxu3 %v960_v7  ;;  %v768_v13 = vld [vmem:[%s4291_s6 + $0x1f8] sm:$0xff] }
 0x2ff   : > { %v1794_v20 = vadd.f32 %v1793_v15, %v1681_v16  ;;  %v832_v14 = vld [vmem:[%s4291_s6 + $0x3f8] sm:$0xff]  ;;  %v498_v15 = vld [vmem:[%s4305_s8 + $0x188] sm:$0xff]  ;;  %2317 = vmatpush.msrb.mxu0 %v768_v13 }
 0x300   : > { %2430 = vmatpush.msrb.mxu1 %v832_v14  ;;  %v3533_v14 = vld [vmem:[%s4283_s29 + $0x30] sm:$0xff] }
 0x301   : > { %v2802_v21 = vadd.f32 %v1794_v20, %v482_v19  ;;  %1730 = vmatmul.f32.gmra.mxu2 %v3501_v22  ;;  %v1457_v23 = vpop.f32.mrf.mxu0 }
 0x302   : > { %v1570_v24 = vpop.f32.mrf.mxu1  ;;  %1843 = vmatmul.f32.gmra.mxu3 %v3502_v25  ;;  %v3520_v25 = vld [vmem:[%s4283_s29 + $0x3a8] sm:$0xff] }
 0x303   : > { %v1571_v26 = vadd.f32 %v1570_v24, %v1457_v23  ;;  %2930 = vst [vmem:[%s4305_s8 + $0x108] sm:$0xff] %v2802_v21  ;;  %v3518_v21 = vld [vmem:[%s4283_s29 + $0x3b8] sm:$0xff]  ;;  %v3519_v24 = vld [vmem:[%s4283_s29 + $0x3a0] sm:$0xff] }
 0x304   : > { %v1683_v27 = vpop.f32.mrf.mxu2  ;;  %1504 = vmatmul.f32.gmra.mxu0 %v3503_v28  ;;  %v502_v28 = vld [vmem:[%s4305_s8 + $0x1a8] sm:$0xff] }
 0x305   : > { %1617 = vmatmul.f32.gmra.mxu1 %v3504_v29  ;;  %v1796_v30 = vpop.f32.mrf.mxu3  ;;  %v1684_v31 = vadd.f32 %v1683_v27, %v1571_v26 }
 0x307   : > { %v1797_v33 = vadd.f32 %v1796_v30, %v1684_v31  ;;  %v3521_v31 = vld [vmem:[%s4283_s29 + $0x3d0] sm:$0xff] }
 0x309   : > { %v2806_v34 = vadd.f32 %v1797_v33, %v486_v32  ;;  %1733 = vmatmul.f32.gmra.mxu2 %v3505_v35  ;;  %v1460_v36 = vpop.f32.mrf.mxu0 }
 0x30a   : > { %v1573_v37 = vpop.f32.mrf.mxu1  ;;  %1846 = vmatmul.f32.gmra.mxu3 %v3506_v38 }
 0x30b   : > { %v1574_v39 = vadd.f32 %v1573_v37, %v1460_v36  ;;  %2934 = vst [vmem:[%s4305_s8 + $0x128] sm:$0xff] %v2806_v34  ;;  %v3522_v34 = vld [vmem:[%s4283_s29 + $0x3d8] sm:$0xff] }
 0x30c   : > { %v1686_v42 = vpop.f32.mrf.mxu2  ;;  %1507 = vmatmul.f32.gmra.mxu0 %v3507_v43  ;;  %v892_v36 = vld [vmem:[%s4291_s6 + $0x5d8] sm:$0xff] }
 0x30d   : > { %1620 = vmatmul.f32.gmra.mxu1 %v3508_v44  ;;  %v1799_v45 = vpop.f32.mrf.mxu3  ;;  %v1687_v46 = vadd.f32 %v1686_v42, %v1574_v39  ;;  %v956_v37 = vld [vmem:[%s4291_s6 + $0x7d8] sm:$0xff]  ;;  %v3523_v39 = vld [vmem:[%s4283_s29 + $0x3c0] sm:$0xff]  ;;  %2544 = vmatpush.msrb.mxu2 %v892_v36  ;;  %v3540_v36 = vld [vmem:[%s4283_s29 + $0x48] sm:$0xff] }
 0x30e   : > { %2657 = vmatpush.msrb.mxu3 %v956_v37  ;;  %v764_v43 = vld [vmem:[%s4291_s6 + $0x1d8] sm:$0xff] }
 0x30f   : > { %v1800_v50 = vadd.f32 %v1799_v45, %v1687_v46  ;;  %v828_v44 = vld [vmem:[%s4291_s6 + $0x3d8] sm:$0xff]  ;;  %v506_v45 = vld [vmem:[%s4305_s8 + $0x1c8] sm:$0xff]  ;;  %2318 = vmatpush.msrb.mxu0 %v764_v43 }
 0x310   : > { %2431 = vmatpush.msrb.mxu1 %v828_v44  ;;  %v3541_v44 = vld [vmem:[%s4283_s29 + $0x70] sm:$0xff] }
 0x311   : > { %v2810_v51 = vadd.f32 %v1800_v50, %v490_v49  ;;  %1736 = vmatmul.f32.gmra.mxu2 %v3509_v52  ;;  %v1463_v53 = vpop.f32.mrf.mxu0 }
 0x312   : > { %v1576_v54 = vpop.f32.mrf.mxu1  ;;  %1849 = vmatmul.f32.gmra.mxu3 %v3510_v55  ;;  %v3528_v55 = vld [vmem:[%s4283_s29 + $0x3e8] sm:$0xff] }
 0x313   : > { %v1577_v56 = vadd.f32 %v1576_v54, %v1463_v53  ;;  %2938 = vst [vmem:[%s4305_s8 + $0x148] sm:$0xff] %v2810_v51  ;;  %v3526_v51 = vld [vmem:[%s4283_s29 + $0x3f8] sm:$0xff]  ;;  %v3527_v54 = vld [vmem:[%s4283_s29 + $0x3e0] sm:$0xff] }
 0x314   : > { %v1689_v57 = vpop.f32.mrf.mxu2  ;;  %1510 = vmatmul.f32.gmra.mxu0 %v3511_v58  ;;  %v510_v58 = vld [vmem:[%s4305_s8 + $0x1e8] sm:$0xff] }
 0x315   : > { %1623 = vmatmul.f32.gmra.mxu1 %v3512_v59  ;;  %v1802_v60 = vpop.f32.mrf.mxu3  ;;  %v1690_v61 = vadd.f32 %v1689_v57, %v1577_v56 }
 0x317   : > { %v1803_v63 = vadd.f32 %v1802_v60, %v1690_v61  ;;  %v3529_v61 = vld [vmem:[%s4283_s29 + $0x10] sm:$0xff] }
 0x319   : > { %v2814_v0 = vadd.f32 %v1803_v63, %v494_v62  ;;  %1739 = vmatmul.f32.gmra.mxu2 %v3513_v1  ;;  %v1466_v2 = vpop.f32.mrf.mxu0 }
 0x31a   : > { %v1579_v3 = vpop.f32.mrf.mxu1  ;;  %1852 = vmatmul.f32.gmra.mxu3 %v3514_v4 }
 0x31b   : > { %v1580_v5 = vadd.f32 %v1579_v3, %v1466_v2  ;;  %2942 = vst [vmem:[%s4305_s8 + $0x168] sm:$0xff] %v2814_v0  ;;  %v3530_v0 = vld [vmem:[%s4283_s29 + $0x18] sm:$0xff] }
 0x31c   : > { %v1692_v8 = vpop.f32.mrf.mxu2  ;;  %1513 = vmatmul.f32.gmra.mxu0 %v3515_v9  ;;  %v888_v2 = vld [vmem:[%s4291_s6 + $0x5b8] sm:$0xff] }
 0x31d   : > { %1626 = vmatmul.f32.gmra.mxu1 %v3516_v10  ;;  %v1805_v11 = vpop.f32.mrf.mxu3  ;;  %v1693_v12 = vadd.f32 %v1692_v8, %v1580_v5  ;;  %v952_v3 = vld [vmem:[%s4291_s6 + $0x7b8] sm:$0xff]  ;;  %v3531_v5 = vld [vmem:[%s4283_s29] sm:$0xff]  ;;  %2545 = vmatpush.msrb.mxu2 %v888_v2  ;;  %v3548_v2 = vld [vmem:[%s4283_s29 + $0x88] sm:$0xff] }
 0x31e   : > { %2658 = vmatpush.msrb.mxu3 %v952_v3  ;;  %v760_v9 = vld [vmem:[%s4291_s6 + $0x1b8] sm:$0xff] }
 0x31f   : > { %v1806_v16 = vadd.f32 %v1805_v11, %v1693_v12  ;;  %v824_v10 = vld [vmem:[%s4291_s6 + $0x3b8] sm:$0xff]  ;;  %v514_v11 = vld [vmem:[%s4305_s8 + $0x208] sm:$0xff]  ;;  %2319 = vmatpush.msrb.mxu0 %v760_v9 }
 0x320   : > { %2432 = vmatpush.msrb.mxu1 %v824_v10  ;;  %v3549_v10 = vld [vmem:[%s4283_s29 + $0xb0] sm:$0xff] }
 0x321   : > { %v2818_v17 = vadd.f32 %v1806_v16, %v498_v15  ;;  %1742 = vmatmul.f32.gmra.mxu2 %v3517_v18  ;;  %v1469_v19 = vpop.f32.mrf.mxu0 }
 0x322   : > { %v1582_v20 = vpop.f32.mrf.mxu1  ;;  %1855 = vmatmul.f32.gmra.mxu3 %v3518_v21  ;;  %v3536_v21 = vld [vmem:[%s4283_s29 + $0x28] sm:$0xff] }
 0x323   : > { %v1583_v22 = vadd.f32 %v1582_v20, %v1469_v19  ;;  %2946 = vst [vmem:[%s4305_s8 + $0x188] sm:$0xff] %v2818_v17  ;;  %v3534_v17 = vld [vmem:[%s4283_s29 + $0x38] sm:$0xff]  ;;  %v3535_v20 = vld [vmem:[%s4283_s29 + $0x20] sm:$0xff] }
 0x324   : > { %v1695_v23 = vpop.f32.mrf.mxu2  ;;  %1516 = vmatmul.f32.gmra.mxu0 %v3519_v24  ;;  %v518_v24 = vld [vmem:[%s4305_s8 + $0x228] sm:$0xff] }
 0x325   : > { %1629 = vmatmul.f32.gmra.mxu1 %v3520_v25  ;;  %v1808_v26 = vpop.f32.mrf.mxu3  ;;  %v1696_v27 = vadd.f32 %v1695_v23, %v1583_v22 }
 0x327   : > { %v1809_v29 = vadd.f32 %v1808_v26, %v1696_v27  ;;  %v3537_v27 = vld [vmem:[%s4283_s29 + $0x50] sm:$0xff] }
 0x329   : > { %v2822_v30 = vadd.f32 %v1809_v29, %v502_v28  ;;  %1745 = vmatmul.f32.gmra.mxu2 %v3521_v31  ;;  %v1472_v32 = vpop.f32.mrf.mxu0 }
 0x32a   : > { %v1585_v33 = vpop.f32.mrf.mxu1  ;;  %1858 = vmatmul.f32.gmra.mxu3 %v3522_v34 }
 0x32b   : > { %v1586_v35 = vadd.f32 %v1585_v33, %v1472_v32  ;;  %2950 = vst [vmem:[%s4305_s8 + $0x1a8] sm:$0xff] %v2822_v30  ;;  %v3538_v30 = vld [vmem:[%s4283_s29 + $0x58] sm:$0xff] }
 0x32c   : > { %v1698_v38 = vpop.f32.mrf.mxu2  ;;  %1519 = vmatmul.f32.gmra.mxu0 %v3523_v39  ;;  %v884_v32 = vld [vmem:[%s4291_s6 + $0x598] sm:$0xff] }
 0x32d   : > { %1632 = vmatmul.f32.gmra.mxu1 %v3524_v40  ;;  %v1811_v41 = vpop.f32.mrf.mxu3  ;;  %v1699_v42 = vadd.f32 %v1698_v38, %v1586_v35  ;;  %v948_v33 = vld [vmem:[%s4291_s6 + $0x798] sm:$0xff]  ;;  %v3539_v35 = vld [vmem:[%s4283_s29 + $0x40] sm:$0xff]  ;;  %2546 = vmatpush.msrb.mxu2 %v884_v32  ;;  %v3556_v32 = vld [vmem:[%s4283_s29 + $0xc8] sm:$0xff] }
 0x32e   : > { %2659 = vmatpush.msrb.mxu3 %v948_v33  ;;  %v756_v39 = vld [vmem:[%s4291_s6 + $0x198] sm:$0xff] }
 0x32f   : > { %v1812_v46 = vadd.f32 %v1811_v41, %v1699_v42  ;;  %v820_v40 = vld [vmem:[%s4291_s6 + $0x398] sm:$0xff]  ;;  %v522_v41 = vld [vmem:[%s4305_s8 + $0x248] sm:$0xff]  ;;  %2320 = vmatpush.msrb.mxu0 %v756_v39 }
 0x330   : > { %2433 = vmatpush.msrb.mxu1 %v820_v40  ;;  %v3557_v40 = vld [vmem:[%s4283_s29 + $0xf0] sm:$0xff] }
 0x331   : > { %v2826_v47 = vadd.f32 %v1812_v46, %v506_v45  ;;  %1748 = vmatmul.f32.gmra.mxu2 %v3525_v48  ;;  %v1475_v49 = vpop.f32.mrf.mxu0 }
 0x332   : > { %v1588_v50 = vpop.f32.mrf.mxu1  ;;  %1861 = vmatmul.f32.gmra.mxu3 %v3526_v51  ;;  %v3544_v51 = vld [vmem:[%s4283_s29 + $0x68] sm:$0xff] }
 0x333   : > { %v1589_v52 = vadd.f32 %v1588_v50, %v1475_v49  ;;  %2954 = vst [vmem:[%s4305_s8 + $0x1c8] sm:$0xff] %v2826_v47  ;;  %v3542_v47 = vld [vmem:[%s4283_s29 + $0x78] sm:$0xff]  ;;  %v3543_v50 = vld [vmem:[%s4283_s29 + $0x60] sm:$0xff] }
 0x334   : > { %v1701_v53 = vpop.f32.mrf.mxu2  ;;  %1522 = vmatmul.f32.gmra.mxu0 %v3527_v54  ;;  %v526_v54 = vld [vmem:[%s4305_s8 + $0x268] sm:$0xff] }
 0x335   : > { %1635 = vmatmul.f32.gmra.mxu1 %v3528_v55  ;;  %v1814_v56 = vpop.f32.mrf.mxu3  ;;  %v1702_v57 = vadd.f32 %v1701_v53, %v1589_v52 }
 0x337   : > { %v1815_v59 = vadd.f32 %v1814_v56, %v1702_v57  ;;  %v3545_v57 = vld [vmem:[%s4283_s29 + $0x90] sm:$0xff] }
 0x339   : > { %v2830_v60 = vadd.f32 %v1815_v59, %v510_v58  ;;  %2107 = vmatmul.f32.vlgmr.msra.gmra.mxu2 %v3529_v61  ;;  %v1478_v62 = vpop.f32.mrf.mxu0 }
 0x33a   : > { %v1591_v63 = vpop.f32.mrf.mxu1  ;;  %2220 = vmatmul.f32.vlgmr.msra.gmra.mxu3 %v3530_v0 }
 0x33b   : > { %v1592_v1 = vadd.f32 %v1591_v63, %v1478_v62  ;;  %2958 = vst [vmem:[%s4305_s8 + $0x1e8] sm:$0xff] %v2830_v60  ;;  %v3546_v60 = vld [vmem:[%s4283_s29 + $0x98] sm:$0xff] }
 0x33c   : > { %v1704_v4 = vpop.f32.mrf.mxu2  ;;  %1881 = vmatmul.f32.vlgmr.msra.gmra.mxu0 %v3531_v5  ;;  %v880_v62 = vld [vmem:[%s4291_s6 + $0x578] sm:$0xff] }
 0x33d   : > { %1994 = vmatmul.f32.vlgmr.msra.gmra.mxu1 %v3532_v6  ;;  %v1817_v7 = vpop.f32.mrf.mxu3  ;;  %v1705_v8 = vadd.f32 %v1704_v4, %v1592_v1  ;;  %v944_v63 = vld [vmem:[%s4291_s6 + $0x778] sm:$0xff]  ;;  %v3547_v1 = vld [vmem:[%s4283_s29 + $0x80] sm:$0xff]  ;;  %2547 = vmatpush.msrb.mxu2 %v880_v62  ;;  %v3564_v62 = vld [vmem:[%s4283_s29 + $0x108] sm:$0xff] }
 0x33e   : > { %2660 = vmatpush.msrb.mxu3 %v944_v63  ;;  %v752_v5 = vld [vmem:[%s4291_s6 + $0x178] sm:$0xff] }
 0x33f   : > { %v1818_v12 = vadd.f32 %v1817_v7, %v1705_v8  ;;  %v816_v6 = vld [vmem:[%s4291_s6 + $0x378] sm:$0xff]  ;;  %v530_v7 = vld [vmem:[%s4305_s8 + $0x288] sm:$0xff]  ;;  %2321 = vmatpush.msrb.mxu0 %v752_v5 }
 0x340   : > { %2434 = vmatpush.msrb.mxu1 %v816_v6  ;;  %v3565_v6 = vld [vmem:[%s4283_s29 + $0x130] sm:$0xff] }
 0x341   : > { %v2834_v13 = vadd.f32 %v1818_v12, %v514_v11  ;;  %2110 = vmatmul.f32.gmra.mxu2 %v3533_v14  ;;  %v1481_v15 = vpop.f32.mrf.mxu0 }
 0x342   : > { %v1594_v16 = vpop.f32.mrf.mxu1  ;;  %2223 = vmatmul.f32.gmra.mxu3 %v3534_v17  ;;  %v3552_v17 = vld [vmem:[%s4283_s29 + $0xa8] sm:$0xff] }
 0x343   : > { %v1595_v18 = vadd.f32 %v1594_v16, %v1481_v15  ;;  %2962 = vst [vmem:[%s4305_s8 + $0x208] sm:$0xff] %v2834_v13  ;;  %v3550_v13 = vld [vmem:[%s4283_s29 + $0xb8] sm:$0xff]  ;;  %v3551_v16 = vld [vmem:[%s4283_s29 + $0xa0] sm:$0xff] }
 0x344   : > { %v1707_v19 = vpop.f32.mrf.mxu2  ;;  %1884 = vmatmul.f32.gmra.mxu0 %v3535_v20  ;;  %v534_v20 = vld [vmem:[%s4305_s8 + $0x2a8] sm:$0xff] }
 0x345   : > { %1997 = vmatmul.f32.gmra.mxu1 %v3536_v21  ;;  %v1820_v22 = vpop.f32.mrf.mxu3  ;;  %v1708_v23 = vadd.f32 %v1707_v19, %v1595_v18 }
 0x347   : > { %v1821_v25 = vadd.f32 %v1820_v22, %v1708_v23  ;;  %v3553_v23 = vld [vmem:[%s4283_s29 + $0xd0] sm:$0xff] }
 0x349   : > { %v2838_v26 = vadd.f32 %v1821_v25, %v518_v24  ;;  %2113 = vmatmul.f32.gmra.mxu2 %v3537_v27  ;;  %v1484_v28 = vpop.f32.mrf.mxu0 }
 0x34a   : > { %v1597_v29 = vpop.f32.mrf.mxu1  ;;  %2226 = vmatmul.f32.gmra.mxu3 %v3538_v30 }
 0x34b   : > { %v1598_v31 = vadd.f32 %v1597_v29, %v1484_v28  ;;  %2966 = vst [vmem:[%s4305_s8 + $0x228] sm:$0xff] %v2838_v26  ;;  %v3554_v26 = vld [vmem:[%s4283_s29 + $0xd8] sm:$0xff] }
 0x34c   : > { %v1710_v34 = vpop.f32.mrf.mxu2  ;;  %1887 = vmatmul.f32.gmra.mxu0 %v3539_v35  ;;  %v876_v28 = vld [vmem:[%s4291_s6 + $0x558] sm:$0xff] }
 0x34d   : > { %2000 = vmatmul.f32.gmra.mxu1 %v3540_v36  ;;  %v1823_v37 = vpop.f32.mrf.mxu3  ;;  %v1711_v38 = vadd.f32 %v1710_v34, %v1598_v31  ;;  %v940_v29 = vld [vmem:[%s4291_s6 + $0x758] sm:$0xff]  ;;  %v3555_v31 = vld [vmem:[%s4283_s29 + $0xc0] sm:$0xff]  ;;  %2548 = vmatpush.msrb.mxu2 %v876_v28  ;;  %v3572_v28 = vld [vmem:[%s4283_s29 + $0x148] sm:$0xff] }
 0x34e   : > { %2661 = vmatpush.msrb.mxu3 %v940_v29  ;;  %v748_v35 = vld [vmem:[%s4291_s6 + $0x158] sm:$0xff] }
 0x34f   : > { %v1824_v42 = vadd.f32 %v1823_v37, %v1711_v38  ;;  %v812_v36 = vld [vmem:[%s4291_s6 + $0x358] sm:$0xff]  ;;  %v538_v37 = vld [vmem:[%s4305_s8 + $0x2c8] sm:$0xff]  ;;  %2322 = vmatpush.msrb.mxu0 %v748_v35 }
 0x350   : > { %2435 = vmatpush.msrb.mxu1 %v812_v36  ;;  %v3573_v36 = vld [vmem:[%s4283_s29 + $0x170] sm:$0xff] }
 0x351   : > { %v2842_v43 = vadd.f32 %v1824_v42, %v522_v41  ;;  %2116 = vmatmul.f32.gmra.mxu2 %v3541_v44  ;;  %v1487_v45 = vpop.f32.mrf.mxu0 }
 0x352   : > { %v1600_v46 = vpop.f32.mrf.mxu1  ;;  %2229 = vmatmul.f32.gmra.mxu3 %v3542_v47  ;;  %v3560_v47 = vld [vmem:[%s4283_s29 + $0xe8] sm:$0xff] }
 0x353   : > { %v1601_v48 = vadd.f32 %v1600_v46, %v1487_v45  ;;  %2970 = vst [vmem:[%s4305_s8 + $0x248] sm:$0xff] %v2842_v43  ;;  %v3558_v43 = vld [vmem:[%s4283_s29 + $0xf8] sm:$0xff]  ;;  %v3559_v46 = vld [vmem:[%s4283_s29 + $0xe0] sm:$0xff] }
 0x354   : > { %v1713_v49 = vpop.f32.mrf.mxu2  ;;  %1890 = vmatmul.f32.gmra.mxu0 %v3543_v50  ;;  %v542_v50 = vld [vmem:[%s4305_s8 + $0x2e8] sm:$0xff] }
 0x355   : > { %2003 = vmatmul.f32.gmra.mxu1 %v3544_v51  ;;  %v1826_v52 = vpop.f32.mrf.mxu3  ;;  %v1714_v53 = vadd.f32 %v1713_v49, %v1601_v48 }
 0x357   : > { %v1827_v55 = vadd.f32 %v1826_v52, %v1714_v53  ;;  %v3561_v53 = vld [vmem:[%s4283_s29 + $0x110] sm:$0xff] }
 0x359   : > { %v2846_v56 = vadd.f32 %v1827_v55, %v526_v54  ;;  %2119 = vmatmul.f32.gmra.mxu2 %v3545_v57  ;;  %v1490_v58 = vpop.f32.mrf.mxu0 }
 0x35a   : > { %v1603_v59 = vpop.f32.mrf.mxu1  ;;  %2232 = vmatmul.f32.gmra.mxu3 %v3546_v60 }
 0x35b   : > { %v1604_v61 = vadd.f32 %v1603_v59, %v1490_v58  ;;  %2974 = vst [vmem:[%s4305_s8 + $0x268] sm:$0xff] %v2846_v56  ;;  %v3562_v56 = vld [vmem:[%s4283_s29 + $0x118] sm:$0xff] }
 0x35c   : > { %v1716_v0 = vpop.f32.mrf.mxu2  ;;  %1893 = vmatmul.f32.gmra.mxu0 %v3547_v1  ;;  %v872_v58 = vld [vmem:[%s4291_s6 + $0x538] sm:$0xff] }
 0x35d   : > { %2006 = vmatmul.f32.gmra.mxu1 %v3548_v2  ;;  %v1829_v3 = vpop.f32.mrf.mxu3  ;;  %v1717_v4 = vadd.f32 %v1716_v0, %v1604_v61  ;;  %v936_v59 = vld [vmem:[%s4291_s6 + $0x738] sm:$0xff]  ;;  %v3563_v61 = vld [vmem:[%s4283_s29 + $0x100] sm:$0xff]  ;;  %2549 = vmatpush.msrb.mxu2 %v872_v58  ;;  %v5099_v58 = vld [vmem:[%s4283_s29 + $0x188] sm:$0xff] }
 0x35e   : > { %2662 = vmatpush.msrb.mxu3 %v936_v59  ;;  %v744_v1 = vld [vmem:[%s4291_s6 + $0x138] sm:$0xff] }
 0x35f   : > { %v1830_v8 = vadd.f32 %v1829_v3, %v1717_v4  ;;  %v808_v2 = vld [vmem:[%s4291_s6 + $0x338] sm:$0xff]  ;;  %v546_v3 = vld [vmem:[%s4305_s8 + $0x308] sm:$0xff]  ;;  %2323 = vmatpush.msrb.mxu0 %v744_v1 }
 0x360   : > { %2436 = vmatpush.msrb.mxu1 %v808_v2  ;;  %v5106_v2 = vld [vmem:[%s4283_s29 + $0x1b0] sm:$0xff] }
 0x361   : > { %v2850_v9 = vadd.f32 %v1830_v8, %v530_v7  ;;  %2122 = vmatmul.f32.gmra.mxu2 %v3549_v10  ;;  %v1493_v11 = vpop.f32.mrf.mxu0 }
 0x362   : > { %v1606_v12 = vpop.f32.mrf.mxu1  ;;  %2235 = vmatmul.f32.gmra.mxu3 %v3550_v13  ;;  %v3568_v13 = vld [vmem:[%s4283_s29 + $0x128] sm:$0xff] }
 0x363   : > { %v1607_v14 = vadd.f32 %v1606_v12, %v1493_v11  ;;  %2978 = vst [vmem:[%s4305_s8 + $0x288] sm:$0xff] %v2850_v9  ;;  %v3566_v9 = vld [vmem:[%s4283_s29 + $0x138] sm:$0xff]  ;;  %v3567_v12 = vld [vmem:[%s4283_s29 + $0x120] sm:$0xff] }
 0x364   : > { %v1719_v15 = vpop.f32.mrf.mxu2  ;;  %1896 = vmatmul.f32.gmra.mxu0 %v3551_v16  ;;  %v550_v16 = vld [vmem:[%s4305_s8 + $0x328] sm:$0xff] }
 0x365   : > { %2009 = vmatmul.f32.gmra.mxu1 %v3552_v17  ;;  %v1832_v18 = vpop.f32.mrf.mxu3  ;;  %v1720_v19 = vadd.f32 %v1719_v15, %v1607_v14 }
 0x367   : > { %v1833_v21 = vadd.f32 %v1832_v18, %v1720_v19  ;;  %v3569_v19 = vld [vmem:[%s4283_s29 + $0x150] sm:$0xff] }
 0x369   : > { %v2854_v22 = vadd.f32 %v1833_v21, %v534_v20  ;;  %2125 = vmatmul.f32.gmra.mxu2 %v3553_v23  ;;  %v1496_v24 = vpop.f32.mrf.mxu0 }
 0x36a   : > { %v1609_v25 = vpop.f32.mrf.mxu1  ;;  %2238 = vmatmul.f32.gmra.mxu3 %v3554_v26 }
 0x36b   : > { %v1610_v27 = vadd.f32 %v1609_v25, %v1496_v24  ;;  %2982 = vst [vmem:[%s4305_s8 + $0x2a8] sm:$0xff] %v2854_v22  ;;  %v3570_v22 = vld [vmem:[%s4283_s29 + $0x158] sm:$0xff] }
 0x36c   : > { %v1722_v30 = vpop.f32.mrf.mxu2  ;;  %1899 = vmatmul.f32.gmra.mxu0 %v3555_v31  ;;  %v868_v24 = vld [vmem:[%s4291_s6 + $0x518] sm:$0xff] }
 0x36d   : > { %2012 = vmatmul.f32.gmra.mxu1 %v3556_v32  ;;  %v1835_v33 = vpop.f32.mrf.mxu3  ;;  %v1723_v34 = vadd.f32 %v1722_v30, %v1610_v27  ;;  %v932_v25 = vld [vmem:[%s4291_s6 + $0x718] sm:$0xff]  ;;  %v3571_v27 = vld [vmem:[%s4283_s29 + $0x140] sm:$0xff]  ;;  %2550 = vmatpush.msrb.mxu2 %v868_v24  ;;  %v5139_v24 = vld [vmem:[%s4283_s29 + $0x1c8] sm:$0xff] }
 0x36e   : > { %2663 = vmatpush.msrb.mxu3 %v932_v25  ;;  %v740_v31 = vld [vmem:[%s4291_s6 + $0x118] sm:$0xff] }
 0x36f   : > { %v1836_v38 = vadd.f32 %v1835_v33, %v1723_v34  ;;  %v804_v32 = vld [vmem:[%s4291_s6 + $0x318] sm:$0xff]  ;;  %v554_v33 = vld [vmem:[%s4305_s8 + $0x348] sm:$0xff]  ;;  %2324 = vmatpush.msrb.mxu0 %v740_v31 }
 0x370   : > { %2437 = vmatpush.msrb.mxu1 %v804_v32  ;;  %v5146_v32 = vld [vmem:[%s4283_s29 + $0x1f0] sm:$0xff] }
 0x371   : > { %v2858_v39 = vadd.f32 %v1836_v38, %v538_v37  ;;  %2128 = vmatmul.f32.gmra.mxu2 %v3557_v40  ;;  %v1499_v41 = vpop.f32.mrf.mxu0 }
 0x372   : > { %v1612_v42 = vpop.f32.mrf.mxu1  ;;  %2241 = vmatmul.f32.gmra.mxu3 %v3558_v43  ;;  %v3576_v43 = vld [vmem:[%s4283_s29 + $0x168] sm:$0xff] }
 0x373   : > { %v1613_v44 = vadd.f32 %v1612_v42, %v1499_v41  ;;  %2986 = vst [vmem:[%s4305_s8 + $0x2c8] sm:$0xff] %v2858_v39  ;;  %v3574_v39 = vld [vmem:[%s4283_s29 + $0x178] sm:$0xff]  ;;  %v3575_v42 = vld [vmem:[%s4283_s29 + $0x160] sm:$0xff] }
 0x374   : > { %v1725_v45 = vpop.f32.mrf.mxu2  ;;  %1902 = vmatmul.f32.gmra.mxu0 %v3559_v46  ;;  %v558_v46 = vld [vmem:[%s4305_s8 + $0x368] sm:$0xff] }
 0x375   : > { %2015 = vmatmul.f32.gmra.mxu1 %v3560_v47  ;;  %v1838_v48 = vpop.f32.mrf.mxu3  ;;  %v1726_v49 = vadd.f32 %v1725_v45, %v1613_v44 }
 0x377   : > { %v1839_v51 = vadd.f32 %v1838_v48, %v1726_v49  ;;  %v3577_v49 = vld [vmem:[%s4283_s29 + $0x190] sm:$0xff] }
 0x379   : > { %v2862_v52 = vadd.f32 %v1839_v51, %v542_v50  ;;  %2131 = vmatmul.f32.gmra.mxu2 %v3561_v53  ;;  %v1502_v54 = vpop.f32.mrf.mxu0 }
 0x37a   : > { %v1615_v55 = vpop.f32.mrf.mxu1  ;;  %2244 = vmatmul.f32.gmra.mxu3 %v3562_v56 }
 0x37b   : > { %v1616_v57 = vadd.f32 %v1615_v55, %v1502_v54  ;;  %2990 = vst [vmem:[%s4305_s8 + $0x2e8] sm:$0xff] %v2862_v52  ;;  %v3578_v52 = vld [vmem:[%s4283_s29 + $0x198] sm:$0xff] }
 0x37c   : > { %v1728_v60 = vpop.f32.mrf.mxu2  ;;  %1905 = vmatmul.f32.gmra.mxu0 %v3563_v61  ;;  %v864_v54 = vld [vmem:[%s4291_s6 + $0x4f8] sm:$0xff] }
 0x37d   : > { %2018 = vmatmul.f32.gmra.mxu1 %v3564_v62  ;;  %v1841_v63 = vpop.f32.mrf.mxu3  ;;  %v1729_v0 = vadd.f32 %v1728_v60, %v1616_v57  ;;  %v928_v55 = vld [vmem:[%s4291_s6 + $0x6f8] sm:$0xff]  ;;  %v5095_v57 = vld [vmem:[%s4283_s29 + $0x180] sm:$0xff]  ;;  %2551 = vmatpush.msrb.mxu2 %v864_v54  ;;  %v5179_v54 = vld [vmem:[%s4283_s29 + $0x208] sm:$0xff] }
 0x37e   : > { %2664 = vmatpush.msrb.mxu3 %v928_v55  ;;  %v736_v61 = vld [vmem:[%s4291_s6 + $0xf8] sm:$0xff] }
 0x37f   : > { %v1842_v4 = vadd.f32 %v1841_v63, %v1729_v0  ;;  %v800_v62 = vld [vmem:[%s4291_s6 + $0x2f8] sm:$0xff]  ;;  %v562_v63 = vld [vmem:[%s4305_s8 + $0x388] sm:$0xff]  ;;  %2325 = vmatpush.msrb.mxu0 %v736_v61 }
 0x380   : > { %2438 = vmatpush.msrb.mxu1 %v800_v62  ;;  %v451_v61 = vld [vmem:[%s4305_s8 + $0x10] sm:$0xff] }
 0x381   : > { %v2866_v5 = vadd.f32 %v1842_v4, %v546_v3  ;;  %2134 = vmatmul.f32.gmra.mxu2 %v3565_v6  ;;  %v1505_v7 = vpop.f32.mrf.mxu0 }
 0x382   : > { %v1618_v8 = vpop.f32.mrf.mxu1  ;;  %2247 = vmatmul.f32.gmra.mxu3 %v3566_v9  ;;  %v5119_v9 = vld [vmem:[%s4283_s29 + $0x1a8] sm:$0xff] }
 0x383   : > { %v1619_v10 = vadd.f32 %v1618_v8, %v1505_v7  ;;  %2994 = vst [vmem:[%s4305_s8 + $0x308] sm:$0xff] %v2866_v5  ;;  %v5110_v5 = vld [vmem:[%s4283_s29 + $0x1b8] sm:$0xff]  ;;  %v5115_v8 = vld [vmem:[%s4283_s29 + $0x1a0] sm:$0xff] }
 0x384   : > { %v1731_v11 = vpop.f32.mrf.mxu2  ;;  %1908 = vmatmul.f32.gmra.mxu0 %v3567_v12  ;;  %v566_v12 = vld [vmem:[%s4305_s8 + $0x3a8] sm:$0xff] }
 0x385   : > { %2021 = vmatmul.f32.gmra.mxu1 %v3568_v13  ;;  %v1844_v14 = vpop.f32.mrf.mxu3  ;;  %v1732_v15 = vadd.f32 %v1731_v11, %v1619_v10 }
 0x387   : > { %v1845_v17 = vadd.f32 %v1844_v14, %v1732_v15  ;;  %v5124_v15 = vld [vmem:[%s4283_s29 + $0x1d0] sm:$0xff] }
 0x389   : > { %v2870_v18 = vadd.f32 %v1845_v17, %v550_v16  ;;  %2137 = vmatmul.f32.gmra.mxu2 %v3569_v19  ;;  %v1508_v20 = vpop.f32.mrf.mxu0 }
 0x38a   : > { %v1621_v21 = vpop.f32.mrf.mxu1  ;;  %2250 = vmatmul.f32.gmra.mxu3 %v3570_v22 }
 0x38b   : > { %v1622_v23 = vadd.f32 %v1621_v21, %v1508_v20  ;;  %2998 = vst [vmem:[%s4305_s8 + $0x328] sm:$0xff] %v2870_v18  ;;  %v5128_v18 = vld [vmem:[%s4283_s29 + $0x1d8] sm:$0xff] }
 0x38c   : > { %v1734_v26 = vpop.f32.mrf.mxu2  ;;  %1911 = vmatmul.f32.gmra.mxu0 %v3571_v27  ;;  %v860_v20 = vld [vmem:[%s4291_s6 + $0x4d8] sm:$0xff] }
 0x38d   : > { %2024 = vmatmul.f32.gmra.mxu1 %v3572_v28  ;;  %v1847_v29 = vpop.f32.mrf.mxu3  ;;  %v1735_v30 = vadd.f32 %v1734_v26, %v1622_v23  ;;  %v924_v21 = vld [vmem:[%s4291_s6 + $0x6d8] sm:$0xff]  ;;  %v5135_v23 = vld [vmem:[%s4283_s29 + $0x1c0] sm:$0xff]  ;;  %2552 = vmatpush.msrb.mxu2 %v860_v20 }
 0x38e   : > { %2665 = vmatpush.msrb.mxu3 %v924_v21  ;;  %v732_v27 = vld [vmem:[%s4291_s6 + $0xd8] sm:$0xff] }
 0x38f   : > { %v1848_v34 = vadd.f32 %v1847_v29, %v1735_v30  ;;  %v796_v28 = vld [vmem:[%s4291_s6 + $0x2d8] sm:$0xff]  ;;  %v570_v29 = vld [vmem:[%s4305_s8 + $0x3c8] sm:$0xff]  ;;  %2326 = vmatpush.msrb.mxu0 %v732_v27 }
 0x390   : > { %2439 = vmatpush.msrb.mxu1 %v796_v28  ;;  %v916_v27 = vld [vmem:[%s4291_s6 + $0x698] sm:$0xff] }
 0x391   : > { %v2874_v35 = vadd.f32 %v1848_v34, %v554_v33  ;;  %2140 = vmatmul.f32.gmra.mxu2 %v3573_v36  ;;  %v1511_v37 = vpop.f32.mrf.mxu0 }
 0x392   : > { %v1624_v38 = vpop.f32.mrf.mxu1  ;;  %2253 = vmatmul.f32.gmra.mxu3 %v3574_v39  ;;  %v5159_v39 = vld [vmem:[%s4283_s29 + $0x1e8] sm:$0xff] }
 0x393   : > { %v1625_v40 = vadd.f32 %v1624_v38, %v1511_v37  ;;  %3002 = vst [vmem:[%s4305_s8 + $0x348] sm:$0xff] %v2874_v35  ;;  %v5150_v35 = vld [vmem:[%s4283_s29 + $0x1f8] sm:$0xff]  ;;  %v5155_v38 = vld [vmem:[%s4283_s29 + $0x1e0] sm:$0xff] }
 0x394   : > { %v1737_v41 = vpop.f32.mrf.mxu2  ;;  %1914 = vmatmul.f32.gmra.mxu0 %v3575_v42  ;;  %v574_v42 = vld [vmem:[%s4305_s8 + $0x3e8] sm:$0xff] }
 0x395   : > { %2027 = vmatmul.f32.gmra.mxu1 %v3576_v43  ;;  %v1850_v44 = vpop.f32.mrf.mxu3  ;;  %v1738_v45 = vadd.f32 %v1737_v41, %v1625_v40 }
 0x397   : > { %v1851_v47 = vadd.f32 %v1850_v44, %v1738_v45  ;;  %v5164_v45 = vld [vmem:[%s4283_s29 + $0x210] sm:$0xff] }
 0x399   : > { %v2878_v48 = vadd.f32 %v1851_v47, %v558_v46  ;;  %2143 = vmatmul.f32.gmra.mxu2 %v3577_v49  ;;  %v1514_v50 = vpop.f32.mrf.mxu0 }
 0x39a   : > { %v1627_v51 = vpop.f32.mrf.mxu1  ;;  %2256 = vmatmul.f32.gmra.mxu3 %v3578_v52 }
 0x39b   : > { %v1628_v53 = vadd.f32 %v1627_v51, %v1514_v50  ;;  %3006 = vst [vmem:[%s4305_s8 + $0x368] sm:$0xff] %v2878_v48  ;;  %v5168_v48 = vld [vmem:[%s4283_s29 + $0x218] sm:$0xff] }
 0x39c   : > { %v1740_v56 = vpop.f32.mrf.mxu2  ;;  %1917 = vmatmul.f32.gmra.mxu0 %v5095_v57  ;;  %v856_v50 = vld [vmem:[%s4291_s6 + $0x4b8] sm:$0xff] }
 0x39d   : > { %2030 = vmatmul.f32.gmra.mxu1 %v5099_v58  ;;  %v1853_v59 = vpop.f32.mrf.mxu3  ;;  %v1741_v60 = vadd.f32 %v1740_v56, %v1628_v53  ;;  %v920_v51 = vld [vmem:[%s4291_s6 + $0x6b8] sm:$0xff]  ;;  %v5175_v53 = vld [vmem:[%s4283_s29 + $0x200] sm:$0xff]  ;;  %2553 = vmatpush.msrb.mxu2 %v856_v50 }
 0x39e   : > { %2666 = vmatpush.msrb.mxu3 %v920_v51  ;;  %v5235_v50 = vld [vmem:[%s4283_s29 + $0x260] sm:$0xff]  ;;  %v5239_v51 = vld [vmem:[%s4283_s29 + $0x268] sm:$0xff] }
 0x39f   : > { %v1854_v0 = vadd.f32 %v1853_v59, %v1741_v60  ;;  %v728_v59 = vld [vmem:[%s4291_s6 + $0xb8] sm:$0xff] }
 0x3a0   : > { %v792_v60 = vld [vmem:[%s4291_s6 + $0x2b8] sm:$0xff]  ;;  %2327 = vmatpush.msrb.mxu0 %v728_v59  ;;  %2667 = vmatpush.msrb.mxu3 %v916_v27 }
 0x3a1   : > { %v2882_v1 = vadd.f32 %v1854_v0, %v562_v63  ;;  %2146 = vmatmul.f32.gmra.mxu2 %v5106_v2  ;;  %v1517_v3 = vpop.f32.mrf.mxu0  ;;  %2440 = vmatpush.msrb.mxu1 %v792_v60  ;;  %v5186_v0 = vld [vmem:[%s4283_s29 + $0x230] sm:$0xff] }
 0x3a2   : > { %v1630_v4 = vpop.f32.mrf.mxu1  ;;  %2259 = vmatmul.f32.gmra.mxu3 %v5110_v5 }
 0x3a3   : > { %v1631_v6 = vadd.f32 %v1630_v4, %v1517_v3  ;;  %3010 = vst [vmem:[%s4305_s8 + $0x388] sm:$0xff] %v2882_v1  ;;  %v5190_v4 = vld [vmem:[%s4283_s29 + $0x238] sm:$0xff] }
 0x3a4   : > { %v1743_v7 = vpop.f32.mrf.mxu2  ;;  %1920 = vmatmul.f32.gmra.mxu0 %v5115_v8 }
 0x3a5   : > { %2033 = vmatmul.f32.gmra.mxu1 %v5119_v9  ;;  %v1856_v10 = vpop.f32.mrf.mxu3  ;;  %v1744_v11 = vadd.f32 %v1743_v7, %v1631_v6 }
 0x3a7   : > { %v1857_v13 = vadd.f32 %v1856_v10, %v1744_v11  ;;  %v5195_v10 = vld [vmem:[%s4283_s29 + $0x220] sm:$0xff]  ;;  %v5199_v11 = vld [vmem:[%s4283_s29 + $0x228] sm:$0xff] }
 0x3a9   : > { %v2886_v14 = vadd.f32 %v1857_v13, %v566_v12  ;;  %2149 = vmatmul.f32.gmra.mxu2 %v5124_v15  ;;  %v1520_v16 = vpop.f32.mrf.mxu0 }
 0x3aa   : > { %v1633_v17 = vpop.f32.mrf.mxu1  ;;  %2262 = vmatmul.f32.gmra.mxu3 %v5128_v18 }
 0x3ab   : > { %v1634_v19 = vadd.f32 %v1633_v17, %v1520_v16  ;;  %3014 = vst [vmem:[%s4305_s8 + $0x3a8] sm:$0xff] %v2886_v14  ;;  %v455_v14 = vld [vmem:[%s4305_s8 + $0x30] sm:$0xff] }
 0x3ac   : > { %v1746_v22 = vpop.f32.mrf.mxu2  ;;  %1923 = vmatmul.f32.gmra.mxu0 %v5135_v23 }
 0x3ad   : > { %2036 = vmatmul.f32.gmra.mxu1 %v5139_v24  ;;  %v1859_v25 = vpop.f32.mrf.mxu3  ;;  %v1747_v26 = vadd.f32 %v1746_v22, %v1634_v19  ;;  %v5204_v19 = vld [vmem:[%s4283_s29 + $0x250] sm:$0xff]  ;;  %v5208_v22 = vld [vmem:[%s4283_s29 + $0x258] sm:$0xff] }
 0x3af   : > { %v1860_v30 = vadd.f32 %v1859_v25, %v1747_v26  ;;  %v852_v26 = vld [vmem:[%s4291_s6 + $0x498] sm:$0xff] }
 0x3b0   : > { %2554 = vmatpush.msrb.mxu2 %v852_v26 }
 0x3b1   : > { %v2890_v31 = vadd.f32 %v1860_v30, %v570_v29  ;;  %2152 = vmatmul.f32.gmra.mxu2 %v5146_v32  ;;  %v1523_v33 = vpop.f32.mrf.mxu0  ;;  %v5215_v29 = vld [vmem:[%s4283_s29 + $0x240] sm:$0xff]  ;;  %v5219_v30 = vld [vmem:[%s4283_s29 + $0x248] sm:$0xff] }
 0x3b2   : > { %v1636_v34 = vpop.f32.mrf.mxu1  ;;  %2265 = vmatmul.f32.gmra.mxu3 %v5150_v35 }
 0x3b3   : > { %v1637_v36 = vadd.f32 %v1636_v34, %v1523_v33  ;;  %3018 = vst [vmem:[%s4305_s8 + $0x3c8] sm:$0xff] %v2890_v31  ;;  %v724_v34 = vld [vmem:[%s4291_s6 + $0x98] sm:$0xff] }
 0x3b4   : > { %v1749_v37 = vpop.f32.mrf.mxu2  ;;  %1926 = vmatmul.f32.gmra.mxu0 %v5155_v38 }
 0x3b5   : > { %2039 = vmatmul.f32.gmra.mxu1 %v5159_v39  ;;  %v1862_v40 = vpop.f32.mrf.mxu3  ;;  %v1750_v41 = vadd.f32 %v1749_v37, %v1637_v36  ;;  %v788_v36 = vld [vmem:[%s4291_s6 + $0x298] sm:$0xff]  ;;  %2328 = vmatpush.msrb.mxu0 %v724_v34 }
 0x3b6   : > { %v459_v37 = vld [vmem:[%s4305_s8 + $0x50] sm:$0xff]  ;;  %2441 = vmatpush.msrb.mxu1 %v788_v36 }
 0x3b7   : > { %v1863_v43 = vadd.f32 %v1862_v40, %v1750_v41  ;;  %v5270_v34 = vld [vmem:[%s4283_s29 + $0x2b8] sm:$0xff] }
 0x3b9   : > { %v2894_v44 = vadd.f32 %v1863_v43, %v574_v42  ;;  %2155 = vmatmul.f32.gmra.mxu2 %v5164_v45  ;;  %v1882_v46 = vpop.f32.mrf.mxu0  ;;  %v5226_v42 = vld [vmem:[%s4283_s29 + $0x270] sm:$0xff] }
 0x3ba   : > { %v1995_v47 = vpop.f32.mrf.mxu1  ;;  %2268 = vmatmul.f32.gmra.mxu3 %v5168_v48 }
 0x3bb   : > { %v1996_v49 = vadd.f32 %v1995_v47, %v1882_v46  ;;  %3022 = vst [vmem:[%s4305_s8 + $0x3e8] sm:$0xff] %v2894_v44  ;;  %v5230_v46 = vld [vmem:[%s4283_s29 + $0x278] sm:$0xff] }
 0x3bc   : > { %v2108_v52 = vpop.f32.mrf.mxu2  ;;  %1929 = vmatmul.f32.gmra.mxu0 %v5175_v53 }
 0x3bd   : > { %2042 = vmatmul.f32.gmra.mxu1 %v5179_v54  ;;  %v2221_v55 = vpop.f32.mrf.mxu3  ;;  %v2109_v56 = vadd.f32 %v2108_v52, %v1996_v49 }
 0x3bf   : > { %v2222_v62 = vadd.f32 %v2221_v55, %v2109_v56  ;;  %v463_v56 = vld [vmem:[%s4305_s8 + $0x70] sm:$0xff] }
 0x3c1   : > { %v2771_v63 = vadd.f32 %v2222_v62, %v451_v61  ;;  %2158 = vmatmul.f32.gmra.mxu2 %v5186_v0  ;;  %v1885_v1 = vpop.f32.mrf.mxu0  ;;  %v5244_v61 = vld [vmem:[%s4283_s29 + $0x290] sm:$0xff] }
 0x3c2   : > { %v1998_v3 = vpop.f32.mrf.mxu1  ;;  %2271 = vmatmul.f32.gmra.mxu3 %v5190_v4 }
 0x3c3   : > { %v1999_v6 = vadd.f32 %v1998_v3, %v1885_v1  ;;  %2899 = vst [vmem:[%s4305_s8 + $0x10] sm:$0xff] %v2771_v63  ;;  %v5248_v1 = vld [vmem:[%s4283_s29 + $0x298] sm:$0xff] }
 0x3c4   : > { %v2111_v7 = vpop.f32.mrf.mxu2  ;;  %1932 = vmatmul.f32.gmra.mxu0 %v5195_v10 }
 0x3c5   : > { %2045 = vmatmul.f32.gmra.mxu1 %v5199_v11  ;;  %v2224_v12 = vpop.f32.mrf.mxu3  ;;  %v2112_v13 = vadd.f32 %v2111_v7, %v1999_v6  ;;  %v848_v6 = vld [vmem:[%s4291_s6 + $0x478] sm:$0xff] }
 0x3c6   : > { %v912_v7 = vld [vmem:[%s4291_s6 + $0x678] sm:$0xff]  ;;  %2555 = vmatpush.msrb.mxu2 %v848_v6 }
 0x3c7   : > { %v2225_v16 = vadd.f32 %v2224_v12, %v2112_v13  ;;  %v5255_v13 = vld [vmem:[%s4283_s29 + $0x280] sm:$0xff]  ;;  %2668 = vmatpush.msrb.mxu3 %v912_v7 }
 0x3c8   : > { %v5295_v7 = vld [vmem:[%s4283_s29 + $0x2c0] sm:$0xff] }
 0x3c9   : > { %v2775_v17 = vadd.f32 %v2225_v16, %v455_v14  ;;  %2161 = vmatmul.f32.gmra.mxu2 %v5204_v19  ;;  %v1888_v20 = vpop.f32.mrf.mxu0  ;;  %v5259_v14 = vld [vmem:[%s4283_s29 + $0x288] sm:$0xff] }
 0x3ca   : > { %v2001_v21 = vpop.f32.mrf.mxu1  ;;  %2274 = vmatmul.f32.gmra.mxu3 %v5208_v22 }
 0x3cb   : > { %v2002_v25 = vadd.f32 %v2001_v21, %v1888_v20  ;;  %2903 = vst [vmem:[%s4305_s8 + $0x30] sm:$0xff] %v2775_v17  ;;  %v720_v20 = vld [vmem:[%s4291_s6 + $0x78] sm:$0xff] }
 0x3cc   : > { %v2114_v28 = vpop.f32.mrf.mxu2  ;;  %1935 = vmatmul.f32.gmra.mxu0 %v5215_v29  ;;  %v784_v21 = vld [vmem:[%s4291_s6 + $0x278] sm:$0xff] }
 0x3cd   : > { %2048 = vmatmul.f32.gmra.mxu1 %v5219_v30  ;;  %v2227_v31 = vpop.f32.mrf.mxu3  ;;  %v2115_v33 = vadd.f32 %v2114_v28, %v2002_v25  ;;  %v467_v25 = vld [vmem:[%s4305_s8 + $0x90] sm:$0xff]  ;;  %2329 = vmatpush.msrb.mxu0 %v720_v20  ;;  %v5266_v28 = vld [vmem:[%s4283_s29 + $0x2b0] sm:$0xff] }
 0x3ce   : > { %2442 = vmatpush.msrb.mxu1 %v784_v21  ;;  %v716_v20 = vld [vmem:[%s4291_s6 + $0x58] sm:$0xff] }
 0x3cf   : > { %v2228_v40 = vadd.f32 %v2227_v31, %v2115_v33  ;;  %v780_v21 = vld [vmem:[%s4291_s6 + $0x258] sm:$0xff]  ;;  %2330 = vmatpush.msrb.mxu0 %v716_v20 }
 0x3d0   : > { %2443 = vmatpush.msrb.mxu1 %v780_v21  ;;  %v840_v21 = vld [vmem:[%s4291_s6 + $0x438] sm:$0xff] }
 0x3d1   : > { %v2779_v41 = vadd.f32 %v2228_v40, %v459_v37  ;;  %2164 = vmatmul.f32.gmra.mxu2 %v5226_v42  ;;  %v1891_v43 = vpop.f32.mrf.mxu0  ;;  %v5275_v40 = vld [vmem:[%s4283_s29 + $0x2a0] sm:$0xff] }
 0x3d2   : > { %v2004_v44 = vpop.f32.mrf.mxu1  ;;  %2277 = vmatmul.f32.gmra.mxu3 %v5230_v46 }
 0x3d3   : > { %v2005_v47 = vadd.f32 %v2004_v44, %v1891_v43  ;;  %2907 = vst [vmem:[%s4305_s8 + $0x50] sm:$0xff] %v2779_v41  ;;  %v5279_v41 = vld [vmem:[%s4283_s29 + $0x2a8] sm:$0xff] }
 0x3d4   : > { %v2117_v49 = vpop.f32.mrf.mxu2  ;;  %1938 = vmatmul.f32.gmra.mxu0 %v5235_v50 }
 0x3d5   : > { %2051 = vmatmul.f32.gmra.mxu1 %v5239_v51  ;;  %v2230_v52 = vpop.f32.mrf.mxu3  ;;  %v2118_v55 = vadd.f32 %v2117_v49, %v2005_v47  ;;  %v471_v47 = vld [vmem:[%s4305_s8 + $0xb0] sm:$0xff] }
 0x3d7   : > { %v2231_v59 = vadd.f32 %v2230_v52, %v2118_v55  ;;  %v5284_v55 = vld [vmem:[%s4283_s29 + $0x2d0] sm:$0xff] }
 0x3d9   : > { %v2783_v60 = vadd.f32 %v2231_v59, %v463_v56  ;;  %2167 = vmatmul.f32.gmra.mxu2 %v5244_v61  ;;  %v1894_v62 = vpop.f32.mrf.mxu0 }
 0x3da   : > { %v2007_v63 = vpop.f32.mrf.mxu1  ;;  %2280 = vmatmul.f32.gmra.mxu3 %v5248_v1 }
 0x3db   : > { %v2008_v3 = vadd.f32 %v2007_v63, %v1894_v62  ;;  %2911 = vst [vmem:[%s4305_s8 + $0x70] sm:$0xff] %v2783_v60  ;;  %v5288_v60 = vld [vmem:[%s4283_s29 + $0x2d8] sm:$0xff] }
 0x3dc   : > { %v2120_v12 = vpop.f32.mrf.mxu2  ;;  %1941 = vmatmul.f32.gmra.mxu0 %v5255_v13  ;;  %v844_v63 = vld [vmem:[%s4291_s6 + $0x458] sm:$0xff] }
 0x3dd   : > { %2054 = vmatmul.f32.gmra.mxu1 %v5259_v14  ;;  %v2233_v16 = vpop.f32.mrf.mxu3  ;;  %v2121_v17 = vadd.f32 %v2120_v12, %v2008_v3  ;;  %v908_v3 = vld [vmem:[%s4291_s6 + $0x658] sm:$0xff]  ;;  %v5299_v12 = vld [vmem:[%s4283_s29 + $0x2c8] sm:$0xff]  ;;  %2556 = vmatpush.msrb.mxu2 %v844_v63 }
 0x3de   : > { %2669 = vmatpush.msrb.mxu3 %v908_v3  ;;  %v5324_v3 = vld [vmem:[%s4283_s29 + $0x310] sm:$0xff] }
 0x3df   : > { %v2234_v26 = vadd.f32 %v2233_v16, %v2121_v17  ;;  %2557 = vmatpush.msrb.mxu2 %v840_v21 }
 0x3e1   : > { %v2787_v27 = vadd.f32 %v2234_v26, %v467_v25  ;;  %2170 = vmatmul.f32.gmra.mxu2 %v5266_v28  ;;  %v1897_v31 = vpop.f32.mrf.mxu0  ;;  %v475_v25 = vld [vmem:[%s4305_s8 + $0xd0] sm:$0xff] }
 0x3e2   : > { %v2010_v33 = vpop.f32.mrf.mxu1  ;;  %2283 = vmatmul.f32.gmra.mxu3 %v5270_v34 }
 0x3e3   : > { %v2011_v36 = vadd.f32 %v2010_v33, %v1897_v31  ;;  %2915 = vst [vmem:[%s4305_s8 + $0x90] sm:$0xff] %v2787_v27  ;;  %v5306_v31 = vld [vmem:[%s4283_s29 + $0x2f0] sm:$0xff] }
 0x3e4   : > { %v2123_v37 = vpop.f32.mrf.mxu2  ;;  %1944 = vmatmul.f32.gmra.mxu0 %v5275_v40 }
 0x3e5   : > { %2057 = vmatmul.f32.gmra.mxu1 %v5279_v41  ;;  %v2236_v43 = vpop.f32.mrf.mxu3  ;;  %v2124_v44 = vadd.f32 %v2123_v37, %v2011_v36  ;;  %v5310_v37 = vld [vmem:[%s4283_s29 + $0x2f8] sm:$0xff] }
 0x3e7   : > { %v2237_v49 = vadd.f32 %v2236_v43, %v2124_v44 }
 0x3e9   : > { %v2791_v52 = vadd.f32 %v2237_v49, %v471_v47  ;;  %2173 = vmatmul.f32.gmra.mxu2 %v5284_v55  ;;  %v1900_v56 = vpop.f32.mrf.mxu0  ;;  %v5315_v47 = vld [vmem:[%s4283_s29 + $0x2e0] sm:$0xff]  ;;  %v5319_v49 = vld [vmem:[%s4283_s29 + $0x2e8] sm:$0xff] }
 0x3ea   : > { %v2013_v59 = vpop.f32.mrf.mxu1  ;;  %2286 = vmatmul.f32.gmra.mxu3 %v5288_v60 }
 0x3eb   : > { %v2014_v62 = vadd.f32 %v2013_v59, %v1900_v56  ;;  %2919 = vst [vmem:[%s4305_s8 + $0xb0] sm:$0xff] %v2791_v52  ;;  %v479_v59 = vld [vmem:[%s4305_s8 + $0xf0] sm:$0xff] }
 0x3ec   : > { %v2126_v6 = vpop.f32.mrf.mxu2  ;;  %1947 = vmatmul.f32.gmra.mxu0 %v5295_v7 }
 0x3ed   : > { %2060 = vmatmul.f32.gmra.mxu1 %v5299_v12  ;;  %v2239_v16 = vpop.f32.mrf.mxu3  ;;  %v2127_v17 = vadd.f32 %v2126_v6, %v2014_v62 }
 0x3ef   : > { %v2240_v26 = vadd.f32 %v2239_v16, %v2127_v17  ;;  %v5328_v17 = vld [vmem:[%s4283_s29 + $0x318] sm:$0xff] }
 0x3f1   : > { %v2795_v27 = vadd.f32 %v2240_v26, %v475_v25  ;;  %2176 = vmatmul.f32.gmra.mxu2 %v5306_v31  ;;  %v1903_v33 = vpop.f32.mrf.mxu0  ;;  %v904_v25 = vld [vmem:[%s4291_s6 + $0x638] sm:$0xff] }
 0x3f2   : > { %v2016_v36 = vpop.f32.mrf.mxu1  ;;  %2289 = vmatmul.f32.gmra.mxu3 %v5310_v37 }
 0x3f3   : > { %v2017_v43 = vadd.f32 %v2016_v36, %v1903_v33  ;;  %2923 = vst [vmem:[%s4305_s8 + $0xd0] sm:$0xff] %v2795_v27  ;;  %v5335_v27 = vld [vmem:[%s4283_s29 + $0x300] sm:$0xff]  ;;  %v5339_v33 = vld [vmem:[%s4283_s29 + $0x308] sm:$0xff]  ;;  %2670 = vmatpush.msrb.mxu3 %v904_v25 }
 0x3f4   : > { %v2129_v44 = vpop.f32.mrf.mxu2  ;;  %1950 = vmatmul.f32.gmra.mxu0 %v5315_v47  ;;  %5875 = vst [vmem:[#allocation28_spill] sm:$0xff] %v5335_v27 }
 0x3f5   : > { %2063 = vmatmul.f32.gmra.mxu1 %v5319_v49  ;;  %v2242_v52 = vpop.f32.mrf.mxu3  ;;  %v2130_v56 = vadd.f32 %v2129_v44, %v2017_v43  ;;  %5876 = vst [vmem:[#allocation29_spill] sm:$0xff] %v5339_v33  ;;  %v712_v44 = vld [vmem:[%s4291_s6 + $0x38] sm:$0xff] }
 0x3f6   : > { %2331 = vmatpush.msrb.mxu0 %v712_v44 }
 0x3f7   : > { %v2243_v62 = vadd.f32 %v2242_v52, %v2130_v56  ;;  %v776_v52 = vld [vmem:[%s4291_s6 + $0x238] sm:$0xff] }
 0x3f8   : > { %v483_v56 = vld [vmem:[%s4305_s8 + $0x110] sm:$0xff]  ;;  %2444 = vmatpush.msrb.mxu1 %v776_v52 }
 0x3f9   : > { %v2799_v63 = vadd.f32 %v2243_v62, %v479_v59  ;;  %2179 = vmatmul.f32.gmra.mxu2 %v5324_v3  ;;  %v1906_v6 = vpop.f32.mrf.mxu0  ;;  %v487_v52 = vld [vmem:[%s4305_s8 + $0x130] sm:$0xff] }
 0x3fa   : > { %v2019_v16 = vpop.f32.mrf.mxu1  ;;  %2292 = vmatmul.f32.gmra.mxu3 %v5328_v17 }
 0x3fb   : > { %v2020_v20 = vadd.f32 %v2019_v16, %v1906_v6  ;;  %2927 = vst [vmem:[%s4305_s8 + $0xf0] sm:$0xff] %v2799_v63  ;;  %v5346_v63 = vld [vmem:[%s4283_s29 + $0x330] sm:$0xff] }
 0x3fc   : > { %v2132_v26 = vpop.f32.mrf.mxu2  ;;  %1953 = vmatmul.f32.gmra.mxu0 %v5335_v27  ;;  %5877 = vst [vmem:[#allocation30_spill] sm:$0xff] %v5346_v63 }
 0x3fd   : > { %2066 = vmatmul.f32.gmra.mxu1 %v5339_v33  ;;  %v2245_v36 = vpop.f32.mrf.mxu3  ;;  %v2133_v43 = vadd.f32 %v2132_v26, %v2020_v20  ;;  %v5350_v20 = vld [vmem:[%s4283_s29 + $0x338] sm:$0xff]  ;;  %v5355_v26 = vld [vmem:[%s4283_s29 + $0x320] sm:$0xff] }
 0x3fe   : > { %5878 = vst [vmem:[#allocation31_spill] sm:$0xff] %v5350_v20  ;;  %v3659_v33 = vld [vmem:[%s4283_s29] sm:$0xff] }
 0x3ff   : > { %v2246_v59 = vadd.f32 %v2245_v36, %v2133_v43  ;;  %5879 = vst [vmem:[#allocation32_spill] sm:$0xff] %v5355_v26  ;;  %v5359_v36 = vld [vmem:[%s4283_s29 + $0x328] sm:$0xff] }
 0x400   : > { %5880 = vst [vmem:[#allocation33_spill] sm:$0xff] %v5359_v36 }
 0x401   : > { %v2803_v62 = vadd.f32 %v2246_v59, %v483_v56  ;;  %2182 = vmatmul.f32.gmra.mxu2 %v5346_v63  ;;  %v1909_v6 = vpop.f32.mrf.mxu0 }
 0x402   : > { %v2022_v16 = vpop.f32.mrf.mxu1  ;;  %2295 = vmatmul.f32.gmra.mxu3 %v5350_v20 }
 0x403   : > { %v2023_v21 = vadd.f32 %v2022_v16, %v1909_v6  ;;  %2931 = vst [vmem:[%s4305_s8 + $0x110] sm:$0xff] %v2803_v62  ;;  %v5364_v62 = vld [vmem:[%s4283_s29 + $0x350] sm:$0xff] }
 0x404   : > { %v2135_v25 = vpop.f32.mrf.mxu2  ;;  %1956 = vmatmul.f32.gmra.mxu0 %v5355_v26  ;;  %5881 = vst [vmem:[#allocation34_spill] sm:$0xff] %v5364_v62  ;;  %v5368_v26 = vld [vmem:[%s4283_s29 + $0x358] sm:$0xff] }
 0x405   : > { %2069 = vmatmul.f32.gmra.mxu1 %v5359_v36  ;;  %v2248_v43 = vpop.f32.mrf.mxu3  ;;  %v2136_v44 = vadd.f32 %v2135_v25, %v2023_v21  ;;  %5882 = vst [vmem:[#allocation35_spill] sm:$0xff] %v5368_v26  ;;  %v836_v21 = vld [vmem:[%s4291_s6 + $0x418] sm:$0xff] }
 0x406   : > { %v900_v25 = vld [vmem:[%s4291_s6 + $0x618] sm:$0xff]  ;;  %2558 = vmatpush.msrb.mxu2 %v836_v21 }
 0x407   : > { %v2249_v56 = vadd.f32 %v2248_v43, %v2136_v44  ;;  %v5375_v43 = vld [vmem:[%s4283_s29 + $0x340] sm:$0xff]  ;;  %v5379_v44 = vld [vmem:[%s4283_s29 + $0x348] sm:$0xff]  ;;  %2671 = vmatpush.msrb.mxu3 %v900_v25 }
 0x408   : > { %5883 = vst [vmem:[#allocation36_spill] sm:$0xff] %v5375_v43 }
 0x409   : > { %v2807_v59 = vadd.f32 %v2249_v56, %v487_v52  ;;  %2185 = vmatmul.f32.gmra.mxu2 %v5364_v62  ;;  %v1912_v6 = vpop.f32.mrf.mxu0  ;;  %5884 = vst [vmem:[#allocation37_spill] sm:$0xff] %v5379_v44 }
 0x40a   : > { %v2025_v16 = vpop.f32.mrf.mxu1  ;;  %2298 = vmatmul.f32.gmra.mxu3 %v5368_v26 }
 0x40b   : > { %v2026_v36 = vadd.f32 %v2025_v16, %v1912_v6  ;;  %2935 = vst [vmem:[%s4305_s8 + $0x130] sm:$0xff] %v2807_v59  ;;  %v708_v6 = vld [vmem:[%s4291_s6 + $0x18] sm:$0xff] }
 0x40c   : > { %v2138_v20 = vpop.f32.mrf.mxu2  ;;  %1959 = vmatmul.f32.gmra.mxu0 %v5375_v43  ;;  %v772_v59 = vld [vmem:[%s4291_s6 + $0x218] sm:$0xff]  ;;  %v5386_v43 = vld [vmem:[%s4283_s29 + $0x370] sm:$0xff]  ;;  %s5939_s6 = smov %s5938_s16 }
 0x40d   : > { %2072 = vmatmul.f32.gmra.mxu1 %v5379_v44  ;;  %v2251_v52 = vpop.f32.mrf.mxu3  ;;  %v2139_v56 = vadd.f32 %v2138_v20, %v2026_v36  ;;  %v491_v16 = vld [vmem:[%s4305_s8 + $0x150] sm:$0xff]  ;;  %2332 = vmatpush.msrb.mxu0 %v708_v6  ;;  %5885 = vst [vmem:[#allocation38_spill] sm:$0xff] %v5386_v43  ;;  %v5395_v6 = vld [vmem:[%s4283_s29 + $0x360] sm:$0xff]  ;;  %s3817_s18 = scalar_lea.hbm %s5939_s6, 4096 }
 0x40e   : > { %2445 = vmatpush.msrb.mxu1 %v772_v59  ;;  %v5390_v36 = vld [vmem:[%s4283_s29 + $0x378] sm:$0xff]  ;;  %5887 = vst [vmem:[#allocation40_spill] sm:$0xff] %v5395_v6 }
 0x40f   : > { %v2252_v26 = vadd.f32 %v2251_v52, %v2139_v56  ;;  %5886 = vst [vmem:[#allocation39_spill] sm:$0xff] %v5390_v36  ;;  %v495_v59 = vld [vmem:[%s4305_s8 + $0x170] sm:$0xff] }
 0x411   : > { %v2811_v62 = vadd.f32 %v2252_v26, %v491_v16  ;;  %2188 = vmatmul.f32.gmra.mxu2 %v5386_v43  ;;  %v1915_v44 = vpop.f32.mrf.mxu0  ;;  %v5399_v26 = vld [vmem:[%s4283_s29 + $0x368] sm:$0xff] }
 0x412   : > { %v2028_v20 = vpop.f32.mrf.mxu1  ;;  %2301 = vmatmul.f32.gmra.mxu3 %v5390_v36  ;;  %5888 = vst [vmem:[#allocation41_spill] sm:$0xff] %v5399_v26 }
 0x413   : > { %v2029_v21 = vadd.f32 %v2028_v20, %v1915_v44  ;;  %2939 = vst [vmem:[%s4305_s8 + $0x150] sm:$0xff] %v2811_v62  ;;  %v5404_v44 = vld [vmem:[%s4283_s29 + $0x390] sm:$0xff] }
 0x414   : > { %v2141_v25 = vpop.f32.mrf.mxu2  ;;  %1962 = vmatmul.f32.gmra.mxu0 %v5395_v6  ;;  %5889 = vst [vmem:[#allocation42_spill] sm:$0xff] %v5404_v44  ;;  %v5408_v6 = vld [vmem:[%s4283_s29 + $0x398] sm:$0xff] }
 0x415   : > { %2075 = vmatmul.f32.gmra.mxu1 %v5399_v26  ;;  %v2254_v52 = vpop.f32.mrf.mxu3  ;;  %v2142_v56 = vadd.f32 %v2141_v25, %v2029_v21  ;;  %5890 = vst [vmem:[#allocation43_spill] sm:$0xff] %v5408_v6  ;;  %v5413_v21 = vld [vmem:[%s4283_s29 + $0x380] sm:$0xff]  ;;  %v5417_v25 = vld [vmem:[%s4283_s29 + $0x388] sm:$0xff] }
 0x416   : > { %5891 = vst [vmem:[#allocation44_spill] sm:$0xff] %v5413_v21 }
 0x417   : > { %v2255_v16 = vadd.f32 %v2254_v52, %v2142_v56  ;;  %5892 = vst [vmem:[#allocation45_spill] sm:$0xff] %v5417_v25 }
 0x419   : > { %v2815_v36 = vadd.f32 %v2255_v16, %v495_v59  ;;  %2191 = vmatmul.f32.gmra.mxu2 %v5404_v44  ;;  %v1918_v62 = vpop.f32.mrf.mxu0  ;;  %v499_v59 = vld [vmem:[%s4305_s8 + $0x190] sm:$0xff] }
 0x41a   : > { %v2031_v20 = vpop.f32.mrf.mxu1  ;;  %2304 = vmatmul.f32.gmra.mxu3 %v5408_v6 }
 0x41b   : > { %v2032_v43 = vadd.f32 %v2031_v20, %v1918_v62  ;;  %2943 = vst [vmem:[%s4305_s8 + $0x170] sm:$0xff] %v2815_v36  ;;  %v5422_v62 = vld [vmem:[%s4283_s29 + $0x3b0] sm:$0xff] }
 0x41c   : > { %v2144_v26 = vpop.f32.mrf.mxu2  ;;  %1965 = vmatmul.f32.gmra.mxu0 %v5413_v21  ;;  %5893 = vst [vmem:[#allocation46_spill] sm:$0xff] %v5422_v62  ;;  %v5426_v21 = vld [vmem:[%s4283_s29 + $0x3b8] sm:$0xff] }
 0x41d   : > { %2078 = vmatmul.f32.gmra.mxu1 %v5417_v25  ;;  %v2257_v52 = vpop.f32.mrf.mxu3  ;;  %v2145_v56 = vadd.f32 %v2144_v26, %v2032_v43  ;;  %5894 = vst [vmem:[#allocation47_spill] sm:$0xff] %v5426_v21  ;;  %v5431_v43 = vld [vmem:[%s4283_s29 + $0x3a0] sm:$0xff]  ;;  %v5435_v26 = vld [vmem:[%s4283_s29 + $0x3a8] sm:$0xff] }
 0x41e   : > { %5895 = vst [vmem:[#allocation48_spill] sm:$0xff] %v5431_v43 }
 0x41f   : > { %v2258_v16 = vadd.f32 %v2257_v52, %v2145_v56  ;;  %5896 = vst [vmem:[#allocation49_spill] sm:$0xff] %v5435_v26 }
 0x421   : > { %v2819_v6 = vadd.f32 %v2258_v16, %v499_v59  ;;  %2194 = vmatmul.f32.gmra.mxu2 %v5422_v62  ;;  %v1921_v36 = vpop.f32.mrf.mxu0  ;;  %v503_v59 = vld [vmem:[%s4305_s8 + $0x1b0] sm:$0xff] }
 0x422   : > { %v2034_v20 = vpop.f32.mrf.mxu1  ;;  %2307 = vmatmul.f32.gmra.mxu3 %v5426_v21 }
 0x423   : > { %v2035_v44 = vadd.f32 %v2034_v20, %v1921_v36  ;;  %2947 = vst [vmem:[%s4305_s8 + $0x190] sm:$0xff] %v2819_v6  ;;  %v5440_v36 = vld [vmem:[%s4283_s29 + $0x3d0] sm:$0xff] }
 0x424   : > { %v2147_v25 = vpop.f32.mrf.mxu2  ;;  %1968 = vmatmul.f32.gmra.mxu0 %v5431_v43  ;;  %5897 = vst [vmem:[#allocation50_spill] sm:$0xff] %v5440_v36  ;;  %v5444_v43 = vld [vmem:[%s4283_s29 + $0x3d8] sm:$0xff] }
 0x425   : > { %2081 = vmatmul.f32.gmra.mxu1 %v5435_v26  ;;  %v2260_v52 = vpop.f32.mrf.mxu3  ;;  %v2148_v56 = vadd.f32 %v2147_v25, %v2035_v44  ;;  %5898 = vst [vmem:[#allocation51_spill] sm:$0xff] %v5444_v43  ;;  %v5449_v44 = vld [vmem:[%s4283_s29 + $0x3c0] sm:$0xff]  ;;  %v5453_v25 = vld [vmem:[%s4283_s29 + $0x3c8] sm:$0xff] }
 0x426   : > { %5899 = vst [vmem:[#allocation52_spill] sm:$0xff] %v5449_v44 }
 0x427   : > { %v2261_v16 = vadd.f32 %v2260_v52, %v2148_v56  ;;  %5900 = vst [vmem:[#allocation53_spill] sm:$0xff] %v5453_v25 }
 0x429   : > { %v2823_v21 = vadd.f32 %v2261_v16, %v503_v59  ;;  %2197 = vmatmul.f32.gmra.mxu2 %v5440_v36  ;;  %v1924_v6 = vpop.f32.mrf.mxu0  ;;  %v507_v59 = vld [vmem:[%s4305_s8 + $0x1d0] sm:$0xff] }
 0x42a   : > { %v2037_v20 = vpop.f32.mrf.mxu1  ;;  %2310 = vmatmul.f32.gmra.mxu3 %v5444_v43 }
 0x42b   : > { %v2038_v62 = vadd.f32 %v2037_v20, %v1924_v6  ;;  %2951 = vst [vmem:[%s4305_s8 + $0x1b0] sm:$0xff] %v2823_v21  ;;  %v5458_v6 = vld [vmem:[%s4283_s29 + $0x3f0] sm:$0xff] }
 0x42c   : > { %v2150_v26 = vpop.f32.mrf.mxu2  ;;  %1971 = vmatmul.f32.gmra.mxu0 %v5449_v44  ;;  %5901 = vst [vmem:[#allocation54_spill] sm:$0xff] %v5458_v6  ;;  %v5462_v44 = vld [vmem:[%s4283_s29 + $0x3f8] sm:$0xff] }
 0x42d   : > { %2084 = vmatmul.f32.gmra.mxu1 %v5453_v25  ;;  %v2263_v52 = vpop.f32.mrf.mxu3  ;;  %v2151_v56 = vadd.f32 %v2150_v26, %v2038_v62  ;;  %5902 = vst [vmem:[#allocation55_spill] sm:$0xff] %v5462_v44  ;;  %v5467_v62 = vld [vmem:[%s4283_s29 + $0x3e0] sm:$0xff]  ;;  %v5471_v26 = vld [vmem:[%s4283_s29 + $0x3e8] sm:$0xff] }
 0x42e   : > { %5903 = vst [vmem:[#allocation56_spill] sm:$0xff] %v5467_v62 }
 0x42f   : > { %v2264_v16 = vadd.f32 %v2263_v52, %v2151_v56  ;;  %5904 = vst [vmem:[#allocation57_spill] sm:$0xff] %v5471_v26 }
 0x431   : > { %v2827_v43 = vadd.f32 %v2264_v16, %v507_v59  ;;  %2200 = vmatmul.f32.gmra.mxu2 %v5458_v6  ;;  %v1927_v21 = vpop.f32.mrf.mxu0  ;;  %v511_v59 = vld [vmem:[%s4305_s8 + $0x1f0] sm:$0xff] }
 0x432   : > { %v2040_v20 = vpop.f32.mrf.mxu1  ;;  %2313 = vmatmul.f32.gmra.mxu3 %v5462_v44  ;;  %v3658_v6 = vld [vmem:[%s4283_s29 + $0x18] sm:$0xff] }
 0x433   : > { %v2041_v36 = vadd.f32 %v2040_v20, %v1927_v21  ;;  %2955 = vst [vmem:[%s4305_s8 + $0x1d0] sm:$0xff] %v2827_v43  ;;  %v3657_v21 = vld [vmem:[%s4283_s29 + $0x10] sm:$0xff] }
 0x434   : > { %v2153_v25 = vpop.f32.mrf.mxu2  ;;  %1974 = vmatmul.f32.gmra.mxu0 %v5467_v62 }
 0x435   : > { %2087 = vmatmul.f32.gmra.mxu1 %v5471_v26  ;;  %v2266_v52 = vpop.f32.mrf.mxu3  ;;  %v2154_v56 = vadd.f32 %v2153_v25, %v2041_v36  ;;  %v3660_v26 = vld [vmem:[%s4283_s29 + $0x8] sm:$0xff] }
 0x437   : > { %v2267_v16 = vadd.f32 %v2266_v52, %v2154_v56  ;;  %v515_v52 = vld [vmem:[%s4305_s8 + $0x210] sm:$0xff] }
 0x439   : > { %v2831_v44 = vadd.f32 %v2267_v16, %v511_v59  ;;  %2559 = vmatmul.f32.vlgmr.msrb.gmra.mxu2 %v3657_v21  ;;  %v1930_v43 = vpop.f32.mrf.mxu0  ;;  %v3661_v16 = vld [vmem:[%s4283_s29 + $0x30] sm:$0xff] }
 0x43a   : > { %v2043_v20 = vpop.f32.mrf.mxu1  ;;  %2672 = vmatmul.f32.vlgmr.msrb.gmra.mxu3 %v3658_v6 }
 0x43b   : > { %v2044_v62 = vadd.f32 %v2043_v20, %v1930_v43  ;;  %2959 = vst [vmem:[%s4305_s8 + $0x1f0] sm:$0xff] %v2831_v44  ;;  %v3662_v44 = vld [vmem:[%s4283_s29 + $0x38] sm:$0xff]  ;;  %v3663_v20 = vld [vmem:[%s4283_s29 + $0x20] sm:$0xff] }
 0x43c   : > { %v2156_v63 = vpop.f32.mrf.mxu2  ;;  %2333 = vmatmul.f32.vlgmr.msrb.gmra.mxu0 %v3659_v33 }
 0x43d   : > { %2446 = vmatmul.f32.vlgmr.msrb.gmra.mxu1 %v3660_v26  ;;  %v2269_v36 = vpop.f32.mrf.mxu3  ;;  %v2157_v25 = vadd.f32 %v2156_v63, %v2044_v62  ;;  %v3664_v26 = vld [vmem:[%s4283_s29 + $0x28] sm:$0xff] }
 0x43f   : > { %v2270_v56 = vadd.f32 %v2269_v36, %v2157_v25  ;;  %v519_v36 = vld [vmem:[%s4305_s8 + $0x230] sm:$0xff] }
 0x441   : > { %v2835_v59 = vadd.f32 %v2270_v56, %v515_v52  ;;  %2562 = vmatmul.f32.gmra.mxu2 %v3661_v16  ;;  %v1933_v6 = vpop.f32.mrf.mxu0  ;;  %v3665_v56 = vld [vmem:[%s4283_s29 + $0x50] sm:$0xff] }
 0x442   : > { %v2046_v21 = vpop.f32.mrf.mxu1  ;;  %2675 = vmatmul.f32.gmra.mxu3 %v3662_v44 }
 0x443   : > { %v2047_v43 = vadd.f32 %v2046_v21, %v1933_v6  ;;  %2963 = vst [vmem:[%s4305_s8 + $0x210] sm:$0xff] %v2835_v59  ;;  %v3666_v59 = vld [vmem:[%s4283_s29 + $0x58] sm:$0xff] }
 0x444   : > { %v2159_v33 = vpop.f32.mrf.mxu2  ;;  %2336 = vmatmul.f32.gmra.mxu0 %v3663_v20  ;;  %v3667_v20 = vld [vmem:[%s4283_s29 + $0x40] sm:$0xff] }
 0x445   : > { %2449 = vmatmul.f32.gmra.mxu1 %v3664_v26  ;;  %v2272_v63 = vpop.f32.mrf.mxu3  ;;  %v2160_v62 = vadd.f32 %v2159_v33, %v2047_v43  ;;  %v3668_v26 = vld [vmem:[%s4283_s29 + $0x48] sm:$0xff] }
 0x447   : > { %v2273_v25 = vadd.f32 %v2272_v63, %v2160_v62  ;;  %v523_v63 = vld [vmem:[%s4305_s8 + $0x250] sm:$0xff] }
 0x449   : > { %v2839_v52 = vadd.f32 %v2273_v25, %v519_v36  ;;  %2565 = vmatmul.f32.gmra.mxu2 %v3665_v56  ;;  %v1936_v16 = vpop.f32.mrf.mxu0  ;;  %v3669_v25 = vld [vmem:[%s4283_s29 + $0x70] sm:$0xff] }
 0x44a   : > { %v2049_v6 = vpop.f32.mrf.mxu1  ;;  %2678 = vmatmul.f32.gmra.mxu3 %v3666_v59 }
 0x44b   : > { %v2050_v21 = vadd.f32 %v2049_v6, %v1936_v16  ;;  %2967 = vst [vmem:[%s4305_s8 + $0x230] sm:$0xff] %v2839_v52  ;;  %v3670_v52 = vld [vmem:[%s4283_s29 + $0x78] sm:$0xff] }
 0x44c   : > { %v2162_v44 = vpop.f32.mrf.mxu2  ;;  %2339 = vmatmul.f32.gmra.mxu0 %v3667_v20  ;;  %v3671_v20 = vld [vmem:[%s4283_s29 + $0x60] sm:$0xff] }
 0x44d   : > { %2452 = vmatmul.f32.gmra.mxu1 %v3668_v26  ;;  %v2275_v43 = vpop.f32.mrf.mxu3  ;;  %v2163_v33 = vadd.f32 %v2162_v44, %v2050_v21  ;;  %v3672_v26 = vld [vmem:[%s4283_s29 + $0x68] sm:$0xff] }
 0x44f   : > { %v2276_v62 = vadd.f32 %v2275_v43, %v2163_v33  ;;  %v527_v43 = vld [vmem:[%s4305_s8 + $0x270] sm:$0xff] }
 0x451   : > { %v2843_v36 = vadd.f32 %v2276_v62, %v523_v63  ;;  %2568 = vmatmul.f32.gmra.mxu2 %v3669_v25  ;;  %v1939_v56 = vpop.f32.mrf.mxu0  ;;  %v3673_v62 = vld [vmem:[%s4283_s29 + $0x90] sm:$0xff] }
 0x452   : > { %v2052_v16 = vpop.f32.mrf.mxu1  ;;  %2681 = vmatmul.f32.gmra.mxu3 %v3670_v52 }
 0x453   : > { %v2053_v6 = vadd.f32 %v2052_v16, %v1939_v56  ;;  %2971 = vst [vmem:[%s4305_s8 + $0x250] sm:$0xff] %v2843_v36  ;;  %v3674_v36 = vld [vmem:[%s4283_s29 + $0x98] sm:$0xff] }
 0x454   : > { %v2165_v59 = vpop.f32.mrf.mxu2  ;;  %2342 = vmatmul.f32.gmra.mxu0 %v3671_v20  ;;  %v3675_v20 = vld [vmem:[%s4283_s29 + $0x80] sm:$0xff] }
 0x455   : > { %2455 = vmatmul.f32.gmra.mxu1 %v3672_v26  ;;  %v2278_v21 = vpop.f32.mrf.mxu3  ;;  %v2166_v44 = vadd.f32 %v2165_v59, %v2053_v6  ;;  %v3676_v26 = vld [vmem:[%s4283_s29 + $0x88] sm:$0xff] }
 0x457   : > { %v2279_v33 = vadd.f32 %v2278_v21, %v2166_v44  ;;  %v531_v21 = vld [vmem:[%s4305_s8 + $0x290] sm:$0xff] }
 0x459   : > { %v2847_v63 = vadd.f32 %v2279_v33, %v527_v43  ;;  %2571 = vmatmul.f32.gmra.mxu2 %v3673_v62  ;;  %v1942_v25 = vpop.f32.mrf.mxu0  ;;  %v3677_v33 = vld [vmem:[%s4283_s29 + $0xb0] sm:$0xff] }
 0x45a   : > { %v2055_v56 = vpop.f32.mrf.mxu1  ;;  %2684 = vmatmul.f32.gmra.mxu3 %v3674_v36 }
 0x45b   : > { %v2056_v16 = vadd.f32 %v2055_v56, %v1942_v25  ;;  %2975 = vst [vmem:[%s4305_s8 + $0x270] sm:$0xff] %v2847_v63  ;;  %v3678_v63 = vld [vmem:[%s4283_s29 + $0xb8] sm:$0xff] }
 0x45c   : > { %v2168_v52 = vpop.f32.mrf.mxu2  ;;  %2345 = vmatmul.f32.gmra.mxu0 %v3675_v20  ;;  %v3679_v20 = vld [vmem:[%s4283_s29 + $0xa0] sm:$0xff] }
 0x45d   : > { %2458 = vmatmul.f32.gmra.mxu1 %v3676_v26  ;;  %v2281_v6 = vpop.f32.mrf.mxu3  ;;  %v2169_v59 = vadd.f32 %v2168_v52, %v2056_v16  ;;  %v3680_v26 = vld [vmem:[%s4283_s29 + $0xa8] sm:$0xff] }
 0x45f   : > { %v2282_v44 = vadd.f32 %v2281_v6, %v2169_v59  ;;  %v535_v6 = vld [vmem:[%s4305_s8 + $0x2b0] sm:$0xff] }
 0x461   : > { %v2851_v43 = vadd.f32 %v2282_v44, %v531_v21  ;;  %2574 = vmatmul.f32.gmra.mxu2 %v3677_v33  ;;  %v1945_v62 = vpop.f32.mrf.mxu0  ;;  %v3681_v44 = vld [vmem:[%s4283_s29 + $0xd0] sm:$0xff] }
 0x462   : > { %v2058_v25 = vpop.f32.mrf.mxu1  ;;  %2687 = vmatmul.f32.gmra.mxu3 %v3678_v63 }
 0x463   : > { %v2059_v56 = vadd.f32 %v2058_v25, %v1945_v62  ;;  %2979 = vst [vmem:[%s4305_s8 + $0x290] sm:$0xff] %v2851_v43  ;;  %v3682_v43 = vld [vmem:[%s4283_s29 + $0xd8] sm:$0xff] }
 0x464   : > { %v2171_v36 = vpop.f32.mrf.mxu2  ;;  %2348 = vmatmul.f32.gmra.mxu0 %v3679_v20  ;;  %v3683_v20 = vld [vmem:[%s4283_s29 + $0xc0] sm:$0xff] }
 0x465   : > { %2461 = vmatmul.f32.gmra.mxu1 %v3680_v26  ;;  %v2284_v16 = vpop.f32.mrf.mxu3  ;;  %v2172_v52 = vadd.f32 %v2171_v36, %v2059_v56  ;;  %v3684_v26 = vld [vmem:[%s4283_s29 + $0xc8] sm:$0xff] }
 0x467   : > { %v2285_v59 = vadd.f32 %v2284_v16, %v2172_v52  ;;  %v539_v16 = vld [vmem:[%s4305_s8 + $0x2d0] sm:$0xff] }
 0x469   : > { %v2855_v21 = vadd.f32 %v2285_v59, %v535_v6  ;;  %2577 = vmatmul.f32.gmra.mxu2 %v3681_v44  ;;  %v1948_v33 = vpop.f32.mrf.mxu0  ;;  %v3685_v59 = vld [vmem:[%s4283_s29 + $0xf0] sm:$0xff] }
 0x46a   : > { %v2061_v62 = vpop.f32.mrf.mxu1  ;;  %2690 = vmatmul.f32.gmra.mxu3 %v3682_v43 }
 0x46b   : > { %v2062_v25 = vadd.f32 %v2061_v62, %v1948_v33  ;;  %2983 = vst [vmem:[%s4305_s8 + $0x2b0] sm:$0xff] %v2855_v21  ;;  %v3686_v21 = vld [vmem:[%s4283_s29 + $0xf8] sm:$0xff] }
 0x46c   : > { %v2174_v63 = vpop.f32.mrf.mxu2  ;;  %2351 = vmatmul.f32.gmra.mxu0 %v3683_v20  ;;  %v3687_v20 = vld [vmem:[%s4283_s29 + $0xe0] sm:$0xff] }
 0x46d   : > { %2464 = vmatmul.f32.gmra.mxu1 %v3684_v26  ;;  %v2287_v56 = vpop.f32.mrf.mxu3  ;;  %v2175_v36 = vadd.f32 %v2174_v63, %v2062_v25  ;;  %v3688_v26 = vld [vmem:[%s4283_s29 + $0xe8] sm:$0xff] }
 0x46f   : > { %v2288_v52 = vadd.f32 %v2287_v56, %v2175_v36  ;;  %v543_v56 = vld [vmem:[%s4305_s8 + $0x2f0] sm:$0xff] }
 0x471   : > { %v2859_v6 = vadd.f32 %v2288_v52, %v539_v16  ;;  %2580 = vmatmul.f32.gmra.mxu2 %v3685_v59  ;;  %v1951_v44 = vpop.f32.mrf.mxu0  ;;  %v3689_v52 = vld [vmem:[%s4283_s29 + $0x110] sm:$0xff] }
 0x472   : > { %v2064_v33 = vpop.f32.mrf.mxu1  ;;  %2693 = vmatmul.f32.gmra.mxu3 %v3686_v21 }
 0x473   : > { %v2065_v62 = vadd.f32 %v2064_v33, %v1951_v44  ;;  %2987 = vst [vmem:[%s4305_s8 + $0x2d0] sm:$0xff] %v2859_v6  ;;  %v3690_v6 = vld [vmem:[%s4283_s29 + $0x118] sm:$0xff] }
 0x474   : > { %v2177_v43 = vpop.f32.mrf.mxu2  ;;  %2354 = vmatmul.f32.gmra.mxu0 %v3687_v20  ;;  %v3691_v20 = vld [vmem:[%s4283_s29 + $0x100] sm:$0xff] }
 0x475   : > { %2467 = vmatmul.f32.gmra.mxu1 %v3688_v26  ;;  %v2290_v25 = vpop.f32.mrf.mxu3  ;;  %v2178_v63 = vadd.f32 %v2177_v43, %v2065_v62  ;;  %v3692_v26 = vld [vmem:[%s4283_s29 + $0x108] sm:$0xff] }
 0x477   : > { %v2291_v36 = vadd.f32 %v2290_v25, %v2178_v63  ;;  %v547_v25 = vld [vmem:[%s4305_s8 + $0x310] sm:$0xff] }
 0x479   : > { %v2863_v16 = vadd.f32 %v2291_v36, %v543_v56  ;;  %2583 = vmatmul.f32.gmra.mxu2 %v3689_v52  ;;  %v1954_v59 = vpop.f32.mrf.mxu0  ;;  %v3693_v36 = vld [vmem:[%s4283_s29 + $0x130] sm:$0xff] }
 0x47a   : > { %v2067_v44 = vpop.f32.mrf.mxu1  ;;  %2696 = vmatmul.f32.gmra.mxu3 %v3690_v6 }
 0x47b   : > { %v2068_v33 = vadd.f32 %v2067_v44, %v1954_v59  ;;  %2991 = vst [vmem:[%s4305_s8 + $0x2f0] sm:$0xff] %v2863_v16  ;;  %v3694_v16 = vld [vmem:[%s4283_s29 + $0x138] sm:$0xff] }
 0x47c   : > { %v2180_v21 = vpop.f32.mrf.mxu2  ;;  %2357 = vmatmul.f32.gmra.mxu0 %v3691_v20  ;;  %v3695_v20 = vld [vmem:[%s4283_s29 + $0x120] sm:$0xff] }
 0x47d   : > { %2470 = vmatmul.f32.gmra.mxu1 %v3692_v26  ;;  %v2293_v62 = vpop.f32.mrf.mxu3  ;;  %v2181_v43 = vadd.f32 %v2180_v21, %v2068_v33  ;;  %v3696_v26 = vld [vmem:[%s4283_s29 + $0x128] sm:$0xff] }
 0x47f   : > { %v2294_v63 = vadd.f32 %v2293_v62, %v2181_v43  ;;  %v551_v62 = vld [vmem:[%s4305_s8 + $0x330] sm:$0xff] }
 0x481   : > { %v2867_v56 = vadd.f32 %v2294_v63, %v547_v25  ;;  %2586 = vmatmul.f32.gmra.mxu2 %v3693_v36  ;;  %v1957_v52 = vpop.f32.mrf.mxu0  ;;  %v3697_v63 = vld [vmem:[%s4283_s29 + $0x150] sm:$0xff] }
 0x482   : > { %v2070_v59 = vpop.f32.mrf.mxu1  ;;  %2699 = vmatmul.f32.gmra.mxu3 %v3694_v16 }
 0x483   : > { %v2071_v44 = vadd.f32 %v2070_v59, %v1957_v52  ;;  %2995 = vst [vmem:[%s4305_s8 + $0x310] sm:$0xff] %v2867_v56  ;;  %v3698_v56 = vld [vmem:[%s4283_s29 + $0x158] sm:$0xff] }
 0x484   : > { %v2183_v6 = vpop.f32.mrf.mxu2  ;;  %2360 = vmatmul.f32.gmra.mxu0 %v3695_v20  ;;  %v3699_v20 = vld [vmem:[%s4283_s29 + $0x140] sm:$0xff] }
 0x485   : > { %2473 = vmatmul.f32.gmra.mxu1 %v3696_v26  ;;  %v2296_v33 = vpop.f32.mrf.mxu3  ;;  %v2184_v21 = vadd.f32 %v2183_v6, %v2071_v44  ;;  %v3700_v26 = vld [vmem:[%s4283_s29 + $0x148] sm:$0xff] }
 0x487   : > { %v2297_v43 = vadd.f32 %v2296_v33, %v2184_v21  ;;  %v555_v33 = vld [vmem:[%s4305_s8 + $0x350] sm:$0xff] }
 0x489   : > { %v2871_v25 = vadd.f32 %v2297_v43, %v551_v62  ;;  %2589 = vmatmul.f32.gmra.mxu2 %v3697_v63  ;;  %v1960_v36 = vpop.f32.mrf.mxu0  ;;  %v3701_v43 = vld [vmem:[%s4283_s29 + $0x170] sm:$0xff] }
 0x48a   : > { %v2073_v52 = vpop.f32.mrf.mxu1  ;;  %2702 = vmatmul.f32.gmra.mxu3 %v3698_v56 }
 0x48b   : > { %v2074_v59 = vadd.f32 %v2073_v52, %v1960_v36  ;;  %2999 = vst [vmem:[%s4305_s8 + $0x330] sm:$0xff] %v2871_v25  ;;  %v3702_v25 = vld [vmem:[%s4283_s29 + $0x178] sm:$0xff] }
 0x48c   : > { %v2186_v16 = vpop.f32.mrf.mxu2  ;;  %2363 = vmatmul.f32.gmra.mxu0 %v3699_v20  ;;  %v3703_v20 = vld [vmem:[%s4283_s29 + $0x160] sm:$0xff] }
 0x48d   : > { %2476 = vmatmul.f32.gmra.mxu1 %v3700_v26  ;;  %v2299_v44 = vpop.f32.mrf.mxu3  ;;  %v2187_v6 = vadd.f32 %v2186_v16, %v2074_v59  ;;  %v3704_v26 = vld [vmem:[%s4283_s29 + $0x168] sm:$0xff] }
 0x48f   : > { %v2300_v21 = vadd.f32 %v2299_v44, %v2187_v6  ;;  %v559_v44 = vld [vmem:[%s4305_s8 + $0x370] sm:$0xff] }
 0x491   : > { %v2875_v62 = vadd.f32 %v2300_v21, %v555_v33  ;;  %2592 = vmatmul.f32.gmra.mxu2 %v3701_v43  ;;  %v1963_v63 = vpop.f32.mrf.mxu0  ;;  %v3705_v21 = vld [vmem:[%s4283_s29 + $0x190] sm:$0xff] }
 0x492   : > { %v2076_v36 = vpop.f32.mrf.mxu1  ;;  %2705 = vmatmul.f32.gmra.mxu3 %v3702_v25  ;;  %v3706_v25 = vld [vmem:[%s4283_s29 + $0x198] sm:$0xff]  ;;  %s3212_s29 = sshll.u32 %s3038_s2, 3 }
 0x493   : > { %v2077_v52 = vadd.f32 %v2076_v36, %v1963_v63  ;;  %3003 = vst [vmem:[%s4305_s8 + $0x350] sm:$0xff] %v2875_v62  ;;  %s3040_s21 = scalar_lea.hbm %s5938_s16, %s3212_s29 }
 0x494   : > { %v2189_v56 = vpop.f32.mrf.mxu2  ;;  %2366 = vmatmul.f32.gmra.mxu0 %v3703_v20  ;;  %s3043_s11 = sshll.u32 %s3040_s21, 4  ;;  %s3044_s11 = int_to_ptr.hbm [resolvable:$true] %s3043_s11 }
 0x495   : > { %2479 = vmatmul.f32.gmra.mxu1 %v3704_v26  ;;  %v2302_v59 = vpop.f32.mrf.mxu3  ;;  %v2190_v16 = vadd.f32 %v2189_v56, %v2077_v52  ;;  %v563_v56 = vld [vmem:[%s4305_s8 + $0x390] sm:$0xff]  ;;  %s3811_s20 = sshra.s32 %s3044_s11, 4  ;;  %s3812_s20 = int_to_ptr.hbm [resolvable:$true] %s3811_s20 }
 0x496   : > { %s3813_s26 = scalar_lea.hbm %s3812_s20, 1024  ;;  %p3818_p2 = scmp.lt.s32.totalorder %s3812_s20, %s5939_s6 }
 0x497   : > { %v2303_v6 = vadd.f32 %v2302_v59, %v2190_v16  ;;  %p3814_p11 = scmp.ne.s32.totalorder %s3812_s20, %s3813_s26  ;;  %p3819_p3 = scmp.lt.s32.totalorder %s3817_s18, %s3813_s26 }
 0x499   : > { %v2879_v33 = vadd.f32 %v2303_v6, %v559_v44  ;;  %2595 = vmatmul.f32.gmra.mxu2 %v3705_v21  ;;  %v1966_v43 = vpop.f32.mrf.mxu0  ;;  %v567_v6 = vld [vmem:[%s4305_s8 + $0x3b0] sm:$0xff]  ;;  %p3815_p10 = pnand %p3814_p11, %p4259_p5  ;;  %p3820_p4 = por %p3819_p3, %p3818_p2 }
 0x49a   : > { %v2079_v27 = vpop.f32.mrf.mxu1  ;;  %2708 = vmatmul.f32.gmra.mxu3 %v3706_v25 }
 0x49b   : > { %v2080_v62 = vadd.f32 %v2079_v27, %v1966_v43  ;;  %3007 = vst [vmem:[%s4305_s8 + $0x370] sm:$0xff] %v2879_v33  ;;  %p3816_p12 = pneg %p3815_p10 }
 0x49c   : > { %v2192_v63 = vpop.f32.mrf.mxu2  ;;  %2369 = vmatmul.f32.gmra.mxu0 %v5095_v57 }
 0x49d   : > { %2482 = vmatmul.f32.gmra.mxu1 %v5099_v58  ;;  %v2305_v36 = vpop.f32.mrf.mxu3  ;;  %v2193_v52 = vadd.f32 %v2192_v63, %v2080_v62  ;;  %v571_v62 = vld [vmem:[%s4305_s8 + $0x3d0] sm:$0xff]  ;;  %p3821_p7 = pnand %p3820_p4, %p3816_p12 }
 0x49f   : > { %v2306_v20 = vadd.f32 %v2305_v36, %v2193_v52 }
 0x4a1   : > { %v2883_v26 = vadd.f32 %v2306_v20, %v563_v56  ;;  %2598 = vmatmul.f32.gmra.mxu2 %v5106_v2  ;;  %v1969_v59 = vpop.f32.mrf.mxu0  ;;  %v575_v20 = vld [vmem:[%s4305_s8 + $0x3f0] sm:$0xff] }
 0x4a2   : > { %v2082_v16 = vpop.f32.mrf.mxu1  ;;  %2711 = vmatmul.f32.gmra.mxu3 %v5110_v5 }
 0x4a3   : > { %v2083_v27 = vadd.f32 %v2082_v16, %v1969_v59  ;;  %3011 = vst [vmem:[%s4305_s8 + $0x390] sm:$0xff] %v2883_v26 }
 0x4a4   : > { %v2195_v44 = vpop.f32.mrf.mxu2  ;;  %2372 = vmatmul.f32.gmra.mxu0 %v5115_v8 }
 0x4a5   : > { %2485 = vmatmul.f32.gmra.mxu1 %v5119_v9  ;;  %v2308_v57 = vpop.f32.mrf.mxu3  ;;  %v2196_v58 = vadd.f32 %v2195_v44, %v2083_v27  ;;  %v452_v44 = vld [vmem:[%s4305_s8 + $0x18] sm:$0xff] }
 0x4a7   : > { %v2309_v33 = vadd.f32 %v2308_v57, %v2196_v58 }
 0x4a9   : > { %v2887_v21 = vadd.f32 %v2309_v33, %v567_v6  ;;  %2601 = vmatmul.f32.gmra.mxu2 %v5124_v15  ;;  %v1972_v2 = vpop.f32.mrf.mxu0 }
 0x4aa   : > { %v2085_v43 = vpop.f32.mrf.mxu1  ;;  %2714 = vmatmul.f32.gmra.mxu3 %v5128_v18 }
 0x4ab   : > { %v2086_v5 = vadd.f32 %v2085_v43, %v1972_v2  ;;  %3015 = vst [vmem:[%s4305_s8 + $0x3b0] sm:$0xff] %v2887_v21  ;;  %v456_v21 = vld [vmem:[%s4305_s8 + $0x38] sm:$0xff] }
 0x4ac   : > { %v2198_v25 = vpop.f32.mrf.mxu2  ;;  %2375 = vmatmul.f32.gmra.mxu0 %v5135_v23 }
 0x4ad   : > { %2488 = vmatmul.f32.gmra.mxu1 %v5139_v24  ;;  %v2311_v8 = vpop.f32.mrf.mxu3  ;;  %v2199_v9 = vadd.f32 %v2198_v25, %v2086_v5 }
 0x4af   : > { %v2312_v63 = vadd.f32 %v2311_v8, %v2199_v9  ;;  %v460_v8 = vld [vmem:[%s4305_s8 + $0x58] sm:$0xff] }
 0x4b1   : > { %v2891_v36 = vadd.f32 %v2312_v63, %v571_v62  ;;  %2604 = vmatmul.f32.gmra.mxu2 %v5146_v32  ;;  %v1975_v15 = vpop.f32.mrf.mxu0 }
 0x4b2   : > { %v2088_v52 = vpop.f32.mrf.mxu1  ;;  %2717 = vmatmul.f32.gmra.mxu3 %v5150_v35 }
 0x4b3   : > { %v2089_v18 = vadd.f32 %v2088_v52, %v1975_v15  ;;  %3019 = vst [vmem:[%s4305_s8 + $0x3d0] sm:$0xff] %v2891_v36  ;;  %v464_v15 = vld [vmem:[%s4305_s8 + $0x78] sm:$0xff] }
 0x4b4   : > { %v2201_v56 = vpop.f32.mrf.mxu2  ;;  %2378 = vmatmul.f32.gmra.mxu0 %v5155_v38 }
 0x4b5   : > { %2491 = vmatmul.f32.gmra.mxu1 %v5159_v39  ;;  %v2314_v23 = vpop.f32.mrf.mxu3  ;;  %v2202_v24 = vadd.f32 %v2201_v56, %v2089_v18 }
 0x4b7   : > { %v2315_v26 = vadd.f32 %v2314_v23, %v2202_v24  ;;  %v468_v24 = vld [vmem:[%s4305_s8 + $0x98] sm:$0xff] }
 0x4b9   : > { %v2895_v59 = vadd.f32 %v2315_v26, %v575_v20  ;;  %2607 = vmatmul.f32.gmra.mxu2 %v5164_v45  ;;  %v2334_v32 = vpop.f32.mrf.mxu0 }
 0x4ba   : > { %v2447_v16 = vpop.f32.mrf.mxu1  ;;  %2720 = vmatmul.f32.gmra.mxu3 %v5168_v48 }
 0x4bb   : > { %v2448_v35 = vadd.f32 %v2447_v16, %v2334_v32  ;;  %3023 = vst [vmem:[%s4305_s8 + $0x3f0] sm:$0xff] %v2895_v59  ;;  %v472_v16 = vld [vmem:[%s4305_s8 + $0xb8] sm:$0xff] }
 0x4bc   : > { %v2560_v27 = vpop.f32.mrf.mxu2  ;;  %2381 = vmatmul.f32.gmra.mxu0 %v5175_v53 }
 0x4bd   : > { %2494 = vmatmul.f32.gmra.mxu1 %v5179_v54  ;;  %v2673_v38 = vpop.f32.mrf.mxu3  ;;  %v2561_v39 = vadd.f32 %v2560_v27, %v2448_v35 }
 0x4bf   : > { %v2674_v57 = vadd.f32 %v2673_v38, %v2561_v39 }
 0x4c1   : > { %v2772_v58 = vadd.f32 %v2674_v57, %v452_v44  ;;  %2610 = vmatmul.f32.gmra.mxu2 %v5186_v0  ;;  %v2337_v45 = vpop.f32.mrf.mxu0  ;;  %v476_v44 = vld [vmem:[%s4305_s8 + $0xd8] sm:$0xff] }
 0x4c2   : > { %v2450_v6 = vpop.f32.mrf.mxu1  ;;  %2723 = vmatmul.f32.gmra.mxu3 %v5190_v4 }
 0x4c3   : > { %v2451_v48 = vadd.f32 %v2450_v6, %v2337_v45  ;;  %2900 = vst [vmem:[%s4305_s8 + $0x18] sm:$0xff] %v2772_v58 }
 0x4c4   : > { %v2563_v33 = vpop.f32.mrf.mxu2  ;;  %2384 = vmatmul.f32.gmra.mxu0 %v5195_v10 }
 0x4c5   : > { %2497 = vmatmul.f32.gmra.mxu1 %v5199_v11  ;;  %v2676_v53 = vpop.f32.mrf.mxu3  ;;  %v2564_v54 = vadd.f32 %v2563_v33, %v2451_v48  ;;  %v480_v48 = vld [vmem:[%s4305_s8 + $0xf8] sm:$0xff] }
 0x4c7   : > { %v2677_v2 = vadd.f32 %v2676_v53, %v2564_v54 }
 0x4c9   : > { %v2776_v43 = vadd.f32 %v2677_v2, %v456_v21  ;;  %2613 = vmatmul.f32.gmra.mxu2 %v5204_v19  ;;  %v2340_v0 = vpop.f32.mrf.mxu0  ;;  %v5905_v2 = vld [vmem:[#allocation28_spill] sm:$0xff] }
 0x4ca   : > { %v2453_v5 = vpop.f32.mrf.mxu1  ;;  %2726 = vmatmul.f32.gmra.mxu3 %v5208_v22 }
 0x4cb   : > { %v2454_v4 = vadd.f32 %v2453_v5, %v2340_v0  ;;  %2904 = vst [vmem:[%s4305_s8 + $0x38] sm:$0xff] %v2776_v43  ;;  %v484_v0 = vld [vmem:[%s4305_s8 + $0x118] sm:$0xff] }
 0x4cc   : > { %v2566_v25 = vpop.f32.mrf.mxu2  ;;  %2387 = vmatmul.f32.gmra.mxu0 %v5215_v29 }
 0x4cd   : > { %2500 = vmatmul.f32.gmra.mxu1 %v5219_v30  ;;  %v2679_v10 = vpop.f32.mrf.mxu3  ;;  %v2567_v11 = vadd.f32 %v2566_v25, %v2454_v4  ;;  %v5907_v25 = vld [vmem:[#allocation30_spill] sm:$0xff] }
 0x4cf   : > { %v2680_v9 = vadd.f32 %v2679_v10, %v2567_v11  ;;  %v5908_v11 = vld [vmem:[#allocation31_spill] sm:$0xff] }
 0x4d1   : > { %v2780_v62 = vadd.f32 %v2680_v9, %v460_v8  ;;  %2616 = vmatmul.f32.gmra.mxu2 %v5226_v42  ;;  %v2343_v19 = vpop.f32.mrf.mxu0  ;;  %v5909_v9 = vld [vmem:[#allocation32_spill] sm:$0xff] }
 0x4d2   : > { %v2456_v63 = vpop.f32.mrf.mxu1  ;;  %2729 = vmatmul.f32.gmra.mxu3 %v5230_v46 }
 0x4d3   : > { %v2457_v22 = vadd.f32 %v2456_v63, %v2343_v19  ;;  %2908 = vst [vmem:[%s4305_s8 + $0x58] sm:$0xff] %v2780_v62  ;;  %v5910_v62 = vld [vmem:[#allocation33_spill] sm:$0xff] }
 0x4d4   : > { %v2569_v36 = vpop.f32.mrf.mxu2  ;;  %2390 = vmatmul.f32.gmra.mxu0 %v5235_v50 }
 0x4d5   : > { %2503 = vmatmul.f32.gmra.mxu1 %v5239_v51  ;;  %v2682_v29 = vpop.f32.mrf.mxu3  ;;  %v2570_v30 = vadd.f32 %v2569_v36, %v2457_v22  ;;  %v488_v22 = vld [vmem:[%s4305_s8 + $0x138] sm:$0xff] }
 0x4d7   : > { %v2683_v52 = vadd.f32 %v2682_v29, %v2570_v30  ;;  %v5911_v30 = vld [vmem:[#allocation34_spill] sm:$0xff] }
 0x4d9   : > { %v2784_v18 = vadd.f32 %v2683_v52, %v464_v15  ;;  %2619 = vmatmul.f32.gmra.mxu2 %v5244_v61  ;;  %v2346_v42 = vpop.f32.mrf.mxu0 }
 0x4da   : > { %v2459_v56 = vpop.f32.mrf.mxu1  ;;  %2732 = vmatmul.f32.gmra.mxu3 %v5248_v1 }
 0x4db   : > { %v2460_v46 = vadd.f32 %v2459_v56, %v2346_v42  ;;  %2912 = vst [vmem:[%s4305_s8 + $0x78] sm:$0xff] %v2784_v18  ;;  %v5912_v18 = vld [vmem:[#allocation35_spill] sm:$0xff] }
 0x4dc   : > { %v2572_v23 = vpop.f32.mrf.mxu2  ;;  %2393 = vmatmul.f32.gmra.mxu0 %v5255_v13 }
 0x4dd   : > { %2506 = vmatmul.f32.gmra.mxu1 %v5259_v14  ;;  %v2685_v50 = vpop.f32.mrf.mxu3  ;;  %v2573_v51 = vadd.f32 %v2572_v23, %v2460_v46  ;;  %v5913_v46 = vld [vmem:[#allocation36_spill] sm:$0xff]  ;;  %v5914_v23 = vld [vmem:[#allocation37_spill] sm:$0xff] }
 0x4df   : > { %v2686_v20 = vadd.f32 %v2685_v50, %v2573_v51 }
 0x4e1   : > { %v2788_v26 = vadd.f32 %v2686_v20, %v468_v24  ;;  %2622 = vmatmul.f32.gmra.mxu2 %v5266_v28  ;;  %v2349_v61 = vpop.f32.mrf.mxu0  ;;  %v492_v24 = vld [vmem:[%s4305_s8 + $0x158] sm:$0xff] }
 0x4e2   : > { %v2462_v59 = vpop.f32.mrf.mxu1  ;;  %2735 = vmatmul.f32.gmra.mxu3 %v5270_v34 }
 0x4e3   : > { %v2463_v1 = vadd.f32 %v2462_v59, %v2349_v61  ;;  %2916 = vst [vmem:[%s4305_s8 + $0x98] sm:$0xff] %v2788_v26  ;;  %v5915_v61 = vld [vmem:[#allocation38_spill] sm:$0xff] }
 0x4e4   : > { %v2575_v32 = vpop.f32.mrf.mxu2  ;;  %2396 = vmatmul.f32.gmra.mxu0 %v5275_v40 }
 0x4e5   : > { %2509 = vmatmul.f32.gmra.mxu1 %v5279_v41  ;;  %v2688_v13 = vpop.f32.mrf.mxu3  ;;  %v2576_v14 = vadd.f32 %v2575_v32, %v2463_v1  ;;  %v5916_v32 = vld [vmem:[#allocation39_spill] sm:$0xff] }
 0x4e7   : > { %v2689_v35 = vadd.f32 %v2688_v13, %v2576_v14 }
 0x4e9   : > { %v2792_v27 = vadd.f32 %v2689_v35, %v472_v16  ;;  %2625 = vmatmul.f32.gmra.mxu2 %v5284_v55  ;;  %v2352_v28 = vpop.f32.mrf.mxu0  ;;  %v5917_v16 = vld [vmem:[#allocation40_spill] sm:$0xff]  ;;  %v5918_v35 = vld [vmem:[#allocation41_spill] sm:$0xff] }
 0x4ea   : > { %v2465_v38 = vpop.f32.mrf.mxu1  ;;  %2738 = vmatmul.f32.gmra.mxu3 %v5288_v60 }
 0x4eb   : > { %v2466_v34 = vadd.f32 %v2465_v38, %v2352_v28  ;;  %2920 = vst [vmem:[%s4305_s8 + $0xb8] sm:$0xff] %v2792_v27  ;;  %v496_v38 = vld [vmem:[%s4305_s8 + $0x178] sm:$0xff] }
 0x4ec   : > { %v2578_v39 = vpop.f32.mrf.mxu2  ;;  %2399 = vmatmul.f32.gmra.mxu0 %v5295_v7 }
 0x4ed   : > { %2512 = vmatmul.f32.gmra.mxu1 %v5299_v12  ;;  %v2691_v40 = vpop.f32.mrf.mxu3  ;;  %v2579_v41 = vadd.f32 %v2578_v39, %v2466_v34 }
 0x4ef   : > { %v2692_v57 = vadd.f32 %v2691_v40, %v2579_v41  ;;  %v5919_v40 = vld [vmem:[#allocation42_spill] sm:$0xff] }
 0x4f1   : > { %v2796_v58 = vadd.f32 %v2692_v57, %v476_v44  ;;  %2628 = vmatmul.f32.gmra.mxu2 %v5306_v31  ;;  %v2355_v55 = vpop.f32.mrf.mxu0  ;;  %v5920_v57 = vld [vmem:[#allocation43_spill] sm:$0xff] }
 0x4f2   : > { %v2468_v45 = vpop.f32.mrf.mxu1  ;;  %2741 = vmatmul.f32.gmra.mxu3 %v5310_v37 }
 0x4f3   : > { %v2469_v60 = vadd.f32 %v2468_v45, %v2355_v55  ;;  %2924 = vst [vmem:[%s4305_s8 + $0xd8] sm:$0xff] %v2796_v58  ;;  %v5921_v45 = vld [vmem:[#allocation44_spill] sm:$0xff] }
 0x4f4   : > { %v2581_v6 = vpop.f32.mrf.mxu2  ;;  %2402 = vmatmul.f32.gmra.mxu0 %v5315_v47  ;;  %v5906_v47 = vld [vmem:[#allocation29_spill] sm:$0xff] }
 0x4f5   : > { %2515 = vmatmul.f32.gmra.mxu1 %v5319_v49  ;;  %v2694_v7 = vpop.f32.mrf.mxu3  ;;  %v2582_v12 = vadd.f32 %v2581_v6, %v2469_v60  ;;  %v5922_v60 = vld [vmem:[#allocation45_spill] sm:$0xff] }
 0x4f7   : > { %v2695_v33 = vadd.f32 %v2694_v7, %v2582_v12  ;;  %v500_v12 = vld [vmem:[%s4305_s8 + $0x198] sm:$0xff] }
 0x4f9   : > { %v2800_v53 = vadd.f32 %v2695_v33, %v480_v48  ;;  %2631 = vmatmul.f32.gmra.mxu2 %v5324_v3  ;;  %v2358_v31 = vpop.f32.mrf.mxu0 }
 0x4fa   : > { %v2471_v54 = vpop.f32.mrf.mxu1  ;;  %2744 = vmatmul.f32.gmra.mxu3 %v5328_v17 }
 0x4fb   : > { %v2472_v37 = vadd.f32 %v2471_v54, %v2358_v31  ;;  %2928 = vst [vmem:[%s4305_s8 + $0xf8] sm:$0xff] %v2800_v53  ;;  %v5923_v53 = vld [vmem:[#allocation46_spill] sm:$0xff] }
 0x4fc   : > { %v2584_v21 = vpop.f32.mrf.mxu2  ;;  %2405 = vmatmul.f32.gmra.mxu0 %v5905_v2 }
 0x4fd   : > { %2518 = vmatmul.f32.gmra.mxu1 %v5906_v47  ;;  %v2697_v49 = vpop.f32.mrf.mxu3  ;;  %v2585_v43 = vadd.f32 %v2584_v21, %v2472_v37  ;;  %v5924_v37 = vld [vmem:[#allocation47_spill] sm:$0xff]  ;;  %v5925_v47 = vld [vmem:[#allocation48_spill] sm:$0xff] }
 0x4ff   : > { %v2698_v5 = vadd.f32 %v2697_v49, %v2585_v43  ;;  %v5926_v49 = vld [vmem:[#allocation49_spill] sm:$0xff] }
 0x501   : > { %v2804_v4 = vadd.f32 %v2698_v5, %v484_v0  ;;  %2634 = vmatmul.f32.gmra.mxu2 %v5907_v25  ;;  %v2361_v3 = vpop.f32.mrf.mxu0  ;;  %v504_v5 = vld [vmem:[%s4305_s8 + $0x1b8] sm:$0xff] }
 0x502   : > { %v2474_v10 = vpop.f32.mrf.mxu1  ;;  %2747 = vmatmul.f32.gmra.mxu3 %v5908_v11 }
 0x503   : > { %v2475_v17 = vadd.f32 %v2474_v10, %v2361_v3  ;;  %2932 = vst [vmem:[%s4305_s8 + $0x118] sm:$0xff] %v2804_v4  ;;  %v5927_v3 = vld [vmem:[#allocation50_spill] sm:$0xff] }
 0x504   : > { %v2587_v8 = vpop.f32.mrf.mxu2  ;;  %2408 = vmatmul.f32.gmra.mxu0 %v5909_v9 }
 0x505   : > { %2521 = vmatmul.f32.gmra.mxu1 %v5910_v62  ;;  %v2700_v19 = vpop.f32.mrf.mxu3  ;;  %v2588_v63 = vadd.f32 %v2587_v8, %v2475_v17  ;;  %v5928_v17 = vld [vmem:[#allocation51_spill] sm:$0xff]  ;;  %v5929_v62 = vld [vmem:[#allocation52_spill] sm:$0xff] }
 0x507   : > { %v2701_v36 = vadd.f32 %v2700_v19, %v2588_v63  ;;  %v5930_v19 = vld [vmem:[#allocation53_spill] sm:$0xff] }
 0x509   : > { %v2808_v29 = vadd.f32 %v2701_v36, %v488_v22  ;;  %2637 = vmatmul.f32.gmra.mxu2 %v5911_v30  ;;  %v2364_v15 = vpop.f32.mrf.mxu0  ;;  %v508_v36 = vld [vmem:[%s4305_s8 + $0x1d8] sm:$0xff] }
 0x50a   : > { %v2477_v52 = vpop.f32.mrf.mxu1  ;;  %2750 = vmatmul.f32.gmra.mxu3 %v5912_v18 }
 0x50b   : > { %v2478_v42 = vadd.f32 %v2477_v52, %v2364_v15  ;;  %2936 = vst [vmem:[%s4305_s8 + $0x138] sm:$0xff] %v2808_v29  ;;  %v5931_v15 = vld [vmem:[#allocation54_spill] sm:$0xff] }
 0x50c   : > { %v2590_v56 = vpop.f32.mrf.mxu2  ;;  %2411 = vmatmul.f32.gmra.mxu0 %v5913_v46 }
 0x50d   : > { %2524 = vmatmul.f32.gmra.mxu1 %v5914_v23  ;;  %v2703_v50 = vpop.f32.mrf.mxu3  ;;  %v2591_v51 = vadd.f32 %v2590_v56, %v2478_v42  ;;  %v5932_v42 = vld [vmem:[#allocation55_spill] sm:$0xff]  ;;  %v5933_v23 = vld [vmem:[#allocation56_spill] sm:$0xff] }
 0x50f   : > { %v2704_v20 = vadd.f32 %v2703_v50, %v2591_v51  ;;  %v5934_v50 = vld [vmem:[#allocation57_spill] sm:$0xff] }
 0x511   : > { %v2812_v26 = vadd.f32 %v2704_v20, %v492_v24  ;;  %2640 = vmatmul.f32.gmra.mxu2 %v5915_v61  ;;  %v2367_v59 = vpop.f32.mrf.mxu0  ;;  %v512_v20 = vld [vmem:[%s4305_s8 + $0x1f8] sm:$0xff] }
 0x512   : > { %v2480_v1 = vpop.f32.mrf.mxu1  ;;  %2753 = vmatmul.f32.gmra.mxu3 %v5916_v32 }
 0x513   : > { %v2481_v13 = vadd.f32 %v2480_v1, %v2367_v59  ;;  %2940 = vst [vmem:[%s4305_s8 + $0x158] sm:$0xff] %v2812_v26 }
 0x514   : > { %v2593_v14 = vpop.f32.mrf.mxu2  ;;  %2414 = vmatmul.f32.gmra.mxu0 %v5917_v16 }
 0x515   : > { %2527 = vmatmul.f32.gmra.mxu1 %v5918_v35  ;;  %v2706_v27 = vpop.f32.mrf.mxu3  ;;  %v2594_v28 = vadd.f32 %v2593_v14, %v2481_v13  ;;  %v516_v35 = vld [vmem:[%s4305_s8 + $0x218] sm:$0xff] }
 0x517   : > { %v2707_v34 = vadd.f32 %v2706_v27, %v2594_v28 }
 0x519   : > { %v2816_v39 = vadd.f32 %v2707_v34, %v496_v38  ;;  %2643 = vmatmul.f32.gmra.mxu2 %v5919_v40  ;;  %v2370_v41 = vpop.f32.mrf.mxu0 }
 0x51a   : > { %v2483_v44 = vpop.f32.mrf.mxu1  ;;  %2756 = vmatmul.f32.gmra.mxu3 %v5920_v57  ;;  %v520_v57 = vld [vmem:[%s4305_s8 + $0x238] sm:$0xff] }
 0x51b   : > { %v2484_v58 = vadd.f32 %v2483_v44, %v2370_v41  ;;  %2944 = vst [vmem:[%s4305_s8 + $0x178] sm:$0xff] %v2816_v39 }
 0x51c   : > { %v2596_v55 = vpop.f32.mrf.mxu2  ;;  %2417 = vmatmul.f32.gmra.mxu0 %v5921_v45 }
 0x51d   : > { %2530 = vmatmul.f32.gmra.mxu1 %v5922_v60  ;;  %v2709_v6 = vpop.f32.mrf.mxu3  ;;  %v2597_v7 = vadd.f32 %v2596_v55, %v2484_v58 }
 0x51f   : > { %v2710_v48 = vadd.f32 %v2709_v6, %v2597_v7 }
 0x521   : > { %v2820_v33 = vadd.f32 %v2710_v48, %v500_v12  ;;  %2646 = vmatmul.f32.gmra.mxu2 %v5923_v53  ;;  %v2373_v31 = vpop.f32.mrf.mxu0 }
 0x522   : > { %v2486_v54 = vpop.f32.mrf.mxu1  ;;  %2759 = vmatmul.f32.gmra.mxu3 %v5924_v37 }
 0x523   : > { %v2487_v21 = vadd.f32 %v2486_v54, %v2373_v31  ;;  %2948 = vst [vmem:[%s4305_s8 + $0x198] sm:$0xff] %v2820_v33  ;;  %v524_v33 = vld [vmem:[%s4305_s8 + $0x258] sm:$0xff] }
 0x524   : > { %v2599_v2 = vpop.f32.mrf.mxu2  ;;  %2420 = vmatmul.f32.gmra.mxu0 %v5925_v47 }
 0x525   : > { %2533 = vmatmul.f32.gmra.mxu1 %v5926_v49  ;;  %v2712_v43 = vpop.f32.mrf.mxu3  ;;  %v2600_v0 = vadd.f32 %v2599_v2, %v2487_v21 }
 0x527   : > { %v2713_v4 = vadd.f32 %v2712_v43, %v2600_v0  ;;  %v528_v43 = vld [vmem:[%s4305_s8 + $0x278] sm:$0xff] }
 0x529   : > { %v2824_v25 = vadd.f32 %v2713_v4, %v504_v5  ;;  %2649 = vmatmul.f32.gmra.mxu2 %v5927_v3  ;;  %v2376_v10 = vpop.f32.mrf.mxu0 }
 0x52a   : > { %v2489_v11 = vpop.f32.mrf.mxu1  ;;  %2762 = vmatmul.f32.gmra.mxu3 %v5928_v17 }
 0x52b   : > { %v2490_v8 = vadd.f32 %v2489_v11, %v2376_v10  ;;  %2952 = vst [vmem:[%s4305_s8 + $0x1b8] sm:$0xff] %v2824_v25 }
 0x52c   : > { %v2602_v9 = vpop.f32.mrf.mxu2  ;;  %2423 = vmatmul.f32.gmra.mxu0 %v5929_v62 }
 0x52d   : > { %2536 = vmatmul.f32.gmra.mxu1 %v5930_v19  ;;  %v2715_v63 = vpop.f32.mrf.mxu3  ;;  %v2603_v22 = vadd.f32 %v2602_v9, %v2490_v8  ;;  %v532_v8 = vld [vmem:[%s4305_s8 + $0x298] sm:$0xff] }
 0x52f   : > { %v2716_v29 = vadd.f32 %v2715_v63, %v2603_v22 }
 0x531   : > { %v2828_v30 = vadd.f32 %v2716_v29, %v508_v36  ;;  %2652 = vmatmul.f32.gmra.mxu2 %v5931_v15  ;;  %v2379_v52 = vpop.f32.mrf.mxu0  ;;  %v536_v15 = vld [vmem:[%s4305_s8 + $0x2b8] sm:$0xff] }
 0x532   : > { %v2492_v18 = vpop.f32.mrf.mxu1  ;;  %2765 = vmatmul.f32.gmra.mxu3 %v5932_v42 }
 0x533   : > { %v2493_v56 = vadd.f32 %v2492_v18, %v2379_v52  ;;  %2956 = vst [vmem:[%s4305_s8 + $0x1d8] sm:$0xff] %v2828_v30 }
 0x534   : > { %v2605_v46 = vpop.f32.mrf.mxu2  ;;  %2426 = vmatmul.f32.gmra.mxu0 %v5933_v23 }
 0x535   : > { %2539 = vmatmul.f32.gmra.mxu1 %v5934_v50  ;;  %v2718_v51 = vpop.f32.mrf.mxu3  ;;  %v2606_v24 = vadd.f32 %v2605_v46, %v2493_v56 }
 0x537   : > { %v2719_v26 = vadd.f32 %v2718_v51, %v2606_v24  ;;  %v540_v24 = vld [vmem:[%s4305_s8 + $0x2d8] sm:$0xff] }
 0x539   : > { %v2832_v61 = vadd.f32 %v2719_v26, %v512_v20  ;;  %v2382_v59 = vpop.f32.mrf.mxu0 }
 0x53a   : > { %v2495_v1 = vpop.f32.mrf.mxu1 }
 0x53b   : > { %v2496_v32 = vadd.f32 %v2495_v1, %v2382_v59  ;;  %2960 = vst [vmem:[%s4305_s8 + $0x1f8] sm:$0xff] %v2832_v61 }
 0x53c   : > { %v2608_v13 = vpop.f32.mrf.mxu2 }
 0x53d   : > { %v2721_v14 = vpop.f32.mrf.mxu3  ;;  %v2609_v16 = vadd.f32 %v2608_v13, %v2496_v32 }
 0x53f   : > { %v2722_v27 = vadd.f32 %v2721_v14, %v2609_v16  ;;  %v544_v16 = vld [vmem:[%s4305_s8 + $0x2f8] sm:$0xff] }
 0x541   : > { %v2836_v28 = vadd.f32 %v2722_v27, %v516_v35  ;;  %v2385_v38 = vpop.f32.mrf.mxu0 }
 0x542   : > { %v2498_v34 = vpop.f32.mrf.mxu1 }
 0x543   : > { %v2499_v39 = vadd.f32 %v2498_v34, %v2385_v38  ;;  %2964 = vst [vmem:[%s4305_s8 + $0x218] sm:$0xff] %v2836_v28 }
 0x544   : > { %v2611_v40 = vpop.f32.mrf.mxu2 }
 0x545   : > { %v2724_v41 = vpop.f32.mrf.mxu3  ;;  %v2612_v44 = vadd.f32 %v2611_v40, %v2499_v39 }
 0x547   : > { %v2725_v58 = vadd.f32 %v2724_v41, %v2612_v44  ;;  %v548_v44 = vld [vmem:[%s4305_s8 + $0x318] sm:$0xff] }
 0x549   : > { %v2840_v55 = vadd.f32 %v2725_v58, %v520_v57  ;;  %v2388_v45 = vpop.f32.mrf.mxu0 }
 0x54a   : > { %v2501_v60 = vpop.f32.mrf.mxu1 }
 0x54b   : > { %v2502_v6 = vadd.f32 %v2501_v60, %v2388_v45  ;;  %2968 = vst [vmem:[%s4305_s8 + $0x238] sm:$0xff] %v2840_v55 }
 0x54c   : > { %v2614_v7 = vpop.f32.mrf.mxu2 }
 0x54d   : > { %v2727_v12 = vpop.f32.mrf.mxu3  ;;  %v2615_v48 = vadd.f32 %v2614_v7, %v2502_v6 }
 0x54f   : > { %v2728_v53 = vadd.f32 %v2727_v12, %v2615_v48  ;;  %v552_v48 = vld [vmem:[%s4305_s8 + $0x338] sm:$0xff] }
 0x551   : > { %v2844_v31 = vadd.f32 %v2728_v53, %v524_v33  ;;  %v2391_v54 = vpop.f32.mrf.mxu0 }
 0x552   : > { %v2504_v37 = vpop.f32.mrf.mxu1 }
 0x553   : > { %v2505_v21 = vadd.f32 %v2504_v37, %v2391_v54  ;;  %2972 = vst [vmem:[%s4305_s8 + $0x258] sm:$0xff] %v2844_v31 }
 0x554   : > { %v2617_v2 = vpop.f32.mrf.mxu2 }
 0x555   : > { %v2730_v47 = vpop.f32.mrf.mxu3  ;;  %v2618_v49 = vadd.f32 %v2617_v2, %v2505_v21 }
 0x557   : > { %v2731_v0 = vadd.f32 %v2730_v47, %v2618_v49  ;;  %v556_v49 = vld [vmem:[%s4305_s8 + $0x358] sm:$0xff] }
 0x559   : > { %v2848_v5 = vadd.f32 %v2731_v0, %v528_v43  ;;  %v2394_v4 = vpop.f32.mrf.mxu0 }
 0x55a   : > { %v2507_v25 = vpop.f32.mrf.mxu1 }
 0x55b   : > { %v2508_v3 = vadd.f32 %v2507_v25, %v2394_v4  ;;  %2976 = vst [vmem:[%s4305_s8 + $0x278] sm:$0xff] %v2848_v5 }
 0x55c   : > { %v2620_v10 = vpop.f32.mrf.mxu2 }
 0x55d   : > { %v2733_v11 = vpop.f32.mrf.mxu3  ;;  %v2621_v17 = vadd.f32 %v2620_v10, %v2508_v3 }
 0x55f   : > { %v2734_v9 = vadd.f32 %v2733_v11, %v2621_v17  ;;  %v560_v17 = vld [vmem:[%s4305_s8 + $0x378] sm:$0xff] }
 0x561   : > { %v2852_v62 = vadd.f32 %v2734_v9, %v532_v8  ;;  %v2397_v19 = vpop.f32.mrf.mxu0 }
 0x562   : > { %v2510_v63 = vpop.f32.mrf.mxu1 }
 0x563   : > { %v2511_v22 = vadd.f32 %v2510_v63, %v2397_v19  ;;  %2980 = vst [vmem:[%s4305_s8 + $0x298] sm:$0xff] %v2852_v62 }
 0x564   : > { %v2623_v36 = vpop.f32.mrf.mxu2 }
 0x565   : > { %v2736_v29 = vpop.f32.mrf.mxu3  ;;  %v2624_v30 = vadd.f32 %v2623_v36, %v2511_v22 }
 0x567   : > { %v2737_v52 = vadd.f32 %v2736_v29, %v2624_v30  ;;  %v564_v30 = vld [vmem:[%s4305_s8 + $0x398] sm:$0xff] }
 0x569   : > { %v2856_v18 = vadd.f32 %v2737_v52, %v536_v15  ;;  %v2400_v42 = vpop.f32.mrf.mxu0 }
 0x56a   : > { %v2513_v56 = vpop.f32.mrf.mxu1 }
 0x56b   : > { %v2514_v46 = vadd.f32 %v2513_v56, %v2400_v42  ;;  %2984 = vst [vmem:[%s4305_s8 + $0x2b8] sm:$0xff] %v2856_v18 }
 0x56c   : > { %v2626_v23 = vpop.f32.mrf.mxu2 }
 0x56d   : > { %v2739_v50 = vpop.f32.mrf.mxu3  ;;  %v2627_v51 = vadd.f32 %v2626_v23, %v2514_v46 }
 0x56f   : > { %v2740_v20 = vadd.f32 %v2739_v50, %v2627_v51  ;;  %v568_v51 = vld [vmem:[%s4305_s8 + $0x3b8] sm:$0xff] }
 0x571   : > { %v2860_v26 = vadd.f32 %v2740_v20, %v540_v24  ;;  %v2403_v61 = vpop.f32.mrf.mxu0 }
 0x572   : > { %v2516_v59 = vpop.f32.mrf.mxu1 }
 0x573   : > { %v2517_v1 = vadd.f32 %v2516_v59, %v2403_v61  ;;  %2988 = vst [vmem:[%s4305_s8 + $0x2d8] sm:$0xff] %v2860_v26 }
 0x574   : > { %v2629_v32 = vpop.f32.mrf.mxu2 }
 0x575   : > { %v2742_v13 = vpop.f32.mrf.mxu3  ;;  %v2630_v14 = vadd.f32 %v2629_v32, %v2517_v1 }
 0x577   : > { %v2743_v35 = vadd.f32 %v2742_v13, %v2630_v14  ;;  %v572_v14 = vld [vmem:[%s4305_s8 + $0x3d8] sm:$0xff] }
 0x579   : > { %v2864_v27 = vadd.f32 %v2743_v35, %v544_v16  ;;  %v2406_v28 = vpop.f32.mrf.mxu0 }
 0x57a   : > { %v2519_v38 = vpop.f32.mrf.mxu1 }
 0x57b   : > { %v2520_v34 = vadd.f32 %v2519_v38, %v2406_v28  ;;  %2992 = vst [vmem:[%s4305_s8 + $0x2f8] sm:$0xff] %v2864_v27 }
 0x57c   : > { %v2632_v39 = vpop.f32.mrf.mxu2 }
 0x57d   : > { %v2745_v40 = vpop.f32.mrf.mxu3  ;;  %v2633_v41 = vadd.f32 %v2632_v39, %v2520_v34 }
 0x57f   : > { %v2746_v57 = vadd.f32 %v2745_v40, %v2633_v41  ;;  %v576_v41 = vld [vmem:[%s4305_s8 + $0x3f8] sm:$0xff] }
 0x581   : > { %v2868_v58 = vadd.f32 %v2746_v57, %v548_v44  ;;  %v2409_v55 = vpop.f32.mrf.mxu0 }
 0x582   : > { %v2522_v45 = vpop.f32.mrf.mxu1 }
 0x583   : > { %v2523_v60 = vadd.f32 %v2522_v45, %v2409_v55  ;;  %2996 = vst [vmem:[%s4305_s8 + $0x318] sm:$0xff] %v2868_v58 }
 0x584   : > { %v2635_v6 = vpop.f32.mrf.mxu2 }
 0x585   : > { %v2748_v7 = vpop.f32.mrf.mxu3  ;;  %v2636_v12 = vadd.f32 %v2635_v6, %v2523_v60 }
 0x587   : > { %v2749_v33 = vadd.f32 %v2748_v7, %v2636_v12 }
 0x589   : > { %v2872_v53 = vadd.f32 %v2749_v33, %v552_v48  ;;  %v2412_v31 = vpop.f32.mrf.mxu0 }
 0x58a   : > { %v2525_v54 = vpop.f32.mrf.mxu1 }
 0x58b   : > { %v2526_v37 = vadd.f32 %v2525_v54, %v2412_v31  ;;  %3000 = vst [vmem:[%s4305_s8 + $0x338] sm:$0xff] %v2872_v53 }
 0x58c   : > { %v2638_v21 = vpop.f32.mrf.mxu2 }
 0x58d   : > { %v2751_v2 = vpop.f32.mrf.mxu3  ;;  %v2639_v47 = vadd.f32 %v2638_v21, %v2526_v37 }
 0x58f   : > { %v2752_v43 = vadd.f32 %v2751_v2, %v2639_v47 }
 0x591   : > { %v2876_v0 = vadd.f32 %v2752_v43, %v556_v49  ;;  %v2415_v5 = vpop.f32.mrf.mxu0 }
 0x592   : > { %v2528_v4 = vpop.f32.mrf.mxu1 }
 0x593   : > { %v2529_v25 = vadd.f32 %v2528_v4, %v2415_v5  ;;  %3004 = vst [vmem:[%s4305_s8 + $0x358] sm:$0xff] %v2876_v0 }
 0x594   : > { %v2641_v3 = vpop.f32.mrf.mxu2 }
 0x595   : > { %v2754_v10 = vpop.f32.mrf.mxu3  ;;  %v2642_v11 = vadd.f32 %v2641_v3, %v2529_v25 }
 0x597   : > { %v2755_v8 = vadd.f32 %v2754_v10, %v2642_v11 }
 0x599   : > { %v2880_v9 = vadd.f32 %v2755_v8, %v560_v17  ;;  %v2418_v62 = vpop.f32.mrf.mxu0 }
 0x59a   : > { %v2531_v19 = vpop.f32.mrf.mxu1 }
 0x59b   : > { %v2532_v63 = vadd.f32 %v2531_v19, %v2418_v62  ;;  %3008 = vst [vmem:[%s4305_s8 + $0x378] sm:$0xff] %v2880_v9 }
 0x59c   : > { %v2644_v22 = vpop.f32.mrf.mxu2 }
 0x59d   : > { %v2757_v36 = vpop.f32.mrf.mxu3  ;;  %v2645_v29 = vadd.f32 %v2644_v22, %v2532_v63 }
 0x59f   : > { %v2758_v15 = vadd.f32 %v2757_v36, %v2645_v29 }
 0x5a1   : > { %v2884_v52 = vadd.f32 %v2758_v15, %v564_v30  ;;  %v2421_v18 = vpop.f32.mrf.mxu0 }
 0x5a2   : > { %v2534_v42 = vpop.f32.mrf.mxu1 }
 0x5a3   : > { %v2535_v56 = vadd.f32 %v2534_v42, %v2421_v18  ;;  %3012 = vst [vmem:[%s4305_s8 + $0x398] sm:$0xff] %v2884_v52 }
 0x5a4   : > { %v2647_v46 = vpop.f32.mrf.mxu2 }
 0x5a5   : > { %v2760_v23 = vpop.f32.mrf.mxu3  ;;  %v2648_v50 = vadd.f32 %v2647_v46, %v2535_v56 }
 0x5a7   : > { %v2761_v24 = vadd.f32 %v2760_v23, %v2648_v50 }
 0x5a9   : > { %v2888_v20 = vadd.f32 %v2761_v24, %v568_v51  ;;  %v2424_v26 = vpop.f32.mrf.mxu0 }
 0x5aa   : > { %v2537_v61 = vpop.f32.mrf.mxu1 }
 0x5ab   : > { %v2538_v59 = vadd.f32 %v2537_v61, %v2424_v26  ;;  %3016 = vst [vmem:[%s4305_s8 + $0x3b8] sm:$0xff] %v2888_v20 }
 0x5ac   : > { %v2650_v1 = vpop.f32.mrf.mxu2 }
 0x5ad   : > { %v2763_v32 = vpop.f32.mrf.mxu3  ;;  %v2651_v13 = vadd.f32 %v2650_v1, %v2538_v59 }
 0x5af   : > { %v2764_v16 = vadd.f32 %v2763_v32, %v2651_v13 }
 0x5b1   : > { %v2892_v35 = vadd.f32 %v2764_v16, %v572_v14  ;;  %v2427_v27 = vpop.f32.mrf.mxu0 }
 0x5b2   : > { %v2540_v28 = vpop.f32.mrf.mxu1 }
 0x5b3   : > { %v2541_v38 = vadd.f32 %v2540_v28, %v2427_v27  ;;  %3020 = vst [vmem:[%s4305_s8 + $0x3d8] sm:$0xff] %v2892_v35 }
 0x5b4   : > { %v2653_v34 = vpop.f32.mrf.mxu2 }
 0x5b5   : > { %v2766_v39 = vpop.f32.mrf.mxu3  ;;  %v2654_v40 = vadd.f32 %v2653_v34, %v2541_v38 }
 0x5b7   : > { %v2767_v44 = vadd.f32 %v2766_v39, %v2654_v40 }
 0x5b9   : > { %v2896_v57 = vadd.f32 %v2767_v44, %v576_v41 }
 0x5bb   : > { %3024 = vst [vmem:[%s4305_s8 + $0x3f8] sm:$0xff] %v2896_v57 }
 0x5bc   : > { %3824 = shalt.err (!%p3821_p7)
}
 0x5bd   : > { %s3997_s25 = smov 512   ;;  %s3998_s8 = smov 1024  }
 0x5be   : > { %s3999_s2 = smov 32  }
 0x5bf   : > { %3224 = dma.vmem_to_hbm [thread:$0]  (%p4259_p5), %s3042_s9, 16384, %s3044_s11, %s3026_s12, %s3997_s25, %s3998_s8, %s3999_s2  }
 0x5c0 PF: > { %s5940_s29 = sld [smem:[#allocation13_spill]]  ;;  %p3241_p0 = scmp.ge.s32.totalorder %s3991_s30, 2 }
 0x5c2   : > { %p3237_p9 = pnand %p3241_p0, %p4271_p1 }
 0x5c4   : > { %p3238_p8 = pneg %p3237_p9 }
 0x5c6   : > { %s3058_s27 = sand.u32 1, %s5940_s29  }
 0x5c7   : > { %s3059_s0 = scalar_lea.sflag [#allocation4], %s3058_s27 }
 0x5c8   : > { %3914 = dma.done.wait (%p3238_p8), %s3059_s0, 16384  }
 0x5c9   : > { %3916 = vsyncadd (%p3238_p8), %s3059_s0, 4294950912  ;;  %s22_s30 = sadd.s32 1, %s3991_s30   ;;  %s5943_s12 = sld [smem:[#allocation14_spill]] }
 0x5ca   : > { %p5723_p13 = scmp.ge.s32.totalorder %s22_s30, 14   ;;  %s5944_s15 = sld [smem:[#allocation16_spill]] }
 0x5cb   : > { %s5945_s10 = sld [smem:[#allocation17_spill]]  ;;  %s5952_s13 = smov %s3927_s14 }
 0x5cc   : > { %s5946_s20 = sld [smem:[#allocation25_spill]]  ;;  %s5954_s14 = smov %s4207_s1 }
 0x5cd   : > { %s5947_s9 = sld [smem:[#allocation27_spill]]  ;;  %s5956_s16 = smov %s3939_s17 }
 0x5ce   : > { %s5948_s24 = sld [smem:[#allocation21_spill]]  ;;  %s5957_s17 = smov %s4240_s7 }
 0x5cf   : > { %s5949_s26 = sld [smem:[#allocation22_spill]]  ;;  %s5958_s18 = smov %s3947_s19 }
 0x5d0   : > { %s5950_s27 = sld [smem:[#allocation23_spill]]  ;;  %s5960_s21 = smov %s3959_s22 }
 0x5d1   : > { %s5951_s11 = sld [smem:[#allocation24_spill]]  ;;  %s5959_s19 = smov %s5945_s10 }
 0x5d2   : > { %s5953_s29 = sld [smem:[#allocation26_spill]]  ;;  %s5961_s22 = smov %s3963_s23 }
 0x5d3   : > { %s5962_s23 = smov %s5947_s9  ;;  %s5963_s25 = smov %s3983_s28 }
 0x5d4   :  { %21 = sbr.rel (!%p5723_p13) target bundleno = 20 (0x14), region = 105 }
 0x5d7   : > { %s5964_s28 = smov %s5951_s11 }
 0x5d9   :  { %3065 = vsyncpa [#allocation3], 1 }
 0x5da   :  { %3067 = vsyncpa [#allocation3 + $0x1], 1 }
 0x5db   :  { %3068 = vsyncpa [#allocation6], 1 }
 0x5dc   :  { %3070 = vsyncpa [#allocation6 + $0x1], 1 }
 0x5dd   :  { %3071 = vsyncpa [#allocation4], 1 }
 0x5de   :  { %3073 = vsyncpa [#allocation4 + $0x1], 1 }

</bundles_post_ra>
